<compile_context>
chip_gen: v5e
topology: v5e:2x2
jax: 0.10.0
libtpu: 0.0.40
codegen_flags: <defaults>
</compile_context>

<pallas_src>
import functools
import numpy as np

import jax
import jax.numpy as jnp
from jax import lax
from jax.experimental import pallas as pl
from jax.experimental.pallas import tpu as pltpu

_BN_EPS = 1e-5
_PAD_L = 8   # left halo columns in the padded scratch (keeps interior stores 8-aligned)
_PAD_R = 8   # right halo columns (only 1 is needed; 8 keeps the width a multiple of 8)


def _round_up(x, m):
    return ((x + m - 1) // m) * m


# ----------------------------------------------------------------------------
# Fused RRB kernel: one grid step == one image, everything resident in VMEM
# ----------------------------------------------------------------------------
def _rrb_kernel(x_ref, w1_ref, b1_ref, w2_ref, b2_ref, w3_ref, b3_ref,
                o_ref, p1_ref, p2_ref):
    _, H, W, Cin_p = x_ref.shape
    Cp = o_ref.shape[-1]
    HW = H * W

    # ---- conv1: 1x1 + bias (no activation); bf16 MXU, f32 accumulate --------
    x = x_ref[0].reshape(HW, Cin_p)                                   # bf16
    x1 = jnp.dot(x, w1_ref[...], preferred_element_type=jnp.float32) + b1_ref[...]

    # ---- stash x1 into a zero-padded spatial halo buffer --------------------
    # (serves as conv2 input AND as the f32 residual read back at the end)
    p1_ref[...] = jnp.zeros_like(p1_ref)
    p1_ref[1:H + 1, _PAD_L:_PAD_L + W, :] = x1.reshape(H, W, Cp)

    def conv3x3(p_ref, w_ref):
        # 9 shifted-window reads of the halo buffer; one bf16 MXU dot per tap.
        acc = jnp.zeros((HW, Cp), jnp.float32)
        for u in range(3):
            for v in range(3):
                c0 = _PAD_L - 1 + v
                a = p_ref[u:u + H, c0:c0 + W, :]
                a = a.reshape(HW, Cp).astype(jnp.bfloat16)
                acc = acc + jnp.dot(a, w_ref[u * 3 + v],
                                    preferred_element_type=jnp.float32)
        return acc

    # ---- conv2 (3x3) + folded eval-mode BN + ReLU ----------------------------
    r2 = jnp.maximum(conv3x3(p1_ref, w2_ref) + b2_ref[...], 0.0)

    p2_ref[...] = jnp.zeros_like(p2_ref)
    p2_ref[1:H + 1, _PAD_L:_PAD_L + W, :] = r2.reshape(H, W, Cp)

    # ---- conv3 (3x3) + bias + residual(x1) + ReLU ----------------------------
    res = conv3x3(p2_ref, w3_ref) + b3_ref[...]
    x1_res = p1_ref[1:H + 1, _PAD_L:_PAD_L + W, :].reshape(HW, Cp)    # f32 residual
    out = jnp.maximum(x1_res + res, 0.0)
    o_ref[...] = out.reshape(1, H, W, Cp).astype(o_ref.dtype)


@functools.lru_cache(maxsize=None)
def _build_rrb_call(N, H, W, Cin_p, Cp):
    HW = H * W
    pw = _PAD_L + W + _PAD_R            # halo-buffer width (multiple of 8)

    # VMEM footprint (double-buffered inputs/outputs + halo scratch) -> limit.
    buf_bytes = (2 * HW * Cin_p * 2                     # x block (bf16) x2
                 + 2 * HW * Cp * 4                      # out block (f32) x2
                 + 2 * ((Cin_p * Cp + 18 * Cp * Cp) * 2 + 3 * Cp * 4)  # weights/bias x2
                 + 2 * (H + 2) * pw * Cp * 4)           # two halo scratch buffers
    vmem_limit = int(min(96 * 1024 * 1024, 2 * buf_bytes + (8 << 20)))

    flops = 2 * N * HW * Cp * (Cin_p + 18 * Cp)
    bytes_accessed = int(N * HW * Cin_p * 2 + N * HW * Cp * 4
                         + (Cin_p * Cp + 18 * Cp * Cp) * 2 + 3 * Cp * 4)

    return pl.pallas_call(
        _rrb_kernel,
        out_shape=jax.ShapeDtypeStruct((N, H, W, Cp), jnp.float32),
        grid_spec=pltpu.PrefetchScalarGridSpec(
            num_scalar_prefetch=0,
            grid=(N,),
            in_specs=[
                pl.BlockSpec((1, H, W, Cin_p), lambda b: (b, 0, 0, 0)),   # x (bf16)
                pl.BlockSpec((Cin_p, Cp), lambda b: (0, 0)),              # w1 (bf16)
                pl.BlockSpec((1, Cp), lambda b: (0, 0)),                  # b1 (f32)
                pl.BlockSpec((9, Cp, Cp), lambda b: (0, 0, 0)),           # w2 (BN folded)
                pl.BlockSpec((1, Cp), lambda b: (0, 0)),                  # b2
                pl.BlockSpec((9, Cp, Cp), lambda b: (0, 0, 0)),           # w3
                pl.BlockSpec((1, Cp), lambda b: (0, 0)),                  # b3
            ],
            out_specs=pl.BlockSpec((1, H, W, Cp), lambda b: (b, 0, 0, 0)),
            scratch_shapes=[pltpu.VMEM((H + 2, pw, Cp), jnp.float32),     # x1 halo
                            pltpu.VMEM((H + 2, pw, Cp), jnp.float32)],    # r2 halo
        ),
        compiler_params=pltpu.CompilerParams(
            dimension_semantics=("parallel",),          # batch splits across TCs (v7x)
            vmem_limit_bytes=vmem_limit),
        cost_estimate=pl.CostEstimate(flops=flops, transcendentals=0,
                                      bytes_accessed=bytes_accessed),
    )


# ----------------------------------------------------------------------------
# Parameter construction: PyTorch-like init, BN folded, pre-packed for Pallas
# ----------------------------------------------------------------------------
def make_rrb_params(key, in_channels, out_channels, kernel_size=3):
    assert kernel_size == 3
    cin_p = _round_up(in_channels, 128)
    cout_p = _round_up(out_channels, 128)
    ks = jax.random.split(key, 10)

    def conv_init(kw_, kb_, kh, kwid, cin, cout):
        fan_in = kh * kwid * cin
        bound = 1.0 / np.sqrt(fan_in)
        w = jax.random.uniform(kw_, (kh, kwid, cin, cout), jnp.float32, -bound, bound)
        b = jax.random.uniform(kb_, (cout,), jnp.float32, -bound, bound)
        return w, b

    w1, b1 = conv_init(ks[0], ks[1], 1, 1, in_channels, out_channels)
    w2, b2 = conv_init(ks[2], ks[3], 3, 3, out_channels, out_channels)
    w3, b3 = conv_init(ks[4], ks[5], 3, 3, out_channels, out_channels)

    # eval-mode BatchNorm (running stats) folded into conv2
    # TODO(synk): training-mode BatchNorm (batch statistics) not implemented.
    gamma = 1.0 + 0.1 * jax.random.normal(ks[6], (out_channels,), jnp.float32)
    beta = 0.1 * jax.random.normal(ks[7], (out_channels,), jnp.float32)
    running_mean = 0.1 * jax.random.normal(ks[8], (out_channels,), jnp.float32)
    running_var = 1.0 + 0.1 * jax.random.uniform(ks[9], (out_channels,), jnp.float32)
    scale = gamma / jnp.sqrt(running_var + _BN_EPS)

    w2f = w2 * scale[None, None, None, :]
    b2f = (b2 - running_mean) * scale + beta

    # ---- pre-pack once: pad to 128 lanes, tap-major (9, Cp, Cp), cast bf16 ----
    def pack_1x1(w, cinp, coutp):
        cin, cout = w.shape[2], w.shape[3]
        wm = jnp.zeros((cinp, coutp), jnp.float32).at[:cin, :cout].set(w[0, 0])
        return wm.astype(jnp.bfloat16)

    def pack_3x3(w, cinp, coutp):
        kh, kwid, cin, cout = w.shape
        wm = jnp.zeros((kh * kwid, cinp, coutp), jnp.float32)
        wm = wm.at[:, :cin, :cout].set(w.reshape(kh * kwid, cin, cout))
        return wm.astype(jnp.bfloat16)

    def pack_bias(b, coutp):
        return jnp.zeros((1, coutp), jnp.float32).at[0, :b.shape[0]].set(b)

    params = {
        'w1': pack_1x1(w1, cin_p, cout_p), 'b1': pack_bias(b1, cout_p),
        'w2': pack_3x3(w2f, cout_p, cout_p), 'b2': pack_bias(b2f, cout_p),
        'w3': pack_3x3(w3, cout_p, cout_p), 'b3': pack_bias(b3, cout_p),
    }
    raw = {'w1': w1, 'b1': b1, 'w2': w2, 'b2': b2, 'w3': w3, 'b3': b3,
           'gamma': gamma, 'beta': beta, 'mean': running_mean, 'var': running_var}
    return params, raw


# ----------------------------------------------------------------------------
# RRB forward (NCHW in, NCHW out)
# ----------------------------------------------------------------------------
@functools.partial(jax.jit, static_argnames=('cout',))
def rrb_forward(x_nchw, params, *, cout):
    N, Cin, H, W = x_nchw.shape
    Cin_p, Cp = params['w1'].shape
    assert W % 8 == 0, "spatial width must be a multiple of 8 (pad spatially otherwise)"
    # TODO(synk): for large H*W the per-image block no longer fits VMEM; tile the
    # image over row bands with a 1-row halo instead of one block per image.

    # NCHW -> NHWC, pad channels once, bf16 (lane-dense layout end-to-end)
    x = jnp.transpose(x_nchw, (0, 2, 3, 1))
    x = jnp.pad(x, ((0, 0), (0, 0), (0, 0), (0, Cin_p - Cin))).astype(jnp.bfloat16)

    out = _build_rrb_call(N, H, W, Cin_p, Cp)(
        x, params['w1'], params['b1'], params['w2'], params['b2'],
        params['w3'], params['b3'])

    return jnp.transpose(out[..., :cout], (0, 3, 1, 2))                 # NCHW


# ----------------------------------------------------------------------------
# Pure-JAX reference (f32, HIGHEST precision) for a correctness check
# ----------------------------------------------------------------------------
def rrb_reference(x_nchw, raw):
    x = jnp.transpose(x_nchw, (0, 2, 3, 1)).astype(jnp.float32)
    dn = ('NHWC', 'HWIO', 'NHWC')

    def conv(inp, w, b, pad):
        y = lax.conv_general_dilated(inp, w, (1, 1), [(pad, pad), (pad, pad)],
                                     dimension_numbers=dn,
                                     precision=lax.Precision.HIGHEST)
        return y + b[None, None, None, :]

    x1 = conv(x, raw['w1'], raw['b1'], 0)
    r = conv(x1, raw['w2'], raw['b2'], 1)
    r = (r - raw['mean']) / jnp.sqrt(raw['var'] + _BN_EPS) * raw['gamma'] + raw['beta']
    r = jnp.maximum(r, 0.0)
    r = conv(r, raw['w3'], raw['b3'], 1)
    out = jnp.maximum(x1 + r, 0.0)
    return jnp.transpose(out, (0, 3, 1, 2))


# ----------------------------------------------------------------------------
if __name__ == "__main__":
    key = jax.random.PRNGKey(0)
    pkey, xkey = jax.random.split(key)

    in_channels, out_channels = 4, 64
    params, raw = make_rrb_params(pkey, in_channels, out_channels)
    x = jax.random.normal(xkey, (2, in_channels, 16, 16), jnp.float32)   # NCHW input

    out = rrb_forward(x, params, cout=out_channels)
    out = jax.block_until_ready(out)

    assert out.shape == (2, out_channels, 16, 16)
    assert bool(jnp.all(jnp.isfinite(out)))

    ref = rrb_reference(x, raw)
    max_err = float(jnp.max(jnp.abs(out - ref)))
    assert bool(jnp.allclose(out, ref, rtol=5e-2, atol=5e-2)), f"max abs err {max_err}"

    print("KERNEL_OK")
</pallas_src>

<mosaic_0001>
module attributes {stable_mosaic.version = 11 : i64} {
  func.func @_rrb_kernel(%arg0: i32, %arg1: memref<1x16x16x128xbf16, #tpu.memory_space<vmem>>, %arg2: memref<128x128xbf16, #tpu.memory_space<vmem>>, %arg3: memref<1x128xf32, #tpu.memory_space<vmem>>, %arg4: memref<9x128x128xbf16, #tpu.memory_space<vmem>>, %arg5: memref<1x128xf32, #tpu.memory_space<vmem>>, %arg6: memref<9x128x128xbf16, #tpu.memory_space<vmem>>, %arg7: memref<1x128xf32, #tpu.memory_space<vmem>>, %arg8: memref<1x16x16x128xf32, #tpu.memory_space<vmem>>, %arg9: memref<18x32x128xf32, #tpu.memory_space<vmem>>, %arg10: memref<18x32x128xf32, #tpu.memory_space<vmem>>) attributes {dimension_semantics = [#tpu.dimension_semantics<parallel>], iteration_bounds = array<i64: 2>, scalar_prefetch = 0 : i64, scratch_operands = 2 : i64, tpu.core_type = #tpu.core_type<tc>, window_params = [{transform_indices = @transform_0, window_bounds = array<i64: 1, 16, 16, 128>}, {pipeline_mode = #tpu.pipeline_mode<synchronous>, transform_indices = @transform_1, window_bounds = array<i64: 128, 128>}, {pipeline_mode = #tpu.pipeline_mode<synchronous>, transform_indices = @transform_2, window_bounds = array<i64: 1, 128>}, {pipeline_mode = #tpu.pipeline_mode<synchronous>, transform_indices = @transform_3, window_bounds = array<i64: 9, 128, 128>}, {pipeline_mode = #tpu.pipeline_mode<synchronous>, transform_indices = @transform_4, window_bounds = array<i64: 1, 128>}, {pipeline_mode = #tpu.pipeline_mode<synchronous>, transform_indices = @transform_5, window_bounds = array<i64: 9, 128, 128>}, {pipeline_mode = #tpu.pipeline_mode<synchronous>, transform_indices = @transform_6, window_bounds = array<i64: 1, 128>}, {transform_indices = @transform_7, window_bounds = array<i64: 1, 16, 16, 128>}]} {
    %c0 = arith.constant 0 : index
    %c0_0 = arith.constant 0 : index
    %c0_1 = arith.constant 0 : index
    %c0_2 = arith.constant 0 : index
    %0 = vector.load %arg1[%c0, %c0_0, %c0_1, %c0_2] : memref<1x16x16x128xbf16, #tpu.memory_space<vmem>>, vector<1x16x16x128xbf16>
    %1 = vector.shape_cast %0 : vector<1x16x16x128xbf16> to vector<16x16x128xbf16>
    %2 = vector.shape_cast %1 : vector<16x16x128xbf16> to vector<256x128xbf16>
    %c0_3 = arith.constant 0 : index
    %c0_4 = arith.constant 0 : index
    %3 = vector.load %arg2[%c0_3, %c0_4] : memref<128x128xbf16, #tpu.memory_space<vmem>>, vector<128x128xbf16>
    %cst = arith.constant dense<0.000000e+00> : vector<256x128xf32>
    %4 = tpu.matmul %2, %3, %cst {dimension_numbers = #tpu.dot_dimension_numbers<[1], [0], [0], [1], [0, 0, 1, 1], [], []>} : vector<256x128xbf16>, vector<128x128xbf16>, vector<256x128xf32> -> vector<256x128xf32>
    %c0_5 = arith.constant 0 : index
    %c0_6 = arith.constant 0 : index
    %5 = vector.load %arg3[%c0_5, %c0_6] : memref<1x128xf32, #tpu.memory_space<vmem>>, vector<1x128xf32>
    %6 = vector.broadcast %5 : vector<1x128xf32> to vector<256x128xf32>
    %7 = arith.addf %4, %6 : vector<256x128xf32>
    %cst_7 = arith.constant 0.000000e+00 : f32
    %8 = vector.broadcast %cst_7 : f32 to vector<18x32x128xf32>
    %c0_8 = arith.constant 0 : index
    %c0_9 = arith.constant 0 : index
    %c0_10 = arith.constant 0 : index
    %9 = vector.load %arg9[%c0_8, %c0_9, %c0_10] : memref<18x32x128xf32, #tpu.memory_space<vmem>>, vector<18x32x128xf32>
    tpu.vector_store %arg9[%c0_8, %c0_9, %c0_10], %8 {strides = array<i32>} : memref<18x32x128xf32, #tpu.memory_space<vmem>>, vector<18x32x128xf32>,
    %10 = vector.shape_cast %7 : vector<256x128xf32> to vector<16x16x128xf32>
    %c1 = arith.constant 1 : index
    %c8 = arith.constant 8 : index
    %c0_11 = arith.constant 0 : index
    %11 = vector.load %arg9[%c1, %c8, %c0_11] : memref<18x32x128xf32, #tpu.memory_space<vmem>>, vector<16x16x128xf32>
    tpu.vector_store %arg9[%c1, %c8, %c0_11], %10 {strides = array<i32>} : memref<18x32x128xf32, #tpu.memory_space<vmem>>, vector<16x16x128xf32>,
    %cst_12 = arith.constant 0.000000e+00 : f32
    %12 = vector.broadcast %cst_12 : f32 to vector<256x128xf32>
    %c0_13 = arith.constant 0 : index
    %c7 = arith.constant 7 : index
    %c0_14 = arith.constant 0 : index
    %13 = vector.load %arg9[%c0_13, %c7, %c0_14] : memref<18x32x128xf32, #tpu.memory_space<vmem>>, vector<16x16x128xf32>
    %14 = vector.shape_cast %13 : vector<16x16x128xf32> to vector<256x128xf32>
    %15 = arith.truncf %14 : vector<256x128xf32> to vector<256x128xbf16>
    %c0_15 = arith.constant 0 : index
    %c0_16 = arith.constant 0 : index
    %c0_17 = arith.constant 0 : index
    %16 = vector.load %arg4[%c0_15, %c0_16, %c0_17] : memref<9x128x128xbf16, #tpu.memory_space<vmem>>, vector<1x128x128xbf16>
    %17 = vector.shape_cast %16 : vector<1x128x128xbf16> to vector<128x128xbf16>
    %cst_18 = arith.constant dense<0.000000e+00> : vector<256x128xf32>
    %18 = tpu.matmul %15, %17, %cst_18 {dimension_numbers = #tpu.dot_dimension_numbers<[1], [0], [0], [1], [0, 0, 1, 1], [], []>} : vector<256x128xbf16>, vector<128x128xbf16>, vector<256x128xf32> -> vector<256x128xf32>
    %19 = arith.addf %12, %18 : vector<256x128xf32>
    %c0_19 = arith.constant 0 : index
    %c8_20 = arith.constant 8 : index
    %c0_21 = arith.constant 0 : index
    %20 = vector.load %arg9[%c0_19, %c8_20, %c0_21] : memref<18x32x128xf32, #tpu.memory_space<vmem>>, vector<16x16x128xf32>
    %21 = vector.shape_cast %20 : vector<16x16x128xf32> to vector<256x128xf32>
    %22 = arith.truncf %21 : vector<256x128xf32> to vector<256x128xbf16>
    %c1_22 = arith.constant 1 : index
    %c0_23 = arith.constant 0 : index
    %c0_24 = arith.constant 0 : index
    %23 = vector.load %arg4[%c1_22, %c0_23, %c0_24] : memref<9x128x128xbf16, #tpu.memory_space<vmem>>, vector<1x128x128xbf16>
    %24 = vector.shape_cast %23 : vector<1x128x128xbf16> to vector<128x128xbf16>
    %cst_25 = arith.constant dense<0.000000e+00> : vector<256x128xf32>
    %25 = tpu.matmul %22, %24, %cst_25 {dimension_numbers = #tpu.dot_dimension_numbers<[1], [0], [0], [1], [0, 0, 1, 1], [], []>} : vector<256x128xbf16>, vector<128x128xbf16>, vector<256x128xf32> -> vector<256x128xf32>
    %26 = arith.addf %19, %25 : vector<256x128xf32>
    %c0_26 = arith.constant 0 : index
    %c9 = arith.constant 9 : index
    %c0_27 = arith.constant 0 : index
    %27 = vector.load %arg9[%c0_26, %c9, %c0_27] : memref<18x32x128xf32, #tpu.memory_space<vmem>>, vector<16x16x128xf32>
    %28 = vector.shape_cast %27 : vector<16x16x128xf32> to vector<256x128xf32>
    %29 = arith.truncf %28 : vector<256x128xf32> to vector<256x128xbf16>
    %c2 = arith.constant 2 : index
    %c0_28 = arith.constant 0 : index
    %c0_29 = arith.constant 0 : index
    %30 = vector.load %arg4[%c2, %c0_28, %c0_29] : memref<9x128x128xbf16, #tpu.memory_space<vmem>>, vector<1x128x128xbf16>
    %31 = vector.shape_cast %30 : vector<1x128x128xbf16> to vector<128x128xbf16>
    %cst_30 = arith.constant dense<0.000000e+00> : vector<256x128xf32>
    %32 = tpu.matmul %29, %31, %cst_30 {dimension_numbers = #tpu.dot_dimension_numbers<[1], [0], [0], [1], [0, 0, 1, 1], [], []>} : vector<256x128xbf16>, vector<128x128xbf16>, vector<256x128xf32> -> vector<256x128xf32>
    %33 = arith.addf %26, %32 : vector<256x128xf32>
    %c1_31 = arith.constant 1 : index
    %c7_32 = arith.constant 7 : index
    %c0_33 = arith.constant 0 : index
    %34 = vector.load %arg9[%c1_31, %c7_32, %c0_33] : memref<18x32x128xf32, #tpu.memory_space<vmem>>, vector<16x16x128xf32>
    %35 = vector.shape_cast %34 : vector<16x16x128xf32> to vector<256x128xf32>
    %36 = arith.truncf %35 : vector<256x128xf32> to vector<256x128xbf16>
    %c3 = arith.constant 3 : index
    %c0_34 = arith.constant 0 : index
    %c0_35 = arith.constant 0 : index
    %37 = vector.load %arg4[%c3, %c0_34, %c0_35] : memref<9x128x128xbf16, #tpu.memory_space<vmem>>, vector<1x128x128xbf16>
    %38 = vector.shape_cast %37 : vector<1x128x128xbf16> to vector<128x128xbf16>
    %cst_36 = arith.constant dense<0.000000e+00> : vector<256x128xf32>
    %39 = tpu.matmul %36, %38, %cst_36 {dimension_numbers = #tpu.dot_dimension_numbers<[1], [0], [0], [1], [0, 0, 1, 1], [], []>} : vector<256x128xbf16>, vector<128x128xbf16>, vector<256x128xf32> -> vector<256x128xf32>
    %40 = arith.addf %33, %39 : vector<256x128xf32>
    %c1_37 = arith.constant 1 : index
    %c8_38 = arith.constant 8 : index
    %c0_39 = arith.constant 0 : index
    %41 = vector.load %arg9[%c1_37, %c8_38, %c0_39] : memref<18x32x128xf32, #tpu.memory_space<vmem>>, vector<16x16x128xf32>
    %42 = vector.shape_cast %41 : vector<16x16x128xf32> to vector<256x128xf32>
    %43 = arith.truncf %42 : vector<256x128xf32> to vector<256x128xbf16>
    %c4 = arith.constant 4 : index
    %c0_40 = arith.constant 0 : index
    %c0_41 = arith.constant 0 : index
    %44 = vector.load %arg4[%c4, %c0_40, %c0_41] : memref<9x128x128xbf16, #tpu.memory_space<vmem>>, vector<1x128x128xbf16>
    %45 = vector.shape_cast %44 : vector<1x128x128xbf16> to vector<128x128xbf16>
    %cst_42 = arith.constant dense<0.000000e+00> : vector<256x128xf32>
    %46 = tpu.matmul %43, %45, %cst_42 {dimension_numbers = #tpu.dot_dimension_numbers<[1], [0], [0], [1], [0, 0, 1, 1], [], []>} : vector<256x128xbf16>, vector<128x128xbf16>, vector<256x128xf32> -> vector<256x128xf32>
    %47 = arith.addf %40, %46 : vector<256x128xf32>
    %c1_43 = arith.constant 1 : index
    %c9_44 = arith.constant 9 : index
    %c0_45 = arith.constant 0 : index
    %48 = vector.load %arg9[%c1_43, %c9_44, %c0_45] : memref<18x32x128xf32, #tpu.memory_space<vmem>>, vector<16x16x128xf32>
    %49 = vector.shape_cast %48 : vector<16x16x128xf32> to vector<256x128xf32>
    %50 = arith.truncf %49 : vector<256x128xf32> to vector<256x128xbf16>
    %c5 = arith.constant 5 : index
    %c0_46 = arith.constant 0 : index
    %c0_47 = arith.constant 0 : index
    %51 = vector.load %arg4[%c5, %c0_46, %c0_47] : memref<9x128x128xbf16, #tpu.memory_space<vmem>>, vector<1x128x128xbf16>
    %52 = vector.shape_cast %51 : vector<1x128x128xbf16> to vector<128x128xbf16>
    %cst_48 = arith.constant dense<0.000000e+00> : vector<256x128xf32>
    %53 = tpu.matmul %50, %52, %cst_48 {dimension_numbers = #tpu.dot_dimension_numbers<[1], [0], [0], [1], [0, 0, 1, 1], [], []>} : vector<256x128xbf16>, vector<128x128xbf16>, vector<256x128xf32> -> vector<256x128xf32>
    %54 = arith.addf %47, %53 : vector<256x128xf32>
    %c2_49 = arith.constant 2 : index
    %c7_50 = arith.constant 7 : index
    %c0_51 = arith.constant 0 : index
    %55 = vector.load %arg9[%c2_49, %c7_50, %c0_51] : memref<18x32x128xf32, #tpu.memory_space<vmem>>, vector<16x16x128xf32>
    %56 = vector.shape_cast %55 : vector<16x16x128xf32> to vector<256x128xf32>
    %57 = arith.truncf %56 : vector<256x128xf32> to vector<256x128xbf16>
    %c6 = arith.constant 6 : index
    %c0_52 = arith.constant 0 : index
    %c0_53 = arith.constant 0 : index
    %58 = vector.load %arg4[%c6, %c0_52, %c0_53] : memref<9x128x128xbf16, #tpu.memory_space<vmem>>, vector<1x128x128xbf16>
    %59 = vector.shape_cast %58 : vector<1x128x128xbf16> to vector<128x128xbf16>
    %cst_54 = arith.constant dense<0.000000e+00> : vector<256x128xf32>
    %60 = tpu.matmul %57, %59, %cst_54 {dimension_numbers = #tpu.dot_dimension_numbers<[1], [0], [0], [1], [0, 0, 1, 1], [], []>} : vector<256x128xbf16>, vector<128x128xbf16>, vector<256x128xf32> -> vector<256x128xf32>
    %61 = arith.addf %54, %60 : vector<256x128xf32>
    %c2_55 = arith.constant 2 : index
    %c8_56 = arith.constant 8 : index
    %c0_57 = arith.constant 0 : index
    %62 = vector.load %arg9[%c2_55, %c8_56, %c0_57] : memref<18x32x128xf32, #tpu.memory_space<vmem>>, vector<16x16x128xf32>
    %63 = vector.shape_cast %62 : vector<16x16x128xf32> to vector<256x128xf32>
    %64 = arith.truncf %63 : vector<256x128xf32> to vector<256x128xbf16>
    %c7_58 = arith.constant 7 : index
    %c0_59 = arith.constant 0 : index
    %c0_60 = arith.constant 0 : index
    %65 = vector.load %arg4[%c7_58, %c0_59, %c0_60] : memref<9x128x128xbf16, #tpu.memory_space<vmem>>, vector<1x128x128xbf16>
    %66 = vector.shape_cast %65 : vector<1x128x128xbf16> to vector<128x128xbf16>
    %cst_61 = arith.constant dense<0.000000e+00> : vector<256x128xf32>
    %67 = tpu.matmul %64, %66, %cst_61 {dimension_numbers = #tpu.dot_dimension_numbers<[1], [0], [0], [1], [0, 0, 1, 1], [], []>} : vector<256x128xbf16>, vector<128x128xbf16>, vector<256x128xf32> -> vector<256x128xf32>
    %68 = arith.addf %61, %67 : vector<256x128xf32>
    %c2_62 = arith.constant 2 : index
    %c9_63 = arith.constant 9 : index
    %c0_64 = arith.constant 0 : index
    %69 = vector.load %arg9[%c2_62, %c9_63, %c0_64] : memref<18x32x128xf32, #tpu.memory_space<vmem>>, vector<16x16x128xf32>
    %70 = vector.shape_cast %69 : vector<16x16x128xf32> to vector<256x128xf32>
    %71 = arith.truncf %70 : vector<256x128xf32> to vector<256x128xbf16>
    %c8_65 = arith.constant 8 : index
    %c0_66 = arith.constant 0 : index
    %c0_67 = arith.constant 0 : index
    %72 = vector.load %arg4[%c8_65, %c0_66, %c0_67] : memref<9x128x128xbf16, #tpu.memory_space<vmem>>, vector<1x128x128xbf16>
    %73 = vector.shape_cast %72 : vector<1x128x128xbf16> to vector<128x128xbf16>
    %cst_68 = arith.constant dense<0.000000e+00> : vector<256x128xf32>
    %74 = tpu.matmul %71, %73, %cst_68 {dimension_numbers = #tpu.dot_dimension_numbers<[1], [0], [0], [1], [0, 0, 1, 1], [], []>} : vector<256x128xbf16>, vector<128x128xbf16>, vector<256x128xf32> -> vector<256x128xf32>
    %75 = arith.addf %68, %74 : vector<256x128xf32>
    %c0_69 = arith.constant 0 : index
    %c0_70 = arith.constant 0 : index
    %76 = vector.load %arg5[%c0_69, %c0_70] : memref<1x128xf32, #tpu.memory_space<vmem>>, vector<1x128xf32>
    %77 = vector.broadcast %76 : vector<1x128xf32> to vector<256x128xf32>
    %78 = arith.addf %75, %77 : vector<256x128xf32>
    %cst_71 = arith.constant 0.000000e+00 : f32
    %79 = vector.broadcast %cst_71 : f32 to vector<256x128xf32>
    %80 = arith.maximumf %78, %79 : vector<256x128xf32>
    %cst_72 = arith.constant 0.000000e+00 : f32
    %81 = vector.broadcast %cst_72 : f32 to vector<18x32x128xf32>
    %c0_73 = arith.constant 0 : index
    %c0_74 = arith.constant 0 : index
    %c0_75 = arith.constant 0 : index
    %82 = vector.load %arg10[%c0_73, %c0_74, %c0_75] : memref<18x32x128xf32, #tpu.memory_space<vmem>>, vector<18x32x128xf32>
    tpu.vector_store %arg10[%c0_73, %c0_74, %c0_75], %81 {strides = array<i32>} : memref<18x32x128xf32, #tpu.memory_space<vmem>>, vector<18x32x128xf32>,
    %83 = vector.shape_cast %80 : vector<256x128xf32> to vector<16x16x128xf32>
    %c1_76 = arith.constant 1 : index
    %c8_77 = arith.constant 8 : index
    %c0_78 = arith.constant 0 : index
    %84 = vector.load %arg10[%c1_76, %c8_77, %c0_78] : memref<18x32x128xf32, #tpu.memory_space<vmem>>, vector<16x16x128xf32>
    tpu.vector_store %arg10[%c1_76, %c8_77, %c0_78], %83 {strides = array<i32>} : memref<18x32x128xf32, #tpu.memory_space<vmem>>, vector<16x16x128xf32>,
    %cst_79 = arith.constant 0.000000e+00 : f32
    %85 = vector.broadcast %cst_79 : f32 to vector<256x128xf32>
    %c0_80 = arith.constant 0 : index
    %c7_81 = arith.constant 7 : index
    %c0_82 = arith.constant 0 : index
    %86 = vector.load %arg10[%c0_80, %c7_81, %c0_82] : memref<18x32x128xf32, #tpu.memory_space<vmem>>, vector<16x16x128xf32>
    %87 = vector.shape_cast %86 : vector<16x16x128xf32> to vector<256x128xf32>
    %88 = arith.truncf %87 : vector<256x128xf32> to vector<256x128xbf16>
    %c0_83 = arith.constant 0 : index
    %c0_84 = arith.constant 0 : index
    %c0_85 = arith.constant 0 : index
    %89 = vector.load %arg6[%c0_83, %c0_84, %c0_85] : memref<9x128x128xbf16, #tpu.memory_space<vmem>>, vector<1x128x128xbf16>
    %90 = vector.shape_cast %89 : vector<1x128x128xbf16> to vector<128x128xbf16>
    %cst_86 = arith.constant dense<0.000000e+00> : vector<256x128xf32>
    %91 = tpu.matmul %88, %90, %cst_86 {dimension_numbers = #tpu.dot_dimension_numbers<[1], [0], [0], [1], [0, 0, 1, 1], [], []>} : vector<256x128xbf16>, vector<128x128xbf16>, vector<256x128xf32> -> vector<256x128xf32>
    %92 = arith.addf %85, %91 : vector<256x128xf32>
    %c0_87 = arith.constant 0 : index
    %c8_88 = arith.constant 8 : index
    %c0_89 = arith.constant 0 : index
    %93 = vector.load %arg10[%c0_87, %c8_88, %c0_89] : memref<18x32x128xf32, #tpu.memory_space<vmem>>, vector<16x16x128xf32>
    %94 = vector.shape_cast %93 : vector<16x16x128xf32> to vector<256x128xf32>
    %95 = arith.truncf %94 : vector<256x128xf32> to vector<256x128xbf16>
    %c1_90 = arith.constant 1 : index
    %c0_91 = arith.constant 0 : index
    %c0_92 = arith.constant 0 : index
    %96 = vector.load %arg6[%c1_90, %c0_91, %c0_92] : memref<9x128x128xbf16, #tpu.memory_space<vmem>>, vector<1x128x128xbf16>
    %97 = vector.shape_cast %96 : vector<1x128x128xbf16> to vector<128x128xbf16>
    %cst_93 = arith.constant dense<0.000000e+00> : vector<256x128xf32>
    %98 = tpu.matmul %95, %97, %cst_93 {dimension_numbers = #tpu.dot_dimension_numbers<[1], [0], [0], [1], [0, 0, 1, 1], [], []>} : vector<256x128xbf16>, vector<128x128xbf16>, vector<256x128xf32> -> vector<256x128xf32>
    %99 = arith.addf %92, %98 : vector<256x128xf32>
    %c0_94 = arith.constant 0 : index
    %c9_95 = arith.constant 9 : index
    %c0_96 = arith.constant 0 : index
    %100 = vector.load %arg10[%c0_94, %c9_95, %c0_96] : memref<18x32x128xf32, #tpu.memory_space<vmem>>, vector<16x16x128xf32>
    %101 = vector.shape_cast %100 : vector<16x16x128xf32> to vector<256x128xf32>
    %102 = arith.truncf %101 : vector<256x128xf32> to vector<256x128xbf16>
    %c2_97 = arith.constant 2 : index
    %c0_98 = arith.constant 0 : index
    %c0_99 = arith.constant 0 : index
    %103 = vector.load %arg6[%c2_97, %c0_98, %c0_99] : memref<9x128x128xbf16, #tpu.memory_space<vmem>>, vector<1x128x128xbf16>
    %104 = vector.shape_cast %103 : vector<1x128x128xbf16> to vector<128x128xbf16>
    %cst_100 = arith.constant dense<0.000000e+00> : vector<256x128xf32>
    %105 = tpu.matmul %102, %104, %cst_100 {dimension_numbers = #tpu.dot_dimension_numbers<[1], [0], [0], [1], [0, 0, 1, 1], [], []>} : vector<256x128xbf16>, vector<128x128xbf16>, vector<256x128xf32> -> vector<256x128xf32>
    %106 = arith.addf %99, %105 : vector<256x128xf32>
    %c1_101 = arith.constant 1 : index
    %c7_102 = arith.constant 7 : index
    %c0_103 = arith.constant 0 : index
    %107 = vector.load %arg10[%c1_101, %c7_102, %c0_103] : memref<18x32x128xf32, #tpu.memory_space<vmem>>, vector<16x16x128xf32>
    %108 = vector.shape_cast %107 : vector<16x16x128xf32> to vector<256x128xf32>
    %109 = arith.truncf %108 : vector<256x128xf32> to vector<256x128xbf16>
    %c3_104 = arith.constant 3 : index
    %c0_105 = arith.constant 0 : index
    %c0_106 = arith.constant 0 : index
    %110 = vector.load %arg6[%c3_104, %c0_105, %c0_106] : memref<9x128x128xbf16, #tpu.memory_space<vmem>>, vector<1x128x128xbf16>
    %111 = vector.shape_cast %110 : vector<1x128x128xbf16> to vector<128x128xbf16>
    %cst_107 = arith.constant dense<0.000000e+00> : vector<256x128xf32>
    %112 = tpu.matmul %109, %111, %cst_107 {dimension_numbers = #tpu.dot_dimension_numbers<[1], [0], [0], [1], [0, 0, 1, 1], [], []>} : vector<256x128xbf16>, vector<128x128xbf16>, vector<256x128xf32> -> vector<256x128xf32>
    %113 = arith.addf %106, %112 : vector<256x128xf32>
    %c1_108 = arith.constant 1 : index
    %c8_109 = arith.constant 8 : index
    %c0_110 = arith.constant 0 : index
    %114 = vector.load %arg10[%c1_108, %c8_109, %c0_110] : memref<18x32x128xf32, #tpu.memory_space<vmem>>, vector<16x16x128xf32>
    %115 = vector.shape_cast %114 : vector<16x16x128xf32> to vector<256x128xf32>
    %116 = arith.truncf %115 : vector<256x128xf32> to vector<256x128xbf16>
    %c4_111 = arith.constant 4 : index
    %c0_112 = arith.constant 0 : index
    %c0_113 = arith.constant 0 : index
    %117 = vector.load %arg6[%c4_111, %c0_112, %c0_113] : memref<9x128x128xbf16, #tpu.memory_space<vmem>>, vector<1x128x128xbf16>
    %118 = vector.shape_cast %117 : vector<1x128x128xbf16> to vector<128x128xbf16>
    %cst_114 = arith.constant dense<0.000000e+00> : vector<256x128xf32>
    %119 = tpu.matmul %116, %118, %cst_114 {dimension_numbers = #tpu.dot_dimension_numbers<[1], [0], [0], [1], [0, 0, 1, 1], [], []>} : vector<256x128xbf16>, vector<128x128xbf16>, vector<256x128xf32> -> vector<256x128xf32>
    %120 = arith.addf %113, %119 : vector<256x128xf32>
    %c1_115 = arith.constant 1 : index
    %c9_116 = arith.constant 9 : index
    %c0_117 = arith.constant 0 : index
    %121 = vector.load %arg10[%c1_115, %c9_116, %c0_117] : memref<18x32x128xf32, #tpu.memory_space<vmem>>, vector<16x16x128xf32>
    %122 = vector.shape_cast %121 : vector<16x16x128xf32> to vector<256x128xf32>
    %123 = arith.truncf %122 : vector<256x128xf32> to vector<256x128xbf16>
    %c5_118 = arith.constant 5 : index
    %c0_119 = arith.constant 0 : index
    %c0_120 = arith.constant 0 : index
    %124 = vector.load %arg6[%c5_118, %c0_119, %c0_120] : memref<9x128x128xbf16, #tpu.memory_space<vmem>>, vector<1x128x128xbf16>
    %125 = vector.shape_cast %124 : vector<1x128x128xbf16> to vector<128x128xbf16>
    %cst_121 = arith.constant dense<0.000000e+00> : vector<256x128xf32>
    %126 = tpu.matmul %123, %125, %cst_121 {dimension_numbers = #tpu.dot_dimension_numbers<[1], [0], [0], [1], [0, 0, 1, 1], [], []>} : vector<256x128xbf16>, vector<128x128xbf16>, vector<256x128xf32> -> vector<256x128xf32>
    %127 = arith.addf %120, %126 : vector<256x128xf32>
    %c2_122 = arith.constant 2 : index
    %c7_123 = arith.constant 7 : index
    %c0_124 = arith.constant 0 : index
    %128 = vector.load %arg10[%c2_122, %c7_123, %c0_124] : memref<18x32x128xf32, #tpu.memory_space<vmem>>, vector<16x16x128xf32>
    %129 = vector.shape_cast %128 : vector<16x16x128xf32> to vector<256x128xf32>
    %130 = arith.truncf %129 : vector<256x128xf32> to vector<256x128xbf16>
    %c6_125 = arith.constant 6 : index
    %c0_126 = arith.constant 0 : index
    %c0_127 = arith.constant 0 : index
    %131 = vector.load %arg6[%c6_125, %c0_126, %c0_127] : memref<9x128x128xbf16, #tpu.memory_space<vmem>>, vector<1x128x128xbf16>
    %132 = vector.shape_cast %131 : vector<1x128x128xbf16> to vector<128x128xbf16>
    %cst_128 = arith.constant dense<0.000000e+00> : vector<256x128xf32>
    %133 = tpu.matmul %130, %132, %cst_128 {dimension_numbers = #tpu.dot_dimension_numbers<[1], [0], [0], [1], [0, 0, 1, 1], [], []>} : vector<256x128xbf16>, vector<128x128xbf16>, vector<256x128xf32> -> vector<256x128xf32>
    %134 = arith.addf %127, %133 : vector<256x128xf32>
    %c2_129 = arith.constant 2 : index
    %c8_130 = arith.constant 8 : index
    %c0_131 = arith.constant 0 : index
    %135 = vector.load %arg10[%c2_129, %c8_130, %c0_131] : memref<18x32x128xf32, #tpu.memory_space<vmem>>, vector<16x16x128xf32>
    %136 = vector.shape_cast %135 : vector<16x16x128xf32> to vector<256x128xf32>
    %137 = arith.truncf %136 : vector<256x128xf32> to vector<256x128xbf16>
    %c7_132 = arith.constant 7 : index
    %c0_133 = arith.constant 0 : index
    %c0_134 = arith.constant 0 : index
    %138 = vector.load %arg6[%c7_132, %c0_133, %c0_134] : memref<9x128x128xbf16, #tpu.memory_space<vmem>>, vector<1x128x128xbf16>
    %139 = vector.shape_cast %138 : vector<1x128x128xbf16> to vector<128x128xbf16>
    %cst_135 = arith.constant dense<0.000000e+00> : vector<256x128xf32>
    %140 = tpu.matmul %137, %139, %cst_135 {dimension_numbers = #tpu.dot_dimension_numbers<[1], [0], [0], [1], [0, 0, 1, 1], [], []>} : vector<256x128xbf16>, vector<128x128xbf16>, vector<256x128xf32> -> vector<256x128xf32>
    %141 = arith.addf %134, %140 : vector<256x128xf32>
    %c2_136 = arith.constant 2 : index
    %c9_137 = arith.constant 9 : index
    %c0_138 = arith.constant 0 : index
    %142 = vector.load %arg10[%c2_136, %c9_137, %c0_138] : memref<18x32x128xf32, #tpu.memory_space<vmem>>, vector<16x16x128xf32>
    %143 = vector.shape_cast %142 : vector<16x16x128xf32> to vector<256x128xf32>
    %144 = arith.truncf %143 : vector<256x128xf32> to vector<256x128xbf16>
    %c8_139 = arith.constant 8 : index
    %c0_140 = arith.constant 0 : index
    %c0_141 = arith.constant 0 : index
    %145 = vector.load %arg6[%c8_139, %c0_140, %c0_141] : memref<9x128x128xbf16, #tpu.memory_space<vmem>>, vector<1x128x128xbf16>
    %146 = vector.shape_cast %145 : vector<1x128x128xbf16> to vector<128x128xbf16>
    %cst_142 = arith.constant dense<0.000000e+00> : vector<256x128xf32>
    %147 = tpu.matmul %144, %146, %cst_142 {dimension_numbers = #tpu.dot_dimension_numbers<[1], [0], [0], [1], [0, 0, 1, 1], [], []>} : vector<256x128xbf16>, vector<128x128xbf16>, vector<256x128xf32> -> vector<256x128xf32>
    %148 = arith.addf %141, %147 : vector<256x128xf32>
    %c0_143 = arith.constant 0 : index
    %c0_144 = arith.constant 0 : index
    %149 = vector.load %arg7[%c0_143, %c0_144] : memref<1x128xf32, #tpu.memory_space<vmem>>, vector<1x128xf32>
    %150 = vector.broadcast %149 : vector<1x128xf32> to vector<256x128xf32>
    %151 = arith.addf %148, %150 : vector<256x128xf32>
    %c1_145 = arith.constant 1 : index
    %c8_146 = arith.constant 8 : index
    %c0_147 = arith.constant 0 : index
    %152 = vector.load %arg9[%c1_145, %c8_146, %c0_147] : memref<18x32x128xf32, #tpu.memory_space<vmem>>, vector<16x16x128xf32>
    %153 = vector.shape_cast %152 : vector<16x16x128xf32> to vector<256x128xf32>
    %154 = arith.addf %153, %151 : vector<256x128xf32>
    %cst_148 = arith.constant 0.000000e+00 : f32
    %155 = vector.broadcast %cst_148 : f32 to vector<256x128xf32>
    %156 = arith.maximumf %154, %155 : vector<256x128xf32>
    %157 = vector.shape_cast %156 : vector<256x128xf32> to vector<1x16x16x128xf32>
    %c0_149 = arith.constant 0 : index
    %c0_150 = arith.constant 0 : index
    %c0_151 = arith.constant 0 : index
    %c0_152 = arith.constant 0 : index
    %158 = vector.load %arg8[%c0_149, %c0_150, %c0_151, %c0_152] : memref<1x16x16x128xf32, #tpu.memory_space<vmem>>, vector<1x16x16x128xf32>
    tpu.vector_store %arg8[%c0_149, %c0_150, %c0_151, %c0_152], %157 {strides = array<i32>} : memref<1x16x16x128xf32, #tpu.memory_space<vmem>>, vector<1x16x16x128xf32>,
    return
  }
  func.func @transform_0(%arg0: i32) -> (i32, i32, i32, i32) {
    %c0_i32 = arith.constant 0 : i32
    %c0_i32_0 = arith.constant 0 : i32
    %c0_i32_1 = arith.constant 0 : i32
    %c0_i32_2 = arith.constant 0 : i32
    return %arg0, %c0_i32, %c0_i32_0, %c0_i32_1 : i32, i32, i32, i32
  }
  func.func @transform_1(%arg0: i32) -> (i32, i32) {
    %c0_i32 = arith.constant 0 : i32
    %c0_i32_0 = arith.constant 0 : i32
    %c0_i32_1 = arith.constant 0 : i32
    return %c0_i32, %c0_i32_0 : i32, i32
  }
  func.func @transform_2(%arg0: i32) -> (i32, i32) {
    %c0_i32 = arith.constant 0 : i32
    %c0_i32_0 = arith.constant 0 : i32
    %c0_i32_1 = arith.constant 0 : i32
    return %c0_i32, %c0_i32_0 : i32, i32
  }
  func.func @transform_3(%arg0: i32) -> (i32, i32, i32) {
    %c0_i32 = arith.constant 0 : i32
    %c0_i32_0 = arith.constant 0 : i32
    %c0_i32_1 = arith.constant 0 : i32
    %c0_i32_2 = arith.constant 0 : i32
    return %c0_i32, %c0_i32_0, %c0_i32_1 : i32, i32, i32
  }
  func.func @transform_4(%arg0: i32) -> (i32, i32) {
    %c0_i32 = arith.constant 0 : i32
    %c0_i32_0 = arith.constant 0 : i32
    %c0_i32_1 = arith.constant 0 : i32
    return %c0_i32, %c0_i32_0 : i32, i32
  }
  func.func @transform_5(%arg0: i32) -> (i32, i32, i32) {
    %c0_i32 = arith.constant 0 : i32
    %c0_i32_0 = arith.constant 0 : i32
    %c0_i32_1 = arith.constant 0 : i32
    %c0_i32_2 = arith.constant 0 : i32
    return %c0_i32, %c0_i32_0, %c0_i32_1 : i32, i32, i32
  }
  func.func @transform_6(%arg0: i32) -> (i32, i32) {
    %c0_i32 = arith.constant 0 : i32
    %c0_i32_0 = arith.constant 0 : i32
    %c0_i32_1 = arith.constant 0 : i32
    return %c0_i32, %c0_i32_0 : i32, i32
  }
  func.func @transform_7(%arg0: i32) -> (i32, i32, i32, i32) {
    %c0_i32 = arith.constant 0 : i32
    %c0_i32_0 = arith.constant 0 : i32
    %c0_i32_1 = arith.constant 0 : i32
    %c0_i32_2 = arith.constant 0 : i32
    return %arg0, %c0_i32, %c0_i32_0, %c0_i32_1 : i32, i32, i32, i32
  }
}

</mosaic_0001>

<bundles_post_ra>
// kernel: rrb_forward.1
= control target key start
LH: loop header
LB: loop body
LE: loop exit
PB: predicated region body
PF: predicated region fallthrough
CT: control target
= control target key end

     0   :  { %12 = vsyncpa [#allocation5], 0  ;;  %s6296_s24 = smov 0   ;;  %s8464_s0 = inlined_call_operand.vmem [shape: bf16[2,16,16,128], index: 0, kind: input, shape index: {}]   ;;  %s8465_s1 = inlined_call_operand.vmem [shape: bf16[128,128], index: 1, kind: input, shape index: {}]   ;;  %s8466_s2 = inlined_call_operand.vmem [shape: f32[1,128], index: 2, kind: input, shape index: {}]   ;;  %s8467_s3 = inlined_call_operand.vmem [shape: bf16[9,128,128], index: 3, kind: input, shape index: {}]   ;;  %s8468_s4 = inlined_call_operand.vmem [shape: f32[1,128], index: 4, kind: input, shape index: {}]   ;;  %s8469_s5 = inlined_call_operand.hbm [shape: bf16[9,128,128], index: 5, kind: input, shape index: {}]   ;;  %s8470_s6 = inlined_call_operand.vmem [shape: f32[1,128], index: 6, kind: input, shape index: {}]   ;;  %s8471_s7 = inlined_call_operand.vmem [shape: f32[2,16,16,128], index: 7, kind: output, shape index: {}]  }
   0x1 LB: > { %s224_s27 = sshll.u32 %s8469_s5, 4  ;;  %s6305_s28 = sadd.s32 4294967295, %s6249_s24   ;;  %s6249_s24 = sphi %s6296_s24, %s18_s24   ;;  %s225_s27 = int_to_ptr.hbm [resolvable:$true] %s224_s27 }
   0x2   : > { %p5176_p0 = scmp.ge.s32.totalorder %s6249_s24, 1  ;;  %p201_p1 = scmp.lt.s32.totalorder %s6249_s24, 3 }
   0x3   : > { %p6189_p2 = scmp.eq.s32.totalorder %s6305_s28, 0  ;;  %s6251_s29 = smov [#allocation4]  }
   0x4   : > { %p202_p3 = pnand %p5176_p0, %p201_p1  ;;  %s226_s30 = sshll.u32 %s6251_s29, 4  ;;  %s227_s30 = int_to_ptr.vmem [resolvable:$true] %s226_s30 }
   0x5   : > { %s6252_s8 = smov 64   ;;  %s6253_s9 = smov 4  }
   0x6   : > { %p6185_p4 = pneg %p202_p3  ;;  %253 = sbr.rel (%p202_p3) target bundleno = 1779 (0x6f3), region = 48 }
   0x8   : > { %p6186_p5 = pnand %p6189_p2, %p6185_p4 }
   0xa   : > { %6188 = dma.hbm_to_vmem [thread:$0]  (!%p6186_p5), %s225_s27, 9216, %s227_s30, [#allocation5], %s6252_s8, %s6252_s8, %s6253_s9  }
   0xb   : > { %6244 = dma.done.wait (%p6189_p2), [#allocation5], 9216  }
   0xc   : > { %6246 = vsyncadd (%p6189_p2), [#allocation5], 4294958080  ;;  %v6012_v0 = vld [vmem:[%s8465_s1 + $0x38] sm:$0xff]  ;;  %v6011_v1 = vld [vmem:[%s8465_s1 + $0x30] sm:$0xff]  ;;  %p286_p6 = scmp.lt.s32.totalorder %s6305_s28, 1  ;;  %v6254_v29 = vmov 0.0  }
   0xd   : > { %492 = vmatpush.bf16.msra.mxu0 %v6012_v0  ;;  %6157 = vmatpush.bf16.msra.mxu3 %v6012_v0  ;;  %v6010_v2 = vld [vmem:[%s8465_s1 + $0x28] sm:$0xff]  ;;  %v6009_v3 = vld [vmem:[%s8465_s1 + $0x20] sm:$0xff]  ;;  %v6008_v4 = vld [vmem:[%s8465_s1 + $0x18] sm:$0xff]  ;;  %581 = vst [vmem:[#allocation2] sm:$0xff] %v6254_v29  ;;  %v6255_v30 = vmov 0.0|0.0  }
   0xe   : > { %v6007_v5 = vld [vmem:[%s8465_s1 + $0x10] sm:$0xff]  ;;  %s8831_s28 = smov (!%p286_p6, %s6305_s28), 1  ;;  %v6006_v6 = vld [vmem:[%s8465_s1 + $0x8] sm:$0xff]  ;;  %v6005_v7 = vld [vmem:[%s8465_s1] sm:$0xff]  ;;  %582 = vst [vmem:[#allocation2 + $0x8] sm:$0xff] %v6254_v29 }
   0xf   : > { %s5987_s25 = sshll.u32 %s8831_s28, 7  ;;  %v6028_v12 = vld [vmem:[%s8467_s3 + $0x78] sm:$0xff]  ;;  %v6027_v14 = vld [vmem:[%s8467_s3 + $0x70] sm:$0xff]  ;;  %v6026_v16 = vld [vmem:[%s8467_s3 + $0x68] sm:$0xff]  ;;  %583 = vst [vmem:[#allocation2 + $0x10] sm:$0xff] %v6254_v29  ;;  %s5988_s16 = sshll.u32 %s8831_s28, 8 }
  0x10   : > { %s6342_s8 = scalar_lea.vmem %s8464_s0, %s5987_s25  ;;  %863 = vmatpush.bf16.msra.mxu1 %v6028_v12  ;;  %v6358_v15 = vld [vmem:[%s8467_s3 + $0x38] sm:$0xff]  ;;  %v6367_v17 = vld [vmem:[%s8467_s3 + $0x30] sm:$0xff]  ;;  %v6025_v18 = vld [vmem:[%s8467_s3 + $0x60] sm:$0xff]  ;;  %584 = vst [vmem:[#allocation2 + $0x18] sm:$0xff] %v6254_v29  ;;  %s8299_s19 = scalar_lea.vmem %s8471_s7, %s5988_s16 }
  0x11   : > { %493 = vmatpush.bf16.msra.mxu0 %v6011_v1  ;;  %6158 = vmatpush.bf16.msra.mxu3 %v6011_v1  ;;  %v5989_v8 = vld [vmem:[%s6342_s8] sm:$0xff]  ;;  %v5990_v9 = vld [vmem:[%s6342_s8 + $0x8] sm:$0xff]  ;;  %v5991_v10 = vld [vmem:[%s6342_s8 + $0x10] sm:$0xff]  ;;  %585 = vst [vmem:[#allocation2 + $0x20] sm:$0xff] %v6254_v29 }
  0x12   : > { %v5992_v11 = vld [vmem:[%s6342_s8 + $0x18] sm:$0xff]  ;;  %v5993_v13 = vld [vmem:[%s6342_s8 + $0x20] sm:$0xff]  ;;  %1000 = vmatpush.bf16.msra.mxu2 %v6358_v15  ;;  %v6376_v19 = vld [vmem:[%s8467_s3 + $0x28] sm:$0xff]  ;;  %588 = vst [vmem:[#allocation2 + $0x38] sm:$0xff] %v6254_v29 }
  0x13   : > { %v6024_v20 = vld [vmem:[%s8467_s3 + $0x58] sm:$0xff]  ;;  %v6385_v21 = vld [vmem:[%s8467_s3 + $0x20] sm:$0xff]  ;;  %v5994_v22 = vld [vmem:[%s6342_s8 + $0x28] sm:$0xff]  ;;  %589 = vst [vmem:[#allocation2 + $0x40] sm:$0xff] %v6254_v29 }
  0x14   : > { %864 = vmatpush.bf16.msra.mxu1 %v6027_v14  ;;  %v6023_v23 = vld [vmem:[%s8467_s3 + $0x50] sm:$0xff]  ;;  %v6395_v24 = vld [vmem:[%s8467_s3 + $0x18] sm:$0xff]  ;;  %v6022_v25 = vld [vmem:[%s8467_s3 + $0x48] sm:$0xff]  ;;  %592 = vst [vmem:[#allocation2 + $0x58] sm:$0xff] %v6254_v29 }
  0x15   : > { %494 = vmatpush.bf16.msra.mxu0 %v6010_v2  ;;  %6159 = vmatpush.bf16.msra.mxu3 %v6010_v2  ;;  %v6404_v26 = vld [vmem:[%s8467_s3 + $0x10] sm:$0xff]  ;;  %v6021_v27 = vld [vmem:[%s8467_s3 + $0x40] sm:$0xff]  ;;  %v6413_v28 = vld [vmem:[%s8467_s3 + $0x8] sm:$0xff]  ;;  %593 = vst [vmem:[#allocation2 + $0x60] sm:$0xff] %v6254_v29 }
  0x16   : > { %1001 = vmatpush.bf16.msra.mxu2 %v6367_v17  ;;  %v5995_v31 = vld [vmem:[%s6342_s8 + $0x30] sm:$0xff]  ;;  %v6426_v32 = vld [vmem:[%s8467_s3] sm:$0xff]  ;;  %596 = vst [vmem:[#allocation2 + $0x78] sm:$0xff] %v6254_v29  ;;  %v5996_v36 = vld [vmem:[%s6342_s8 + $0x38] sm:$0xff] }
  0x17   : > { %v686_v33 = vld [vmem:[#allocation2 + $0x7] sm:$0xff]  ;;  %v687_v34 = vld [vmem:[#allocation2 + $0xf] sm:$0xff]  ;;  %597 = vst [vmem:[#allocation2 + $0x80] sm:$0xff] %v6254_v29  ;;  %v6461_v37 = vld [vmem:[%s8466_s2] ss:$0 sm:$0xff] }
  0x18   : > { %865 = vmatpush.bf16.msra.mxu1 %v6026_v16  ;;  %v718_v35 = vpack.c.bf16 %v687_v34, %v686_v33  ;;  %600 = vst [vmem:[#allocation2 + $0x98] sm:$0xff] %v6254_v29  ;;  %v5997_v38 = vld [vmem:[%s6342_s8 + $0x40] sm:$0xff]  ;;  %v5998_v44 = vld [vmem:[%s6342_s8 + $0x48] sm:$0xff]  ;;  %v6044_v46 = vld [vmem:[%s8467_s3 + $0xf8] sm:$0xff] }
  0x19   : > { %495 = vmatpush.bf16.msra.mxu0 %v6009_v3  ;;  %6160 = vmatpush.bf16.msra.mxu3 %v6009_v3  ;;  %601 = vst [vmem:[#allocation2 + $0xa0] sm:$0xff] %v6254_v29  ;;  %v5999_v51 = vld [vmem:[%s6342_s8 + $0x50] sm:$0xff]  ;;  %v6001_v54 = vld [vmem:[%s6342_s8 + $0x60] sm:$0xff]  ;;  %v6042_v56 = vld [vmem:[%s8467_s3 + $0xe8] sm:$0xff] }
  0x1a   : > { %1002 = vmatpush.bf16.msra.mxu2 %v6376_v19  ;;  %604 = vst [vmem:[#allocation2 + $0xb8] sm:$0xff] %v6254_v29  ;;  %v6043_v53 = vld [vmem:[%s8467_s3 + $0xf0] sm:$0xff]  ;;  %v6041_v60 = vld [vmem:[%s8467_s3 + $0xe0] sm:$0xff]  ;;  %v6000_v61 = vld [vmem:[%s6342_s8 + $0x58] sm:$0xff] }
  0x1b   : > { %605 = vst [vmem:[#allocation2 + $0xc0] sm:$0xff] %v6254_v29  ;;  %v6040_v63 = vld [vmem:[%s8467_s3 + $0xd8] sm:$0xff] }
  0x1c   : > { %866 = vmatpush.bf16.msra.mxu1 %v6025_v18  ;;  %608 = vst [vmem:[#allocation2 + $0xd8] sm:$0xff] %v6254_v29 }
  0x1d   : > { %496 = vmatpush.bf16.msra.mxu0 %v6008_v4  ;;  %6161 = vmatpush.bf16.msra.mxu3 %v6008_v4  ;;  %609 = vst [vmem:[#allocation2 + $0xe0] sm:$0xff] %v6254_v29  ;;  %v6039_v4 = vld [vmem:[%s8467_s3 + $0xd0] sm:$0xff] }
  0x1e   : > { %1003 = vmatpush.bf16.msra.mxu2 %v6385_v21  ;;  %612 = vst [vmem:[#allocation2 + $0xf8] sm:$0xff] %v6254_v29 }
  0x1f   : > { %613 = vst [vmem:[#allocation2 + $0x100] sm:$0xff] %v6254_v29 }
  0x20   : > { %867 = vmatpush.bf16.msra.mxu1 %v6024_v20  ;;  %616 = vst [vmem:[#allocation2 + $0x118] sm:$0xff] %v6254_v29 }
  0x21   : > { %497 = vmatpush.bf16.msra.mxu0 %v6007_v5  ;;  %6162 = vmatpush.bf16.msra.mxu3 %v6007_v5  ;;  %617 = vst [vmem:[#allocation2 + $0x120] sm:$0xff] %v6254_v29  ;;  %v6002_v5 = vld [vmem:[%s6342_s8 + $0x68] sm:$0xff] }
  0x22   : > { %1004 = vmatpush.bf16.msra.mxu2 %v6395_v24  ;;  %620 = vst [vmem:[#allocation2 + $0x138] sm:$0xff] %v6254_v29 }
  0x23   : > { %621 = vst [vmem:[#allocation2 + $0x140] sm:$0xff] %v6254_v29 }
  0x24   : > { %868 = vmatpush.bf16.msra.mxu1 %v6023_v23  ;;  %624 = vst [vmem:[#allocation2 + $0x158] sm:$0xff] %v6254_v29 }
  0x25   : > { %498 = vmatpush.bf16.msra.mxu0 %v6006_v6  ;;  %6163 = vmatpush.bf16.msra.mxu3 %v6006_v6  ;;  %625 = vst [vmem:[#allocation2 + $0x160] sm:$0xff] %v6254_v29 }
  0x26   : > { %1005 = vmatpush.bf16.msra.mxu2 %v6404_v26  ;;  %628 = vst [vmem:[#allocation2 + $0x178] sm:$0xff] %v6254_v29 }
  0x27   : > { %629 = vst [vmem:[#allocation2 + $0x180] sm:$0xff] %v6254_v29 }
  0x28   : > { %869 = vmatpush.bf16.msra.mxu1 %v6022_v25  ;;  %632 = vst [vmem:[#allocation2 + $0x198] sm:$0xff] %v6254_v29 }
  0x29   : > { %499 = vmatpush.bf16.msra.mxu0 %v6005_v7  ;;  %6164 = vmatpush.bf16.msra.mxu3 %v6005_v7  ;;  %633 = vst [vmem:[#allocation2 + $0x1a0] sm:$0xff] %v6254_v29  ;;  %v6038_v7 = vld [vmem:[%s8467_s3 + $0xc8] sm:$0xff] }
  0x2a   : > { %1006 = vmatpush.bf16.msra.mxu2 %v6413_v28  ;;  %636 = vst [vmem:[#allocation2 + $0x1b8] sm:$0xff] %v6254_v29 }
  0x2b   : > { %637 = vst [vmem:[#allocation2 + $0x1c0] sm:$0xff] %v6254_v29 }
  0x2c   : > { %500 = vmatmul.bf16.vlgmr.msra.gmra.mxu0 %v5989_v8  ;;  %870 = vmatpush.bf16.msra.mxu1 %v6021_v27  ;;  %640 = vst [vmem:[#allocation2 + $0x1d8] sm:$0xff] %v6254_v29 }
  0x2d   : > { %6165 = vmatpush.bf16.msrb.mxu3 %v6028_v12  ;;  %641 = vst [vmem:[#allocation2 + $0x1e0] sm:$0xff] %v6254_v29  ;;  %1436 = vmatpush.bf16.msrb.mxu0 %v6044_v46 }
  0x2e   : > { %1007 = vmatpush.bf16.msra.mxu2 %v6426_v32  ;;  %644 = vst [vmem:[#allocation2 + $0x1f8] sm:$0xff] %v6254_v29  ;;  %560 = vmatmul.bf16.vlgmr.msra.gmra.mxu3 %v6001_v54 }
  0x2f   : > { %871 = vmatmul.bf16.vlgmr.msra.gmra.mxu1 %v6255_v30  ;;  %645 = vst [vmem:[#allocation2 + $0x200] sm:$0xff] %v6254_v29 }
  0x30   : > { %648 = vst [vmem:[#allocation2 + $0x218] sm:$0xff] %v6254_v29 }
  0x31   : > { %6166 = vmatpush.bf16.msrb.mxu3 %v6027_v14  ;;  %1008 = vmatmul.bf16.vlgmr.msra.gmra.mxu2 %v718_v35  ;;  %649 = vst [vmem:[#allocation2 + $0x220] sm:$0xff] %v6254_v29 }
  0x32   : > { %650 = vst [vmem:[#allocation2 + $0x228] sm:$0xff] %v6254_v29  ;;  %1437 = vmatpush.bf16.msrb.mxu0 %v6043_v53 }
  0x33   : > { %651 = vst [vmem:[#allocation2 + $0x230] sm:$0xff] %v6254_v29 }
  0x34   : > { %652 = vst [vmem:[#allocation2 + $0x238] sm:$0xff] %v6254_v29 }
  0x35   : > { %6167 = vmatpush.bf16.msrb.mxu3 %v6026_v16  ;;  %2796 = vst [vmem:[#allocation3] sm:$0xff] %v6254_v29  ;;  %v6003_v16 = vld [vmem:[%s6342_s8 + $0x70] sm:$0xff] }
  0x36   : > { %2797 = vst [vmem:[#allocation3 + $0x8] sm:$0xff] %v6254_v29  ;;  %1438 = vmatpush.bf16.msrb.mxu0 %v6042_v56 }
  0x37   : > { %2798 = vst [vmem:[#allocation3 + $0x10] sm:$0xff] %v6254_v29 }
  0x38   : > { %2799 = vst [vmem:[#allocation3 + $0x18] sm:$0xff] %v6254_v29 }
  0x39   : > { %6168 = vmatpush.bf16.msrb.mxu3 %v6025_v18  ;;  %2800 = vst [vmem:[#allocation3 + $0x20] sm:$0xff] %v6254_v29 }
  0x3a   : > { %2803 = vst [vmem:[#allocation3 + $0x38] sm:$0xff] %v6254_v29  ;;  %1439 = vmatpush.bf16.msrb.mxu0 %v6041_v60 }
  0x3b   : > { %2804 = vst [vmem:[#allocation3 + $0x40] sm:$0xff] %v6254_v29 }
  0x3c   : > { %505 = vmatmul.bf16.gmra.mxu0 %v5990_v9  ;;  %2807 = vst [vmem:[#allocation3 + $0x58] sm:$0xff] %v6254_v29 }
  0x3d   : > { %6169 = vmatpush.bf16.msrb.mxu3 %v6024_v20  ;;  %2808 = vst [vmem:[#allocation3 + $0x60] sm:$0xff] %v6254_v29 }
  0x3e   : > { %2811 = vst [vmem:[#allocation3 + $0x78] sm:$0xff] %v6254_v29  ;;  %1440 = vmatpush.bf16.msrb.mxu0 %v6040_v63  ;;  %565 = vmatmul.bf16.gmra.mxu3 %v6002_v5 }
  0x3f   : > { %2812 = vst [vmem:[#allocation3 + $0x80] sm:$0xff] %v6254_v29 }
  0x40   : > { %2815 = vst [vmem:[#allocation3 + $0x98] sm:$0xff] %v6254_v29 }
  0x41   : > { %6170 = vmatpush.bf16.msrb.mxu3 %v6023_v23  ;;  %2816 = vst [vmem:[#allocation3 + $0xa0] sm:$0xff] %v6254_v29 }
  0x42   : > { %2819 = vst [vmem:[#allocation3 + $0xb8] sm:$0xff] %v6254_v29  ;;  %1441 = vmatpush.bf16.msrb.mxu0 %v6039_v4 }
  0x43   : > { %2820 = vst [vmem:[#allocation3 + $0xc0] sm:$0xff] %v6254_v29 }
  0x44   : > { %2823 = vst [vmem:[#allocation3 + $0xd8] sm:$0xff] %v6254_v29 }
  0x45   : > { %6171 = vmatpush.bf16.msrb.mxu3 %v6022_v25  ;;  %2824 = vst [vmem:[#allocation3 + $0xe0] sm:$0xff] %v6254_v29 }
  0x46   : > { %2827 = vst [vmem:[#allocation3 + $0xf8] sm:$0xff] %v6254_v29  ;;  %1442 = vmatpush.bf16.msrb.mxu0 %v6038_v7 }
  0x47   : > { %2828 = vst [vmem:[#allocation3 + $0x100] sm:$0xff] %v6254_v29 }
  0x48   : > { %2831 = vst [vmem:[#allocation3 + $0x118] sm:$0xff] %v6254_v29 }
  0x49   : > { %6172 = vmatpush.bf16.msrb.mxu3 %v6021_v27  ;;  %2832 = vst [vmem:[#allocation3 + $0x120] sm:$0xff] %v6254_v29 }
  0x4a   : > { %2835 = vst [vmem:[#allocation3 + $0x138] sm:$0xff] %v6254_v29 }
  0x4b   : > { %2836 = vst [vmem:[#allocation3 + $0x140] sm:$0xff] %v6254_v29 }
  0x4c   : > { %510 = vmatmul.bf16.gmra.mxu0 %v5991_v10  ;;  %2839 = vst [vmem:[#allocation3 + $0x158] sm:$0xff] %v6254_v29  ;;  %v6037_v10 = vld [vmem:[%s8467_s3 + $0xc0] sm:$0xff] }
  0x4d   : > { %2840 = vst [vmem:[#allocation3 + $0x160] sm:$0xff] %v6254_v29  ;;  %6173 = vmatpush.bf16.msra.mxu3 %v6358_v15  ;;  %1443 = vmatpush.bf16.msrb.mxu0 %v6037_v10 }
  0x4e   : > { %2843 = vst [vmem:[#allocation3 + $0x178] sm:$0xff] %v6254_v29  ;;  %570 = vmatmul.bf16.gmra.mxu3 %v6003_v16 }
  0x4f   : > { %2844 = vst [vmem:[#allocation3 + $0x180] sm:$0xff] %v6254_v29 }
  0x50   : > { %2847 = vst [vmem:[#allocation3 + $0x198] sm:$0xff] %v6254_v29 }
  0x51   : > { %2848 = vst [vmem:[#allocation3 + $0x1a0] sm:$0xff] %v6254_v29  ;;  %6174 = vmatpush.bf16.msra.mxu3 %v6367_v17 }
  0x52   : > { %2851 = vst [vmem:[#allocation3 + $0x1b8] sm:$0xff] %v6254_v29 }
  0x53   : > { %2852 = vst [vmem:[#allocation3 + $0x1c0] sm:$0xff] %v6254_v29 }
  0x54   : > { %2855 = vst [vmem:[#allocation3 + $0x1d8] sm:$0xff] %v6254_v29 }
  0x55   : > { %2856 = vst [vmem:[#allocation3 + $0x1e0] sm:$0xff] %v6254_v29  ;;  %6175 = vmatpush.bf16.msra.mxu3 %v6376_v19 }
  0x56   : > { %2859 = vst [vmem:[#allocation3 + $0x1f8] sm:$0xff] %v6254_v29 }
  0x57   : > { %2860 = vst [vmem:[#allocation3 + $0x200] sm:$0xff] %v6254_v29 }
  0x58   : > { %2863 = vst [vmem:[#allocation3 + $0x218] sm:$0xff] %v6254_v29 }
  0x59   : > { %2864 = vst [vmem:[#allocation3 + $0x220] sm:$0xff] %v6254_v29  ;;  %6176 = vmatpush.bf16.msra.mxu3 %v6385_v21 }
  0x5a   : > { %2865 = vst [vmem:[#allocation3 + $0x228] sm:$0xff] %v6254_v29 }
  0x5b   : > { %2866 = vst [vmem:[#allocation3 + $0x230] sm:$0xff] %v6254_v29 }
  0x5c   : > { %515 = vmatmul.bf16.gmra.mxu0 %v5992_v11  ;;  %2867 = vst [vmem:[#allocation3 + $0x238] sm:$0xff] %v6254_v29 }
  0x5d   : > { %6177 = vmatpush.bf16.msra.mxu3 %v6395_v24 }
  0x61   : > { %6178 = vmatpush.bf16.msra.mxu3 %v6404_v26 }
  0x65   : > { %6179 = vmatpush.bf16.msra.mxu3 %v6413_v28 }
  0x69   : > { %6180 = vmatpush.bf16.msra.mxu3 %v6426_v32 }
  0x6c   : > { %520 = vmatmul.bf16.gmra.mxu0 %v5993_v13 }
  0x7c   : > { %525 = vmatmul.bf16.gmra.mxu0 %v5994_v22 }
  0x8c   : > { %530 = vmatmul.bf16.gmra.mxu0 %v5995_v31 }
  0x9c   : > { %535 = vmatmul.bf16.gmra.mxu0 %v5996_v36 }
  0xa9   : > { %v501_v39 = vpop.f32.mrf.mxu0 }
  0xaa   : > { %v502_v40 = vadd.f32 %v6461_v37, %v501_v39 }
  0xac   : > { %654 = vst [vmem:[#allocation2 + $0x28] sm:$0xff] %v502_v40  ;;  %540 = vmatmul.bf16.gmra.mxu0 %v5997_v38 }
  0xb1   : > { %v503_v41 = vpop.f32.mrf.mxu0 }
  0xb2   : > { %v6478_v42 = vadd.f32 %v6461_v37, %v503_v41 }
  0xb3   : > { %v688_v1 = vld [vmem:[#allocation2 + $0x27] sm:$0xff] }
  0xb4   : > { %v783_v43 = vpack.c.bf16 %v6478_v42, %v502_v40  ;;  %655 = vst [vmem:[#allocation2 + $0x30] sm:$0xff] %v6478_v42  ;;  %v1009_v54 = vpop.f32.mrf.mxu2 }
  0xb6   : > { %876 = vmatmul.bf16.gmra.mxu1 %v783_v43 }
  0xb9   : > { %v506_v45 = vpop.f32.mrf.mxu0 }
  0xba   : > { %v507_v48 = vadd.f32 %v6461_v37, %v506_v45  ;;  %v872_v45 = vpop.f32.mrf.mxu1 }
  0xbb   : > { %v689_v2 = vld [vmem:[#allocation2 + $0x2f] sm:$0xff]  ;;  %v6595_v56 = vadd.f32 %v1009_v54, %v872_v45 }
  0xbc   : > { %545 = vmatmul.bf16.gmra.mxu0 %v5998_v44  ;;  %656 = vst [vmem:[#allocation2 + $0x48] sm:$0xff] %v507_v48  ;;  %v719_v3 = vpack.c.bf16 %v689_v2, %v688_v1  ;;  %v1557_v54 = vld [vmem:[#allocation2 + $0x28] sm:$0xff] }
  0xbe   : > { %1013 = vmatmul.bf16.gmra.mxu2 %v719_v3 }
  0xc1   : > { %v508_v47 = vpop.f32.mrf.mxu0 }
  0xc2   : > { %v509_v49 = vadd.f32 %v6461_v37, %v508_v47  ;;  %v6590_v53 = vpop.f32.mrf.mxu1 }
  0xc3   : > { %v690_v13 = vld [vmem:[#allocation2 + $0x47] sm:$0xff] }
  0xc4   : > { %v6505_v50 = vpack.c.bf16 %v509_v49, %v507_v48  ;;  %657 = vst [vmem:[#allocation2 + $0x50] sm:$0xff] %v509_v49 }
  0xc6   : > { %881 = vmatmul.bf16.gmra.mxu1 %v6505_v50 }
  0xc9   : > { %v511_v52 = vpop.f32.mrf.mxu0 }
  0xca   : > { %v512_v57 = vadd.f32 %v6461_v37, %v511_v52 }
  0xcb   : > { %v691_v11 = vld [vmem:[#allocation2 + $0x4f] sm:$0xff] }
  0xcc   : > { %550 = vmatmul.bf16.gmra.mxu0 %v5999_v51  ;;  %658 = vst [vmem:[#allocation2 + $0x68] sm:$0xff] %v512_v57  ;;  %v720_v15 = vpack.c.bf16 %v691_v11, %v690_v13 }
  0xce   : > { %1018 = vmatmul.bf16.gmra.mxu2 %v720_v15 }
  0xd1   : > { %v513_v55 = vpop.f32.mrf.mxu0 }
  0xd2   : > { %v514_v58 = vadd.f32 %v6461_v37, %v513_v55  ;;  %v6052_v55 = vld [vmem:[%s8467_s3 + $0x138] sm:$0xff] }
  0xd3   : > { %v692_v22 = vld [vmem:[#allocation2 + $0x67] sm:$0xff]  ;;  %1670 = vmatpush.bf16.msrb.mxu1 %v6052_v55 }
  0xd4   : > { %v6535_v59 = vpack.c.bf16 %v514_v58, %v512_v57  ;;  %659 = vst [vmem:[#allocation2 + $0x70] sm:$0xff] %v514_v58  ;;  %v6054_v55 = vld [vmem:[%s8467_s3 + $0x148] sm:$0xff] }
  0xd6   : > { %886 = vmatmul.bf16.gmra.mxu1 %v6535_v59 }
  0xd9   : > { %v516_v62 = vpop.f32.mrf.mxu0 }
  0xda   : > { %v517_v0 = vadd.f32 %v6461_v37, %v516_v62 }
  0xdb   : > { %v693_v20 = vld [vmem:[#allocation2 + $0x6f] sm:$0xff] }
  0xdc   : > { %660 = vst [vmem:[#allocation2 + $0x88] sm:$0xff] %v517_v0  ;;  %555 = vmatmul.bf16.gmra.mxu0 %v6000_v61  ;;  %v721_v24 = vpack.c.bf16 %v693_v20, %v692_v22  ;;  %v6059_v22 = vld [vmem:[%s8467_s3 + $0x170] sm:$0xff] }
  0xde   : > { %1023 = vmatmul.bf16.gmra.mxu2 %v721_v24 }
  0xe1   : > { %v518_v6 = vpop.f32.mrf.mxu0 }
  0xe2   : > { %v519_v8 = vadd.f32 %v6461_v37, %v518_v6  ;;  %v6004_v6 = vld [vmem:[%s6342_s8 + $0x78] sm:$0xff] }
  0xe3   : > { %v694_v30 = vld [vmem:[#allocation2 + $0x87] sm:$0xff]  ;;  %575 = vmatmul.bf16.gmra.mxu3 %v6004_v6 }
  0xe4   : > { %661 = vst [vmem:[#allocation2 + $0x90] sm:$0xff] %v519_v8  ;;  %v6559_v9 = vpack.c.bf16 %v519_v8, %v517_v0 }
  0xe6   : > { %891 = vmatmul.bf16.gmra.mxu1 %v6559_v9 }
  0xe9   : > { %v521_v12 = vpop.f32.mrf.mxu0 }
  0xea   : > { %v522_v14 = vadd.f32 %v6461_v37, %v521_v12 }
  0xeb   : > { %v695_v28 = vld [vmem:[#allocation2 + $0x8f] sm:$0xff] }
  0xec   : > { %662 = vst [vmem:[#allocation2 + $0xa8] sm:$0xff] %v522_v14  ;;  %1444 = vmatmul.bf16.vlgmr.msrb.gmra.mxu0 %v719_v3  ;;  %v722_v32 = vpack.c.bf16 %v695_v28, %v694_v30  ;;  %v6048_v28 = vld [vmem:[%s8467_s3 + $0x118] sm:$0xff] }
  0xee   : > { %1028 = vmatmul.bf16.gmra.mxu2 %v722_v32 }
  0xf1   : > { %v523_v17 = vpop.f32.mrf.mxu0 }
  0xf2   : > { %v524_v18 = vadd.f32 %v6461_v37, %v523_v17  ;;  %v6060_v17 = vld [vmem:[%s8467_s3 + $0x178] sm:$0xff] }
  0xf3   : > { %v696_v39 = vld [vmem:[#allocation2 + $0xa7] sm:$0xff]  ;;  %1904 = vmatpush.bf16.msrb.mxu2 %v6060_v17 }
  0xf4   : > { %663 = vst [vmem:[#allocation2 + $0xb0] sm:$0xff] %v524_v18  ;;  %v6571_v19 = vpack.c.bf16 %v524_v18, %v522_v14  ;;  %v6051_v14 = vld [vmem:[%s8467_s3 + $0x130] sm:$0xff]  ;;  %v6050_v18 = vld [vmem:[%s8467_s3 + $0x128] sm:$0xff] }
  0xf5   : > { %1671 = vmatpush.bf16.msrb.mxu1 %v6051_v14 }
  0xf6   : > { %896 = vmatmul.bf16.gmra.mxu1 %v6571_v19 }
  0xf7   : > { %1905 = vmatpush.bf16.msrb.mxu2 %v6059_v22 }
  0xf9   : > { %v526_v21 = vpop.f32.mrf.mxu0  ;;  %1672 = vmatpush.bf16.msrb.mxu1 %v6050_v18 }
  0xfa   : > { %v527_v23 = vadd.f32 %v6461_v37, %v526_v21 }
  0xfb   : > { %v697_v36 = vld [vmem:[#allocation2 + $0xaf] sm:$0xff] }
  0xfc   : > { %664 = vst [vmem:[#allocation2 + $0xc8] sm:$0xff] %v527_v23  ;;  %1449 = vmatmul.bf16.gmra.mxu0 %v720_v15  ;;  %v723_v41 = vpack.c.bf16 %v697_v36, %v696_v39  ;;  %v6047_v36 = vld [vmem:[%s8467_s3 + $0x110] sm:$0xff] }
  0xfe   : > { %1033 = vmatmul.bf16.gmra.mxu2 %v723_v41 }
 0x101   : > { %v528_v25 = vpop.f32.mrf.mxu0 }
 0x102   : > { %v529_v26 = vadd.f32 %v6461_v37, %v528_v25 }
 0x103   : > { %v698_v49 = vld [vmem:[#allocation2 + $0xc7] sm:$0xff] }
 0x104   : > { %665 = vst [vmem:[#allocation2 + $0xd0] sm:$0xff] %v529_v26  ;;  %v6576_v27 = vpack.c.bf16 %v529_v26, %v527_v23  ;;  %v6049_v23 = vld [vmem:[%s8467_s3 + $0x120] sm:$0xff] }
 0x105   : > { %1673 = vmatpush.bf16.msrb.mxu1 %v6049_v23 }
 0x106   : > { %901 = vmatmul.bf16.gmra.mxu1 %v6576_v27 }
 0x109   : > { %v531_v29 = vpop.f32.mrf.mxu0  ;;  %1674 = vmatpush.bf16.msrb.mxu1 %v6048_v28 }
 0x10a   : > { %v532_v31 = vadd.f32 %v6461_v37, %v531_v29  ;;  %v6643_v29 = vpop.f32.mrf.mxu2 }
 0x10b   : > { %v699_v47 = vld [vmem:[#allocation2 + $0xcf] sm:$0xff] }
 0x10c   : > { %666 = vst [vmem:[#allocation2 + $0xe8] sm:$0xff] %v532_v31  ;;  %1454 = vmatmul.bf16.gmra.mxu0 %v721_v24  ;;  %v724_v52 = vpack.c.bf16 %v699_v47, %v698_v49  ;;  %v6058_v24 = vld [vmem:[%s8467_s3 + $0x168] sm:$0xff]  ;;  %v6055_v49 = vld [vmem:[%s8467_s3 + $0x150] sm:$0xff] }
 0x10d   : > { %1906 = vmatpush.bf16.msrb.mxu2 %v6058_v24  ;;  %1675 = vmatpush.bf16.msrb.mxu1 %v6047_v36 }
 0x10e   : > { %1038 = vmatmul.bf16.gmra.mxu2 %v724_v52 }
 0x111   : > { %v533_v33 = vpop.f32.mrf.mxu0 }
 0x112   : > { %v534_v34 = vadd.f32 %v6461_v37, %v533_v33 }
 0x113   : > { %v700_v0 = vld [vmem:[#allocation2 + $0xe7] sm:$0xff] }
 0x114   : > { %667 = vst [vmem:[#allocation2 + $0xf0] sm:$0xff] %v534_v34  ;;  %v6581_v35 = vpack.c.bf16 %v534_v34, %v532_v31  ;;  %v6057_v34 = vld [vmem:[%s8467_s3 + $0x160] sm:$0xff] }
 0x115   : > { %1907 = vmatpush.bf16.msrb.mxu2 %v6057_v34 }
 0x116   : > { %906 = vmatmul.bf16.gmra.mxu1 %v6581_v35 }
 0x119   : > { %v536_v38 = vpop.f32.mrf.mxu0 }
 0x11a   : > { %v537_v40 = vadd.f32 %v6461_v37, %v536_v38 }
 0x11b   : > { %v701_v62 = vld [vmem:[#allocation2 + $0xef] sm:$0xff] }
 0x11c   : > { %668 = vst [vmem:[#allocation2 + $0x108] sm:$0xff] %v537_v40  ;;  %1459 = vmatmul.bf16.gmra.mxu0 %v722_v32  ;;  %v725_v2 = vpack.c.bf16 %v701_v62, %v700_v0  ;;  %v1589_v62 = vpack.c.bf16 %v6478_v42, %v1557_v54 }
 0x11e   : > { %1043 = vmatmul.bf16.gmra.mxu2 %v725_v2 }
 0x121   : > { %v538_v43 = vpop.f32.mrf.mxu0 }
 0x122   : > { %v539_v44 = vadd.f32 %v6461_v37, %v538_v43  ;;  %v561_v43 = vpop.f32.mrf.mxu3 }
 0x123   : > { %v702_v12 = vld [vmem:[#allocation2 + $0x107] sm:$0xff] }
 0x124   : > { %669 = vst [vmem:[#allocation2 + $0x110] sm:$0xff] %v539_v44  ;;  %v6586_v46 = vpack.c.bf16 %v539_v44, %v537_v40  ;;  %v6056_v40 = vld [vmem:[%s8467_s3 + $0x158] sm:$0xff]  ;;  %v562_v44 = vadd.f32 %v6461_v37, %v561_v43  ;;  %v1791_v43 = vld [vmem:[#allocation2 + $0x29] sm:$0xff] }
 0x125   : > { %1908 = vmatpush.bf16.msrb.mxu2 %v6056_v40 }
 0x126   : > { %911 = vmatmul.bf16.gmra.mxu1 %v6586_v46  ;;  %678 = vst [vmem:[#allocation2 + $0x1a8] sm:$0xff] %v562_v44 }
 0x129   : > { %v541_v48 = vpop.f32.mrf.mxu0  ;;  %1909 = vmatpush.bf16.msrb.mxu2 %v6055_v49 }
 0x12a   : > { %v542_v51 = vadd.f32 %v6461_v37, %v541_v48 }
 0x12b   : > { %v703_v10 = vld [vmem:[#allocation2 + $0x10f] sm:$0xff] }
 0x12c   : > { %670 = vst [vmem:[#allocation2 + $0x128] sm:$0xff] %v542_v51  ;;  %1464 = vmatmul.bf16.gmra.mxu0 %v723_v41  ;;  %v726_v15 = vpack.c.bf16 %v703_v10, %v702_v12  ;;  %v6046_v41 = vld [vmem:[%s8467_s3 + $0x108] sm:$0xff] }
 0x12d   : > { %1676 = vmatpush.bf16.msrb.mxu1 %v6046_v41  ;;  %1910 = vmatpush.bf16.msrb.mxu2 %v6054_v55 }
 0x12e   : > { %1048 = vmatmul.bf16.gmra.mxu2 %v726_v15 }
 0x131   : > { %v543_v57 = vpop.f32.mrf.mxu0 }
 0x132   : > { %v544_v58 = vadd.f32 %v6461_v37, %v543_v57 }
 0x133   : > { %v6598_v60 = vpop.f32.mrf.mxu1  ;;  %v704_v32 = vld [vmem:[#allocation2 + $0x127] sm:$0xff] }
 0x134   : > { %671 = vst [vmem:[#allocation2 + $0x130] sm:$0xff] %v544_v58  ;;  %v6600_v61 = vpack.c.bf16 %v544_v58, %v542_v51  ;;  %v6045_v51 = vld [vmem:[%s8467_s3 + $0x100] sm:$0xff] }
 0x135   : > { %1677 = vmatpush.bf16.msrb.mxu1 %v6045_v51 }
 0x136   : > { %916 = vmatmul.bf16.gmra.mxu1 %v6600_v61 }
 0x139   : > { %v546_v63 = vpop.f32.mrf.mxu0 }
 0x13a   : > { %v547_v1 = vadd.f32 %v6461_v37, %v546_v63  ;;  %v563_v63 = vpop.f32.mrf.mxu3 }
 0x13b   : > { %v6604_v3 = vpop.f32.mrf.mxu1  ;;  %v705_v30 = vld [vmem:[#allocation2 + $0x12f] sm:$0xff] }
 0x13c   : > { %672 = vst [vmem:[#allocation2 + $0x148] sm:$0xff] %v547_v1  ;;  %1469 = vmatmul.bf16.gmra.mxu0 %v724_v52  ;;  %v727_v38 = vpack.c.bf16 %v705_v30, %v704_v32 }
 0x13e   : > { %1053 = vmatmul.bf16.gmra.mxu2 %v727_v38 }
 0x141   : > { %v548_v4 = vpop.f32.mrf.mxu0  ;;  %v1014_v47 = vpop.f32.mrf.mxu2 }
 0x142   : > { %v549_v5 = vadd.f32 %v6461_v37, %v548_v4  ;;  %v6669_v52 = vadd.f32 %v1014_v47, %v6598_v60  ;;  %v564_v60 = vadd.f32 %v6461_v37, %v563_v63 }
 0x143   : > { %v6608_v7 = vpop.f32.mrf.mxu1 }
 0x144   : > { %673 = vst [vmem:[#allocation2 + $0x150] sm:$0xff] %v549_v5  ;;  %v6610_v8 = vpack.c.bf16 %v549_v5, %v547_v1  ;;  %v6053_v5 = vld [vmem:[%s8467_s3 + $0x140] sm:$0xff]  ;;  %v6695_v18 = vpack.c.bf16 %v564_v60, %v562_v44  ;;  %v1792_v44 = vld [vmem:[#allocation2 + $0x31] sm:$0xff] }
 0x145   : > { %679 = vst [vmem:[#allocation2 + $0x1b0] sm:$0xff] %v564_v60  ;;  %1911 = vmatpush.bf16.msrb.mxu2 %v6053_v5  ;;  %v1794_v60 = vld [vmem:[#allocation2 + $0x51] sm:$0xff] }
 0x146   : > { %921 = vmatmul.bf16.gmra.mxu1 %v6610_v8 }
 0x149   : > { %v551_v11 = vpop.f32.mrf.mxu0  ;;  %v1016_v1 = vpop.f32.mrf.mxu2 }
 0x14a   : > { %v552_v13 = vadd.f32 %v6461_v37, %v551_v11  ;;  %v6687_v6 = vadd.f32 %v1016_v1, %v6604_v3  ;;  %v566_v11 = vpop.f32.mrf.mxu3 }
 0x14b   : > { %v6617_v16 = vpop.f32.mrf.mxu1  ;;  %v707_v0 = vld [vmem:[#allocation2 + $0x14f] sm:$0xff]  ;;  %v567_v12 = vadd.f32 %v6461_v37, %v566_v11 }
 0x14c   : > { %674 = vst [vmem:[#allocation2 + $0x168] sm:$0xff] %v552_v13  ;;  %1474 = vmatmul.bf16.gmra.mxu0 %v725_v2  ;;  %v706_v2 = vld [vmem:[#allocation2 + $0x147] sm:$0xff] }
 0x14d   : > { %v728_v42 = vpack.c.bf16 %v707_v0, %v706_v2  ;;  %680 = vst [vmem:[#allocation2 + $0x1c8] sm:$0xff] %v567_v12  ;;  %v1793_v0 = vld [vmem:[#allocation2 + $0x49] sm:$0xff] }
 0x14f   : > { %1058 = vmatmul.bf16.gmra.mxu2 %v728_v42 }
 0x151   : > { %v553_v20 = vpop.f32.mrf.mxu0 }
 0x152   : > { %v554_v21 = vadd.f32 %v6461_v37, %v553_v20  ;;  %v568_v3 = vpop.f32.mrf.mxu3 }
 0x153   : > { %v6635_v25 = vpop.f32.mrf.mxu1  ;;  %v708_v23 = vld [vmem:[#allocation2 + $0x167] sm:$0xff] }
 0x154   : > { %675 = vst [vmem:[#allocation2 + $0x170] sm:$0xff] %v554_v21  ;;  %v6637_v26 = vpack.c.bf16 %v554_v21, %v552_v13  ;;  %v1019_v13 = vpop.f32.mrf.mxu2  ;;  %v569_v21 = vadd.f32 %v6461_v37, %v568_v3  ;;  %v1347_v3 = vld [vmem:[#allocation2 + $0x1a7] sm:$0xff] }
 0x156   : > { %926 = vmatmul.bf16.gmra.mxu1 %v6637_v26  ;;  %681 = vst [vmem:[#allocation2 + $0x1d0] sm:$0xff] %v569_v21 }
 0x159   : > { %v556_v31 = vpop.f32.mrf.mxu0 }
 0x15a   : > { %v557_v33 = vadd.f32 %v6461_v37, %v556_v31  ;;  %v571_v31 = vpop.f32.mrf.mxu3 }
 0x15b   : > { %v6652_v39 = vpop.f32.mrf.mxu1  ;;  %v709_v20 = vld [vmem:[#allocation2 + $0x16f] sm:$0xff]  ;;  %v572_v32 = vadd.f32 %v6461_v37, %v571_v31 }
 0x15c   : > { %676 = vst [vmem:[#allocation2 + $0x188] sm:$0xff] %v557_v33  ;;  %1479 = vmatmul.bf16.gmra.mxu0 %v726_v15  ;;  %v6693_v15 = vadd.f32 %v1019_v13, %v6608_v7  ;;  %v1021_v22 = vpop.f32.mrf.mxu2  ;;  %v729_v7 = vpack.c.bf16 %v709_v20, %v708_v23  ;;  %v1348_v20 = vld [vmem:[#allocation2 + $0x1af] sm:$0xff] }
 0x15d   : > { %v6703_v28 = vadd.f32 %v1021_v22, %v6617_v16  ;;  %682 = vst [vmem:[#allocation2 + $0x1e8] sm:$0xff] %v572_v32  ;;  %v1796_v22 = vld [vmem:[#allocation2 + $0x71] sm:$0xff]  ;;  %v1367_v23 = vpack.c.bf16 %v1348_v20, %v1347_v3 }
 0x15f   : > { %1063 = vmatmul.bf16.gmra.mxu2 %v729_v7 }
 0x161   : > { %v558_v45 = vpop.f32.mrf.mxu0 }
 0x162   : > { %v559_v48 = vadd.f32 %v6461_v37, %v558_v45  ;;  %v573_v40 = vpop.f32.mrf.mxu3 }
 0x163   : > { %v6674_v57 = vpop.f32.mrf.mxu1  ;;  %v574_v16 = vadd.f32 %v6461_v37, %v573_v40 }
 0x164   : > { %677 = vst [vmem:[#allocation2 + $0x190] sm:$0xff] %v559_v48  ;;  %v6676_v58 = vpack.c.bf16 %v559_v48, %v557_v33  ;;  %v1024_v33 = vpop.f32.mrf.mxu2  ;;  %v6721_v48 = vpack.c.bf16 %v1792_v44, %v1791_v43  ;;  %v1349_v43 = vld [vmem:[#allocation2 + $0x1c7] sm:$0xff]  ;;  %v1350_v44 = vld [vmem:[#allocation2 + $0x1cf] sm:$0xff] }
 0x165   : > { %683 = vst [vmem:[#allocation2 + $0x1f0] sm:$0xff] %v574_v16  ;;  %v6729_v55 = vpack.c.bf16 %v574_v16, %v572_v32 }
 0x166   : > { %931 = vmatmul.bf16.vlgmr.msrb.gmra.mxu3 %v6676_v58  ;;  %1678 = vmatmul.bf16.vlgmr.msrb.gmra.mxu1 %v1589_v62 }
 0x169   : > { %v6681_v4 = vpop.f32.mrf.mxu0 }
 0x16b   : > { %v894_v10 = vpop.f32.mrf.mxu1  ;;  %v1346_v62 = vld [vmem:[#allocation2 + $0x18f] sm:$0xff] }
 0x16c   : > { %1484 = vmatmul.bf16.gmra.mxu0 %v727_v38  ;;  %v6711_v38 = vpack.c.bf16 %v569_v21, %v567_v12  ;;  %v1026_v41 = vpop.f32.mrf.mxu2  ;;  %v1795_v21 = vld [vmem:[#allocation2 + $0x69] sm:$0xff] }
 0x16d   : > { %v6719_v47 = vadd.f32 %v1026_v41, %v6652_v39  ;;  %v1345_v39 = vld [vmem:[#allocation2 + $0x187] sm:$0xff] }
 0x16e   : > { %v1366_v2 = vpack.c.bf16 %v1346_v62, %v1345_v39  ;;  %v1797_v62 = vld [vmem:[#allocation2 + $0x89] sm:$0xff]  ;;  %v1798_v39 = vld [vmem:[#allocation2 + $0x91] sm:$0xff] }
 0x16f   : > { %1912 = vmatmul.bf16.vlgmr.msrb.gmra.mxu2 %v6721_v48 }
 0x171   : > { %v6690_v14 = vpop.f32.mrf.mxu0 }
 0x173   : > { %v897_v17 = vpop.f32.mrf.mxu1 }
 0x174   : > { %v1029_v49 = vpop.f32.mrf.mxu2 }
 0x176   : > { %936 = vmatmul.bf16.gmra.mxu3 %v6695_v18  ;;  %1683 = vmatmul.bf16.gmra.mxu1 %v6505_v50  ;;  %v6709_v50 = vadd.f32 %v1024_v33, %v6635_v25  ;;  %v6756_v33 = vpack.c.bf16 %v1796_v22, %v1795_v21  ;;  %v1352_v21 = vld [vmem:[#allocation2 + $0x1ef] sm:$0xff]  ;;  %v576_v22 = vpop.f32.mrf.mxu3 }
 0x179   : > { %v6700_v24 = vpop.f32.mrf.mxu0 }
 0x17a   : > { %8473 = vst [vmem:[#allocation7_spill] sm:$0xff] %v6700_v24 }
 0x17b   : > { %v899_v30 = vpop.f32.mrf.mxu1 }
 0x17c   : > { %1489 = vmatmul.bf16.gmra.mxu0 %v728_v42  ;;  %v1031_v63 = vpop.f32.mrf.mxu2  ;;  %v6737_v42 = vpack.c.bf16 %v1794_v60, %v1793_v0  ;;  %v6034_v0 = vld [vmem:[%s8467_s3 + $0xa8] sm:$0xff] }
 0x17d   : > { %v6735_v5 = vadd.f32 %v1031_v63, %v894_v10  ;;  %v1368_v63 = vpack.c.bf16 %v1350_v44, %v1349_v43 }
 0x17f   : > { %1917 = vmatmul.bf16.gmra.mxu2 %v6737_v42 }
 0x181   : > { %v6706_v34 = vpop.f32.mrf.mxu0 }
 0x182   : > { %8474 = vst [vmem:[#allocation8_spill] sm:$0xff] %v6706_v34 }
 0x183   : > { %v902_v36 = vpop.f32.mrf.mxu1 }
 0x184   : > { %v1034_v11 = vpop.f32.mrf.mxu2 }
 0x185   : > { %v6742_v13 = vadd.f32 %v1034_v11, %v897_v17  ;;  %v6036_v17 = vld [vmem:[%s8467_s3 + $0xb8] sm:$0xff] }
 0x186   : > { %941 = vmatmul.bf16.gmra.mxu3 %v6711_v38  ;;  %1688 = vmatmul.bf16.gmra.mxu1 %v6535_v59  ;;  %v6727_v59 = vadd.f32 %v1029_v49, %v6674_v57 }
 0x187   : > { %1202 = vmatpush.bf16.msrb.mxu3 %v6036_v17  ;;  %v6792_v17 = vadd.f32 %v6461_v37, %v576_v22  ;;  %v6031_v22 = vld [vmem:[%s8467_s3 + $0x90] sm:$0xff] }
 0x189   : > { %v6716_v45 = vpop.f32.mrf.mxu0  ;;  %684 = vst [vmem:[#allocation2 + $0x208] sm:$0xff] %v6792_v17 }
 0x18a   : > { %8475 = vst [vmem:[#allocation9_spill] sm:$0xff] %v6716_v45 }
 0x18b   : > { %v904_v25 = vpop.f32.mrf.mxu1 }
 0x18c   : > { %1494 = vmatmul.bf16.gmra.mxu0 %v729_v7  ;;  %v1036_v10 = vpop.f32.mrf.mxu2 }
 0x18d   : > { %v6747_v7 = vadd.f32 %v1036_v10, %v899_v30  ;;  %v6035_v30 = vld [vmem:[%s8467_s3 + $0xb0] sm:$0xff]  ;;  %v1351_v10 = vld [vmem:[#allocation2 + $0x1e7] sm:$0xff] }
 0x18e   : > { %1203 = vmatpush.bf16.msrb.mxu3 %v6035_v30  ;;  %v1800_v30 = vld [vmem:[#allocation2 + $0xb1] sm:$0xff]  ;;  %v1369_v43 = vpack.c.bf16 %v1352_v21, %v1351_v10  ;;  %v6074_v21 = vld [vmem:[%s8467_s3 + $0x1e8] sm:$0xff] }
 0x18f   : > { %1922 = vmatmul.bf16.gmra.mxu2 %v6756_v33 }
 0x191   : > { %v6724_v51 = vpop.f32.mrf.mxu0 }
 0x192   : > { %8476 = vst [vmem:[#allocation10_spill] sm:$0xff] %v6724_v51  ;;  %1204 = vmatpush.bf16.msrb.mxu3 %v6034_v0 }
 0x193   : > { %v907_v54 = vpop.f32.mrf.mxu1 }
 0x196   : > { %946 = vmatmul.bf16.gmra.mxu3 %v6729_v55  ;;  %1693 = vmatmul.bf16.gmra.mxu1 %v6559_v9 }
 0x199   : > { %v6733_v1 = vpop.f32.mrf.mxu0 }
 0x19a   : > { %8477 = vst [vmem:[#allocation11_spill] sm:$0xff] %v6733_v1 }
 0x19b   : > { %v909_v57 = vpop.f32.mrf.mxu1 }
 0x19c   : > { %1499 = vmatmul.bf16.gmra.mxu0 %v1366_v2 }
 0x1a1   : > { %v6740_v12 = vpop.f32.mrf.mxu0 }
 0x1a2   : > { %8478 = vst [vmem:[#allocation12_spill] sm:$0xff] %v6740_v12 }
 0x1a3   : > { %v6744_v9 = vpop.f32.mrf.mxu1 }
 0x1a6   : > { %1068 = vmatmul.bf16.vlgmr.msra.gmra.mxu3 %v1366_v2  ;;  %1698 = vmatmul.bf16.gmra.mxu1 %v6571_v19  ;;  %v1039_v19 = vpop.f32.mrf.mxu2  ;;  %v6776_v2 = vpack.c.bf16 %v1798_v39, %v1797_v62 }
 0x1a7   : > { %v6759_v40 = vadd.f32 %v1039_v19, %v902_v36  ;;  %v1799_v19 = vld [vmem:[#allocation2 + $0xa9] sm:$0xff] }
 0x1a8   : > { %1927 = vmatmul.bf16.gmra.mxu2 %v6776_v2  ;;  %v6805_v39 = vpack.c.bf16 %v1800_v30, %v1799_v19  ;;  %v1802_v30 = vld [vmem:[#allocation2 + $0xd1] sm:$0xff] }
 0x1a9   : > { %v6749_v31 = vpop.f32.mrf.mxu0 }
 0x1aa   : > { %8479 = vst [vmem:[#allocation13_spill] sm:$0xff] %v6749_v31 }
 0x1ab   : > { %v6754_v32 = vpop.f32.mrf.mxu1 }
 0x1ac   : > { %1504 = vmatmul.bf16.gmra.mxu0 %v1367_v23 }
 0x1ae   : > { %v1041_v49 = vpop.f32.mrf.mxu2 }
 0x1af   : > { %v6769_v36 = vadd.f32 %v1041_v49, %v904_v25  ;;  %v6033_v25 = vld [vmem:[%s8467_s3 + $0xa0] sm:$0xff]  ;;  %v6076_v49 = vld [vmem:[%s8467_s3 + $0x1f8] sm:$0xff] }
 0x1b0   : > { %1205 = vmatpush.bf16.msrb.mxu3 %v6033_v25  ;;  %2373 = vmatpush.bf16.msra.mxu0 %v6076_v49  ;;  %v1353_v49 = vld [vmem:[#allocation2 + $0x207] sm:$0xff] }
 0x1b1   : > { %v6766_v41 = vpop.f32.mrf.mxu0 }
 0x1b2   : > { %8480 = vst [vmem:[#allocation14_spill] sm:$0xff] %v6766_v41 }
 0x1b3   : > { %v6764_v16 = vpop.f32.mrf.mxu1 }
 0x1b6   : > { %1073 = vmatmul.bf16.gmra.mxu3 %v1367_v23  ;;  %1703 = vmatmul.bf16.gmra.mxu1 %v6576_v27  ;;  %v1044_v27 = vpop.f32.mrf.mxu2 }
 0x1b7   : > { %v6781_v3 = vadd.f32 %v1044_v27, %v907_v54 }
 0x1b8   : > { %1932 = vmatmul.bf16.gmra.mxu2 %v6805_v39 }
 0x1b9   : > { %v6779_v11 = vpop.f32.mrf.mxu0 }
 0x1ba   : > { %8481 = vst [vmem:[#allocation15_spill] sm:$0xff] %v6779_v11 }
 0x1bb   : > { %v6774_v60 = vpop.f32.mrf.mxu1 }
 0x1bc   : > { %1509 = vmatmul.bf16.gmra.mxu0 %v1368_v63 }
 0x1be   : > { %v1046_v54 = vpop.f32.mrf.mxu2 }
 0x1bf   : > { %v6794_v44 = vadd.f32 %v1046_v54, %v909_v57  ;;  %v578_v57 = vpop.f32.mrf.mxu3 }
 0x1c0   : > { %v6812_v0 = vadd.f32 %v6461_v37, %v578_v57  ;;  %v6073_v37 = vld [vmem:[%s8467_s3 + $0x1e0] sm:$0xff] }
 0x1c1   : > { %v6789_v23 = vpop.f32.mrf.mxu0 }
 0x1c2   : > { %8482 = vst [vmem:[#allocation16_spill] sm:$0xff] %v6789_v23 }
 0x1c3   : > { %v6786_v20 = vpop.f32.mrf.mxu1  ;;  %685 = vst [vmem:[#allocation2 + $0x210] sm:$0xff] %v6812_v0 }
 0x1c6   : > { %1078 = vmatmul.bf16.gmra.mxu3 %v1368_v63  ;;  %1708 = vmatmul.bf16.gmra.mxu1 %v6581_v35  ;;  %v6032_v35 = vld [vmem:[%s8467_s3 + $0x98] sm:$0xff]  ;;  %v6075_v63 = vld [vmem:[%s8467_s3 + $0x1f0] sm:$0xff]  ;;  %v1049_v27 = vpop.f32.mrf.mxu2 }
 0x1c7   : > { %1206 = vmatpush.bf16.msrb.mxu3 %v6032_v35  ;;  %2374 = vmatpush.bf16.msra.mxu0 %v6075_v63  ;;  %v6815_v25 = vadd.f32 %v1049_v27, %v6744_v9  ;;  %v1801_v9 = vld [vmem:[#allocation2 + $0xc9] sm:$0xff] }
 0x1c8   : > { %v6030_v27 = vld [vmem:[%s8467_s3 + $0x88] sm:$0xff] }
 0x1c9   : > { %v6817_v10 = vpop.f32.mrf.mxu0 }
 0x1ca   : > { %8483 = vst [vmem:[#allocation17_spill] sm:$0xff] %v6817_v10  ;;  %v1354_v35 = vld [vmem:[#allocation2 + $0x20f] sm:$0xff] }
 0x1cb   : > { %v6803_v62 = vpop.f32.mrf.mxu1  ;;  %1207 = vmatpush.bf16.msrb.mxu3 %v6031_v22  ;;  %2375 = vmatpush.bf16.msra.mxu0 %v6074_v21  ;;  %v1370_v63 = vpack.c.bf16 %v1354_v35, %v1353_v49  ;;  %v6070_v49 = vld [vmem:[%s8467_s3 + $0x1c8] sm:$0xff]  ;;  %v1804_v10 = vld [vmem:[#allocation2 + $0xf1] sm:$0xff] }
 0x1cc   : > { %1514 = vmatmul.bf16.gmra.mxu0 %v1369_v43  ;;  %v1089_v35 = vld [vmem:[#allocation2 + $0x9] sm:$0xff] }
 0x1ce   : > { %v1051_v19 = vpop.f32.mrf.mxu2 }
 0x1cf   : > { %2376 = vmatpush.bf16.msra.mxu0 %v6073_v37  ;;  %v6833_v57 = vadd.f32 %v1051_v19, %v6754_v32  ;;  %1208 = vmatpush.bf16.msrb.mxu3 %v6030_v27  ;;  %v6071_v37 = vld [vmem:[%s8467_s3 + $0x1d0] sm:$0xff] }
 0x1d1   : > { %v6845_v22 = vpop.f32.mrf.mxu0 }
 0x1d2   : > { %8484 = vst [vmem:[#allocation18_spill] sm:$0xff] %v6845_v22  ;;  %v1803_v22 = vld [vmem:[#allocation2 + $0xe9] sm:$0xff] }
 0x1d3   : > { %v6826_v54 = vpop.f32.mrf.mxu1 }
 0x1d6   : > { %1083 = vmatmul.bf16.gmra.mxu3 %v1369_v43  ;;  %1713 = vmatmul.bf16.gmra.mxu1 %v6586_v46  ;;  %v6072_v43 = vld [vmem:[%s8467_s3 + $0x1d8] sm:$0xff]  ;;  %v6843_v46 = vpack.c.bf16 %v1802_v30, %v1801_v9  ;;  %v1054_v19 = vpop.f32.mrf.mxu2  ;;  %v6029_v9 = vld [vmem:[%s8467_s3 + $0x80] sm:$0xff] }
 0x1d7   : > { %2377 = vmatpush.bf16.msra.mxu0 %v6072_v43  ;;  %v6857_v30 = vadd.f32 %v1054_v19, %v6764_v16  ;;  %1209 = vmatpush.bf16.msrb.mxu3 %v6029_v9  ;;  %v2261_v16 = vld [vmem:[#allocation2 + $0x50] sm:$0xff]  ;;  %v2260_v9 = vld [vmem:[#allocation2 + $0x48] sm:$0xff] }
 0x1d8   : > { %1937 = vmatmul.bf16.gmra.mxu2 %v6843_v46 }
 0x1d9   : > { %v6864_v32 = vpop.f32.mrf.mxu0 }
 0x1da   : > { %8485 = vst [vmem:[#allocation19_spill] sm:$0xff] %v6864_v32 }
 0x1db   : > { %v6841_v21 = vpop.f32.mrf.mxu1  ;;  %2378 = vmatpush.bf16.msra.mxu0 %v6071_v37  ;;  %v6069_v37 = vld [vmem:[%s8467_s3 + $0x1c0] sm:$0xff] }
 0x1dc   : > { %1519 = vmatmul.bf16.gmra.mxu0 %v1370_v63  ;;  %v1090_v63 = vld [vmem:[#allocation2 + $0x11] sm:$0xff] }
 0x1dd   : > { %v1121_v27 = vpack.c.bf16 %v1090_v63, %v1089_v35  ;;  %v2292_v35 = vpack.c.bf16 %v2261_v16, %v2260_v9  ;;  %v6875_v63 = vpack.c.bf16 %v1804_v10, %v1803_v22 }
 0x1de   : > { %v1056_v19 = vpop.f32.mrf.mxu2 }
 0x1df   : > { %2379 = vmatpush.bf16.msra.mxu0 %v6070_v49  ;;  %v6871_v23 = vadd.f32 %v1056_v19, %v6774_v60  ;;  %v6084_v60 = vld [vmem:[%s8467_s3 + $0x238] sm:$0xff]  ;;  %v2263_v19 = vld [vmem:[#allocation2 + $0x70] sm:$0xff] }
 0x1e0   : > { %2607 = vmatpush.bf16.msra.mxu1 %v6084_v60 }
 0x1e1   : > { %v6883_v32 = vpop.f32.mrf.mxu0 }
 0x1e2   : > { %8487 = vst [vmem:[#allocation21_spill] sm:$0xff] %v6883_v32  ;;  %v2262_v32 = vld [vmem:[#allocation2 + $0x68] sm:$0xff] }
 0x1e3   : > { %v6862_v43 = vpop.f32.mrf.mxu1  ;;  %2380 = vmatpush.bf16.msra.mxu0 %v6069_v37 }
 0x1e6   : > { %1210 = vmatmul.bf16.vlgmr.msrb.gmra.mxu3 %v1121_v27  ;;  %1718 = vmatmul.bf16.gmra.mxu1 %v6600_v61  ;;  %v6068_v61 = vld [vmem:[%s8467_s3 + $0x1b8] sm:$0xff]  ;;  %v1059_v37 = vpop.f32.mrf.mxu2 }
 0x1e7   : > { %2139 = vmatpush.bf16.msra.mxu3 %v6068_v61  ;;  %v6889_v10 = vadd.f32 %v1059_v37, %v6786_v20  ;;  %v1806_v61 = vld [vmem:[#allocation2 + $0x111] sm:$0xff]  ;;  %v2293_v20 = vpack.c.bf16 %v2263_v19, %v2262_v32 }
 0x1e8   : > { %1942 = vmatmul.bf16.gmra.mxu2 %v6875_v63  ;;  %v2265_v32 = vld [vmem:[#allocation2 + $0x90] sm:$0xff] }
 0x1e9   : > { %v6873_v49 = vpop.f32.mrf.mxu3  ;;  %v6900_v41 = vpop.f32.mrf.mxu0 }
 0x1ea   : > { %8489 = vst [vmem:[#allocation23_spill] sm:$0xff] %v6900_v41 }
 0x1eb   : > { %v6877_v27 = vpop.f32.mrf.mxu1 }
 0x1ec   : > { %2381 = vmatmul.bf16.vlgmr.msra.gmra.mxu0 %v2292_v35  ;;  %8486 = vst [vmem:[#allocation20_spill] sm:$0xff] %v6877_v27  ;;  %v1805_v35 = vld [vmem:[#allocation2 + $0x109] sm:$0xff] }
 0x1ed   : > { %v6904_v60 = vpack.c.bf16 %v1806_v61, %v1805_v35  ;;  %v1807_v35 = vld [vmem:[#allocation2 + $0x129] sm:$0xff]  ;;  %v1808_v61 = vld [vmem:[#allocation2 + $0x131] sm:$0xff] }
 0x1ee   : > { %v1061_v9 = vpop.f32.mrf.mxu2  ;;  %v6925_v1 = vpack.c.bf16 %v1808_v61, %v1807_v35  ;;  %v2267_v35 = vld [vmem:[#allocation2 + $0xb0] sm:$0xff] }
 0x1ef   : > { %v6898_v11 = vadd.f32 %v1061_v9, %v6803_v62 }
 0x1f1   : > { %v6891_v22 = vpop.f32.mrf.mxu3  ;;  %v6914_v62 = vpop.f32.mrf.mxu0 }
 0x1f2   : > { %8491 = vst [vmem:[#allocation25_spill] sm:$0xff] %v6914_v62 }
 0x1f3   : > { %v6893_v16 = vpop.f32.mrf.mxu1 }
 0x1f4   : > { %8488 = vst [vmem:[#allocation22_spill] sm:$0xff] %v6893_v16 }
 0x1f6   : > { %1215 = vmatmul.bf16.gmra.mxu3 %v6721_v48  ;;  %1723 = vmatmul.bf16.gmra.mxu1 %v6610_v8  ;;  %v1064_v8 = vpop.f32.mrf.mxu2 }
 0x1f7   : > { %v6910_v48 = vadd.f32 %v1064_v8, %v6826_v54 }
 0x1f8   : > { %1947 = vmatmul.bf16.gmra.mxu2 %v6904_v60 }
 0x1f9   : > { %v6902_v37 = vpop.f32.mrf.mxu3  ;;  %v6930_v51 = vpop.f32.mrf.mxu0 }
 0x1fa   : > { %8494 = vst [vmem:[#allocation28_spill] sm:$0xff] %v6930_v51  ;;  %v2266_v51 = vld [vmem:[#allocation2 + $0xa8] sm:$0xff] }
 0x1fb   : > { %v6906_v31 = vpop.f32.mrf.mxu1 }
 0x1fc   : > { %2386 = vmatmul.bf16.gmra.mxu0 %v2293_v20  ;;  %8490 = vst [vmem:[#allocation24_spill] sm:$0xff] %v6906_v31  ;;  %v2264_v20 = vld [vmem:[#allocation2 + $0x88] sm:$0xff] }
 0x1fd   : > { %v2294_v54 = vpack.c.bf16 %v2265_v32, %v2264_v20  ;;  %v1809_v20 = vld [vmem:[#allocation2 + $0x149] sm:$0xff] }
 0x1fe   : > { %v1066_v19 = vpop.f32.mrf.mxu2 }
 0x1ff   : > { %v6921_v41 = vadd.f32 %v1066_v19, %v6841_v21  ;;  %v6083_v21 = vld [vmem:[%s8467_s3 + $0x230] sm:$0xff] }
 0x200   : > { %2608 = vmatpush.bf16.msra.mxu1 %v6083_v21 }
 0x201   : > { %v6912_v12 = vpop.f32.mrf.mxu3  ;;  %v6944_v61 = vpop.f32.mrf.mxu0 }
 0x202   : > { %8496 = vst [vmem:[#allocation30_spill] sm:$0xff] %v6944_v61  ;;  %v2269_v61 = vld [vmem:[#allocation2 + $0xd0] sm:$0xff] }
 0x203   : > { %v6916_v9 = vpop.f32.mrf.mxu1 }
 0x204   : > { %8492 = vst [vmem:[#allocation26_spill] sm:$0xff] %v6916_v9 }
 0x206   : > { %1220 = vmatmul.bf16.gmra.mxu3 %v6737_v42  ;;  %1728 = vmatmul.bf16.gmra.mxu1 %v6637_v26  ;;  %v6067_v26 = vld [vmem:[%s8467_s3 + $0x1b0] sm:$0xff] }
 0x207   : > { %2140 = vmatpush.bf16.msra.mxu3 %v6067_v26  ;;  %v2295_v26 = vpack.c.bf16 %v2267_v35, %v2266_v51  ;;  %v1811_v51 = vld [vmem:[#allocation2 + $0x169] sm:$0xff]  ;;  %v1812_v35 = vld [vmem:[#allocation2 + $0x171] sm:$0xff] }
 0x208   : > { %1952 = vmatmul.bf16.gmra.mxu2 %v6925_v1  ;;  %v6964_v31 = vpack.c.bf16 %v1812_v35, %v1811_v51 }
 0x209   : > { %v6923_v8 = vpop.f32.mrf.mxu3  ;;  %v6953_v21 = vpop.f32.mrf.mxu0 }
 0x20a   : > { %8498 = vst [vmem:[#allocation32_spill] sm:$0xff] %v6953_v21 }
 0x20b   : > { %v6927_v62 = vpop.f32.mrf.mxu1 }
 0x20c   : > { %2391 = vmatmul.bf16.gmra.mxu0 %v2294_v54  ;;  %8493 = vst [vmem:[#allocation27_spill] sm:$0xff] %v6927_v62  ;;  %v1810_v54 = vld [vmem:[#allocation2 + $0x151] sm:$0xff] }
 0x20d   : > { %v6948_v9 = vpack.c.bf16 %v1810_v54, %v1809_v20  ;;  %v2268_v20 = vld [vmem:[#allocation2 + $0xc8] sm:$0xff] }
 0x20e   : > { %v2296_v54 = vpack.c.bf16 %v2269_v61, %v2268_v20  ;;  %v6082_v61 = vld [vmem:[%s8467_s3 + $0x228] sm:$0xff] }
 0x20f   : > { %2609 = vmatpush.bf16.msra.mxu1 %v6082_v61 }
 0x211   : > { %v6938_v32 = vpop.f32.mrf.mxu3  ;;  %v6966_v21 = vpop.f32.mrf.mxu0 }
 0x212   : > { %8500 = vst [vmem:[#allocation34_spill] sm:$0xff] %v6966_v21  ;;  %v1814_v21 = vld [vmem:[#allocation2 + $0x191] sm:$0xff] }
 0x213   : > { %v6940_v19 = vpop.f32.mrf.mxu1 }
 0x214   : > { %8495 = vst [vmem:[#allocation29_spill] sm:$0xff] %v6940_v19 }
 0x216   : > { %1225 = vmatmul.bf16.gmra.mxu3 %v6756_v33  ;;  %1733 = vmatmul.bf16.gmra.mxu1 %v6676_v58 }
 0x218   : > { %1957 = vmatmul.bf16.gmra.mxu2 %v6948_v9 }
 0x219   : > { %v6946_v62 = vpop.f32.mrf.mxu3  ;;  %v6982_v20 = vpop.f32.mrf.mxu0 }
 0x21a   : > { %8503 = vst [vmem:[#allocation37_spill] sm:$0xff] %v6982_v20 }
 0x21b   : > { %v6950_v45 = vpop.f32.mrf.mxu1 }
 0x21c   : > { %2396 = vmatmul.bf16.gmra.mxu0 %v2295_v26  ;;  %8497 = vst [vmem:[#allocation31_spill] sm:$0xff] %v6950_v45 }
 0x221   : > { %v6955_v19 = vpop.f32.mrf.mxu3  ;;  %v6996_v20 = vpop.f32.mrf.mxu0 }
 0x222   : > { %8505 = vst [vmem:[#allocation39_spill] sm:$0xff] %v6996_v20 }
 0x223   : > { %v6957_v58 = vpop.f32.mrf.mxu1 }
 0x224   : > { %8499 = vst [vmem:[#allocation33_spill] sm:$0xff] %v6957_v58 }
 0x226   : > { %1230 = vmatmul.bf16.gmra.mxu3 %v6776_v2  ;;  %1738 = vmatmul.bf16.gmra.mxu1 %v6695_v18  ;;  %v6066_v18 = vld [vmem:[%s8467_s3 + $0x1a8] sm:$0xff] }
 0x227   : > { %2141 = vmatpush.bf16.msra.mxu3 %v6066_v18  ;;  %v1813_v18 = vld [vmem:[#allocation2 + $0x189] sm:$0xff] }
 0x228   : > { %1962 = vmatmul.bf16.gmra.mxu2 %v6964_v31 }
 0x229   : > { %v1069_v26 = vpop.f32.mrf.mxu3 }
 0x22a   : > { %v6962_v45 = vadd.f32 %v1069_v26, %v6873_v49  ;;  %v6986_v26 = vpop.f32.mrf.mxu2 }
 0x22b   : > { %v6968_v34 = vpop.f32.mrf.mxu1 }
 0x22c   : > { %2401 = vmatmul.bf16.gmra.mxu0 %v2296_v54  ;;  %8501 = vst [vmem:[#allocation35_spill] sm:$0xff] %v6968_v34  ;;  %v2271_v54 = vld [vmem:[#allocation2 + $0xf0] sm:$0xff]  ;;  %v2270_v34 = vld [vmem:[#allocation2 + $0xe8] sm:$0xff] }
 0x22d   : > { %v2297_v58 = vpack.c.bf16 %v2271_v54, %v2270_v34  ;;  %v7007_v54 = vpop.f32.mrf.mxu0 }
 0x22e   : > { %8508 = vst [vmem:[#allocation42_spill] sm:$0xff] %v7007_v54  ;;  %v8514_v54 = vpack.c.bf16 %v6812_v0, %v6792_v17  ;;  %v6078_v17 = vld [vmem:[%s8467_s3 + $0x208] sm:$0xff] }
 0x231   : > { %v1071_v49 = vpop.f32.mrf.mxu3 }
 0x232   : > { %v6978_v51 = vadd.f32 %v1071_v49, %v6891_v22  ;;  %v6991_v22 = vpack.c.bf16 %v1814_v21, %v1813_v18  ;;  %v1816_v21 = vld [vmem:[#allocation2 + $0x1b1] sm:$0xff] }
 0x233   : > { %v6980_v35 = vpop.f32.mrf.mxu1 }
 0x234   : > { %8502 = vst [vmem:[#allocation36_spill] sm:$0xff] %v6980_v35 }
 0x236   : > { %1235 = vmatmul.bf16.gmra.mxu3 %v6805_v39  ;;  %1743 = vmatmul.bf16.gmra.mxu1 %v6711_v38  ;;  %v6998_v38 = vpop.f32.mrf.mxu2 }
 0x237   : > { %8506 = vst [vmem:[#allocation40_spill] sm:$0xff] %v6998_v38 }
 0x238   : > { %1967 = vmatmul.bf16.gmra.mxu2 %v6991_v22 }
 0x239   : > { %v1074_v16 = vpop.f32.mrf.mxu3 }
 0x23a   : > { %v6989_v61 = vadd.f32 %v1074_v16, %v6902_v37  ;;  %v2273_v16 = vld [vmem:[#allocation2 + $0x110] sm:$0xff] }
 0x23b   : > { %v6993_v49 = vpop.f32.mrf.mxu1  ;;  %v1815_v37 = vld [vmem:[#allocation2 + $0x1a9] sm:$0xff] }
 0x23c   : > { %2406 = vmatmul.bf16.gmra.mxu0 %v2297_v58  ;;  %8504 = vst [vmem:[#allocation38_spill] sm:$0xff] %v6993_v49  ;;  %v2272_v58 = vld [vmem:[#allocation2 + $0x108] sm:$0xff] }
 0x23d   : > { %v2298_v18 = vpack.c.bf16 %v2273_v16, %v2272_v58  ;;  %v6081_v16 = vld [vmem:[%s8467_s3 + $0x220] sm:$0xff]  ;;  %v6080_v58 = vld [vmem:[%s8467_s3 + $0x218] sm:$0xff] }
 0x23e   : > { %v7012_v38 = vpop.f32.mrf.mxu2  ;;  %2610 = vmatpush.bf16.msra.mxu1 %v6081_v16  ;;  %v2274_v16 = vld [vmem:[#allocation2 + $0x128] sm:$0xff] }
 0x23f   : > { %8509 = vst [vmem:[#allocation43_spill] sm:$0xff] %v7012_v38 }
 0x241   : > { %v1076_v35 = vpop.f32.mrf.mxu3 }
 0x242   : > { %v7001_v24 = vadd.f32 %v1076_v35, %v6912_v12  ;;  %v7014_v12 = vpack.c.bf16 %v1816_v21, %v1815_v37  ;;  %v7028_v37 = vpop.f32.mrf.mxu0  ;;  %2611 = vmatpush.bf16.msra.mxu1 %v6080_v58 }
 0x243   : > { %v7003_v34 = vpop.f32.mrf.mxu1  ;;  %8511 = vst [vmem:[#allocation45_spill] sm:$0xff] %v7028_v37  ;;  %v6079_v37 = vld [vmem:[%s8467_s3 + $0x210] sm:$0xff] }
 0x244   : > { %8507 = vst [vmem:[#allocation41_spill] sm:$0xff] %v7003_v34 }
 0x246   : > { %1240 = vmatmul.bf16.gmra.mxu3 %v6843_v46  ;;  %1748 = vmatmul.bf16.gmra.mxu1 %v6729_v55  ;;  %v6065_v55 = vld [vmem:[%s8467_s3 + $0x1a0] sm:$0xff] }
 0x247   : > { %2142 = vmatpush.bf16.msra.mxu3 %v6065_v55  ;;  %v2275_v55 = vld [vmem:[#allocation2 + $0x130] sm:$0xff]  ;;  %2612 = vmatpush.bf16.msra.mxu1 %v6079_v37 }
 0x248   : > { %1972 = vmatmul.bf16.gmra.mxu2 %v7014_v12 }
 0x249   : > { %v1079_v20 = vpop.f32.mrf.mxu3 }
 0x24a   : > { %v7010_v49 = vadd.f32 %v1079_v20, %v6923_v8 }
 0x24b   : > { %v7016_v35 = vpop.f32.mrf.mxu1  ;;  %2613 = vmatpush.bf16.msra.mxu1 %v6078_v17  ;;  %v1820_v17 = vld [vmem:[#allocation2 + $0x1f1] sm:$0xff] }
 0x24c   : > { %2411 = vmatmul.bf16.gmra.mxu0 %v2298_v18  ;;  %8510 = vst [vmem:[#allocation44_spill] sm:$0xff] %v7016_v35  ;;  %v7035_v18 = vpop.f32.mrf.mxu2 }
 0x24d   : > { %8513 = vst [vmem:[#allocation47_spill] sm:$0xff] %v7035_v18 }
 0x251   : > { %v1081_v8 = vpop.f32.mrf.mxu3 }
 0x252   : > { %v7026_v20 = vadd.f32 %v1081_v8, %v6938_v32  ;;  %v1817_v32 = vld [vmem:[#allocation2 + $0x1c9] sm:$0xff]  ;;  %v1818_v8 = vld [vmem:[#allocation2 + $0x1d1] sm:$0xff] }
 0x253   : > { %v7030_v21 = vpop.f32.mrf.mxu1  ;;  %v7047_v18 = vpack.c.bf16 %v1818_v8, %v1817_v32  ;;  %v2276_v32 = vld [vmem:[#allocation2 + $0x148] sm:$0xff] }
 0x254   : > { %8512 = vst [vmem:[#allocation46_spill] sm:$0xff] %v7030_v21  ;;  %v2299_v21 = vpack.c.bf16 %v2275_v55, %v2274_v16  ;;  %v7057_v58 = vpop.f32.mrf.mxu2  ;;  %v2277_v55 = vld [vmem:[#allocation2 + $0x150] sm:$0xff] }
 0x255   : > { %8517 = vst [vmem:[#allocation50_spill] sm:$0xff] %v7057_v58  ;;  %v1819_v8 = vld [vmem:[#allocation2 + $0x1e9] sm:$0xff] }
 0x256   : > { %1245 = vmatmul.bf16.gmra.mxu3 %v6875_v63  ;;  %1753 = vmatmul.bf16.gmra.mxu1 %v8514_v54  ;;  %v7054_v54 = vpop.f32.mrf.mxu0 }
 0x257   : > { %8516 = vst [vmem:[#allocation49_spill] sm:$0xff] %v7054_v54  ;;  %v6064_v54 = vld [vmem:[%s8467_s3 + $0x198] sm:$0xff] }
 0x258   : > { %1977 = vmatmul.bf16.gmra.mxu2 %v7047_v18  ;;  %2143 = vmatpush.bf16.msra.mxu3 %v6064_v54 }
 0x259   : > { %v1084_v35 = vpop.f32.mrf.mxu3 }
 0x25a   : > { %v7045_v34 = vadd.f32 %v1084_v35, %v6946_v62  ;;  %v6077_v62 = vld [vmem:[%s8467_s3 + $0x200] sm:$0xff] }
 0x25b   : > { %v7049_v38 = vpop.f32.mrf.mxu1  ;;  %2614 = vmatpush.bf16.msra.mxu1 %v6077_v62 }
 0x25c   : > { %2416 = vmatmul.bf16.gmra.mxu0 %v2299_v21  ;;  %8515 = vst [vmem:[#allocation48_spill] sm:$0xff] %v7049_v38  ;;  %v7074_v38 = vpop.f32.mrf.mxu2 }
 0x25d   : > { %8520 = vst [vmem:[#allocation53_spill] sm:$0xff] %v7074_v38 }
 0x25e   : > { %v7069_v16 = vpop.f32.mrf.mxu0 }
 0x25f   : > { %8519 = vst [vmem:[#allocation52_spill] sm:$0xff] %v7069_v16  ;;  %v1012_v16 = vadd.f32 %v6643_v29, %v6590_v53 }
 0x261   : > { %v1086_v35 = vpop.f32.mrf.mxu3 }
 0x262   : > { %v7063_v21 = vadd.f32 %v1086_v35, %v6955_v19  ;;  %v2300_v19 = vpack.c.bf16 %v2277_v55, %v2276_v32  ;;  %v2278_v32 = vld [vmem:[#allocation2 + $0x168] sm:$0xff] }
 0x263   : > { %v7065_v37 = vpop.f32.mrf.mxu1 }
 0x264   : > { %8518 = vst [vmem:[#allocation51_spill] sm:$0xff] %v7065_v37  ;;  %v7079_v37 = vpack.c.bf16 %v1820_v17, %v1819_v8  ;;  %v7090_v55 = vpop.f32.mrf.mxu2  ;;  %v1821_v8 = vld [vmem:[#allocation2 + $0x209] sm:$0xff]  ;;  %v1822_v17 = vld [vmem:[#allocation2 + $0x211] sm:$0xff] }
 0x266   : > { %1250 = vmatmul.bf16.gmra.mxu3 %v6904_v60  ;;  %2615 = vmatmul.bf16.vlgmr.msra.gmra.mxu1 %v6737_v42  ;;  %v7086_v58 = vpop.f32.mrf.mxu0 }
 0x267   : > { %8522 = vst [vmem:[#allocation55_spill] sm:$0xff] %v7086_v58 }
 0x268   : > { %1982 = vmatmul.bf16.gmra.mxu2 %v7079_v37 }
 0x269   : > { %v1211_v35 = vpop.f32.mrf.mxu3 }
 0x26a   : > { %v7077_v62 = vadd.f32 %v1211_v35, %v6595_v56  ;;  %v2279_v56 = vld [vmem:[#allocation2 + $0x170] sm:$0xff] }
 0x26b   : > { %v7081_v42 = vpop.f32.mrf.mxu1  ;;  %v2301_v35 = vpack.c.bf16 %v2279_v56, %v2278_v32 }
 0x26c   : > { %2421 = vmatmul.bf16.gmra.mxu0 %v2300_v19  ;;  %8521 = vst [vmem:[#allocation54_spill] sm:$0xff] %v7081_v42  ;;  %v6100_v19 = vld [vmem:[#allocation4 + $0x78] sm:$0xff] }
 0x26d   : > { %3078 = vmatpush.bf16.msra.mxu2 %v6100_v19 }
 0x271   : > { %v1213_v27 = vpop.f32.mrf.mxu3 }
 0x272   : > { %v7088_v38 = vadd.f32 %v1213_v27, %v1012_v16  ;;  %v7099_v27 = vpop.f32.mrf.mxu0  ;;  %v7101_v16 = vpack.c.bf16 %v1822_v17, %v1821_v8  ;;  %v2280_v8 = vld [vmem:[#allocation2 + $0x188] sm:$0xff]  ;;  %v6063_v17 = vld [vmem:[%s8467_s3 + $0x190] sm:$0xff] }
 0x273   : > { %v7092_v54 = vpop.f32.mrf.mxu1  ;;  %8524 = vst [vmem:[#allocation57_spill] sm:$0xff] %v7099_v27  ;;  %2144 = vmatpush.bf16.msra.mxu3 %v6063_v17 }
 0x274   : > { %8523 = vst [vmem:[#allocation56_spill] sm:$0xff] %v7092_v54  ;;  %v7105_v54 = vpop.f32.mrf.mxu2 }
 0x276   : > { %1255 = vmatmul.bf16.gmra.mxu3 %v6925_v1  ;;  %2620 = vmatmul.bf16.gmra.mxu1 %v6756_v33 }
 0x278   : > { %1987 = vmatmul.bf16.gmra.mxu2 %v7101_v16 }
 0x279   : > { %v1216_v53 = vpop.f32.mrf.mxu3 }
 0x27a   : > { %v7097_v29 = vadd.f32 %v1216_v53, %v6669_v52  ;;  %v7113_v32 = vpop.f32.mrf.mxu0  ;;  %v2281_v52 = vld [vmem:[#allocation2 + $0x190] sm:$0xff] }
 0x27b   : > { %v7103_v58 = vpop.f32.mrf.mxu1  ;;  %8527 = vst [vmem:[#allocation60_spill] sm:$0xff] %v7113_v32  ;;  %v2302_v19 = vpack.c.bf16 %v2281_v52, %v2280_v8  ;;  %v2283_v52 = vld [vmem:[#allocation2 + $0x1b0] sm:$0xff] }
 0x27c   : > { %2426 = vmatmul.bf16.gmra.mxu0 %v2301_v35  ;;  %8525 = vst [vmem:[#allocation58_spill] sm:$0xff] %v7103_v58  ;;  %v6099_v8 = vld [vmem:[#allocation4 + $0x70] sm:$0xff] }
 0x27d   : > { %3079 = vmatpush.bf16.msra.mxu2 %v6099_v8 }
 0x281   : > { %v1218_v33 = vpop.f32.mrf.mxu3 }
 0x282   : > { %v7109_v42 = vadd.f32 %v1218_v33, %v6687_v6  ;;  %v7125_v33 = vpop.f32.mrf.mxu0 }
 0x283   : > { %v7111_v56 = vpop.f32.mrf.mxu1  ;;  %8529 = vst [vmem:[#allocation62_spill] sm:$0xff] %v7125_v33 }
 0x284   : > { %8526 = vst [vmem:[#allocation59_spill] sm:$0xff] %v7111_v56  ;;  %v2282_v56 = vld [vmem:[#allocation2 + $0x1a8] sm:$0xff] }
 0x285   : > { %v2303_v17 = vpack.c.bf16 %v2283_v52, %v2282_v56  ;;  %v2285_v56 = vld [vmem:[#allocation2 + $0x1d0] sm:$0xff] }
 0x286   : > { %1260 = vmatmul.bf16.gmra.mxu3 %v6948_v9  ;;  %2625 = vmatmul.bf16.gmra.mxu1 %v6776_v2 }
 0x289   : > { %v1221_v35 = vpop.f32.mrf.mxu3 }
 0x28a   : > { %v7121_v6 = vadd.f32 %v1221_v35, %v6693_v15  ;;  %v7134_v15 = vpop.f32.mrf.mxu0 }
 0x28b   : > { %v7123_v53 = vpop.f32.mrf.mxu1 }
 0x28c   : > { %2431 = vmatmul.bf16.gmra.mxu0 %v2302_v19  ;;  %8528 = vst [vmem:[#allocation61_spill] sm:$0xff] %v7123_v53 }
 0x291   : > { %v1223_v32 = vpop.f32.mrf.mxu3 }
 0x292   : > { %v7128_v27 = vadd.f32 %v1223_v32, %v6703_v28 }
 0x293   : > { %v7130_v2 = vpop.f32.mrf.mxu1 }
 0x294   : > { %8530 = vst [vmem:[#allocation63_spill] sm:$0xff] %v7130_v2  ;;  %v7144_v2 = vpop.f32.mrf.mxu0 }
 0x296   : > { %1265 = vmatmul.bf16.gmra.mxu3 %v6964_v31  ;;  %2630 = vmatmul.bf16.gmra.mxu1 %v6805_v39  ;;  %v2284_v39 = vld [vmem:[#allocation2 + $0x1c8] sm:$0xff] }
 0x297   : > { %v2304_v52 = vpack.c.bf16 %v2285_v56, %v2284_v39  ;;  %v2287_v39 = vld [vmem:[#allocation2 + $0x1f0] sm:$0xff] }
 0x299   : > { %v1226_v19 = vpop.f32.mrf.mxu3 }
 0x29a   : > { %v7137_v35 = vadd.f32 %v1226_v19, %v6709_v50  ;;  %v6062_v50 = vld [vmem:[%s8467_s3 + $0x188] sm:$0xff] }
 0x29b   : > { %v7139_v28 = vpop.f32.mrf.mxu1  ;;  %2145 = vmatpush.bf16.msra.mxu3 %v6062_v50 }
 0x29c   : > { %2436 = vmatmul.bf16.gmra.mxu0 %v2303_v17  ;;  %8531 = vst [vmem:[#allocation64_spill] sm:$0xff] %v7139_v28  ;;  %v7158_v19 = vpop.f32.mrf.mxu0  ;;  %v2286_v28 = vld [vmem:[#allocation2 + $0x1e8] sm:$0xff] }
 0x29d   : > { %v2305_v50 = vpack.c.bf16 %v2287_v39, %v2286_v28 }
 0x2a1   : > { %v1228_v32 = vpop.f32.mrf.mxu3 }
 0x2a2   : > { %v7142_v33 = vadd.f32 %v1228_v32, %v6719_v47 }
 0x2a3   : > { %v7146_v53 = vpop.f32.mrf.mxu1 }
 0x2a4   : > { %8532 = vst [vmem:[#allocation65_spill] sm:$0xff] %v7146_v53  ;;  %v7167_v56 = vpop.f32.mrf.mxu0 }
 0x2a6   : > { %1270 = vmatmul.bf16.gmra.mxu3 %v6991_v22  ;;  %2635 = vmatmul.bf16.gmra.mxu1 %v6843_v46 }
 0x2a9   : > { %v1231_v8 = vpop.f32.mrf.mxu3 }
 0x2aa   : > { %v7154_v47 = vadd.f32 %v1231_v8, %v6727_v59  ;;  %v6098_v59 = vld [vmem:[#allocation4 + $0x68] sm:$0xff] }
 0x2ab   : > { %v7156_v17 = vpop.f32.mrf.mxu1  ;;  %3080 = vmatpush.bf16.msra.mxu2 %v6098_v59 }
 0x2ac   : > { %2441 = vmatmul.bf16.gmra.mxu0 %v2304_v52  ;;  %8533 = vst [vmem:[#allocation66_spill] sm:$0xff] %v7156_v17 }
 0x2b1   : > { %v1233_v32 = vpop.f32.mrf.mxu3 }
 0x2b2   : > { %v7161_v53 = vadd.f32 %v1233_v32, %v6735_v5  ;;  %v7174_v32 = vpop.f32.mrf.mxu0 }
 0x2b3   : > { %v7163_v46 = vpop.f32.mrf.mxu1 }
 0x2b4   : > { %8534 = vst [vmem:[#allocation67_spill] sm:$0xff] %v7163_v46 }
 0x2b6   : > { %1275 = vmatmul.bf16.gmra.mxu3 %v7014_v12  ;;  %2640 = vmatmul.bf16.gmra.mxu1 %v6875_v63  ;;  %v2288_v63 = vld [vmem:[#allocation2 + $0x208] sm:$0xff] }
 0x2b7   : > { %v2306_v28 = vpack.c.bf16 %v6812_v0, %v2288_v63  ;;  %v6097_v0 = vld [vmem:[#allocation4 + $0x60] sm:$0xff] }
 0x2b8   : > { %3081 = vmatpush.bf16.msra.mxu2 %v6097_v0 }
 0x2b9   : > { %v1236_v52 = vpop.f32.mrf.mxu3 }
 0x2ba   : > { %v7170_v8 = vadd.f32 %v1236_v52, %v6742_v13  ;;  %v6061_v13 = vld [vmem:[%s8467_s3 + $0x180] sm:$0xff] }
 0x2bb   : > { %v7172_v5 = vpop.f32.mrf.mxu1  ;;  %2146 = vmatpush.bf16.msra.mxu3 %v6061_v13 }
 0x2bc   : > { %2446 = vmatmul.bf16.gmra.mxu0 %v2305_v50  ;;  %8535 = vst [vmem:[#allocation68_spill] sm:$0xff] %v7172_v5  ;;  %v2028_v5 = vld [vmem:[#allocation2 + $0x67] sm:$0xff] }
 0x2c1   : > { %v1238_v46 = vpop.f32.mrf.mxu3 }
 0x2c2   : > { %v7177_v17 = vadd.f32 %v1238_v46, %v6747_v7  ;;  %v7190_v7 = vpop.f32.mrf.mxu0 }
 0x2c3   : > { %v7179_v58 = vpop.f32.mrf.mxu1 }
 0x2c4   : > { %8536 = vst [vmem:[#allocation69_spill] sm:$0xff] %v7179_v58 }
 0x2c6   : > { %1280 = vmatmul.bf16.gmra.mxu3 %v7047_v18  ;;  %2645 = vmatmul.bf16.gmra.mxu1 %v6904_v60 }
 0x2c9   : > { %v1241_v39 = vpop.f32.mrf.mxu3 }
 0x2ca   : > { %v7188_v59 = vadd.f32 %v1241_v39, %v6759_v40 }
 0x2cb   : > { %v7192_v46 = vpop.f32.mrf.mxu1 }
 0x2cc   : > { %8537 = vst [vmem:[#allocation70_spill] sm:$0xff] %v7188_v59  ;;  %2451 = vmatmul.bf16.gmra.mxu0 %v2306_v28  ;;  %v2027_v28 = vld [vmem:[#allocation2 + $0x4f] sm:$0xff] }
 0x2cd   : > { %8538 = vst [vmem:[#allocation71_spill] sm:$0xff] %v7192_v46 }
 0x2d1   : > { %v1243_v50 = vpop.f32.mrf.mxu3 }
 0x2d2   : > { %v7195_v52 = vadd.f32 %v1243_v50, %v6769_v36  ;;  %v2026_v36 = vld [vmem:[#allocation2 + $0x47] sm:$0xff] }
 0x2d3   : > { %v7197_v60 = vpop.f32.mrf.mxu1 }
 0x2d4   : > { %8539 = vst [vmem:[#allocation72_spill] sm:$0xff] %v7195_v52 }
 0x2d5   : > { %8540 = vst [vmem:[#allocation73_spill] sm:$0xff] %v7197_v60  ;;  %v2058_v60 = vpack.c.bf16 %v2027_v28, %v2026_v36 }
 0x2d6   : > { %1285 = vmatmul.bf16.gmra.mxu3 %v7079_v37  ;;  %2650 = vmatmul.bf16.gmra.mxu1 %v6925_v1  ;;  %v6096_v1 = vld [vmem:[#allocation4 + $0x58] sm:$0xff] }
 0x2d7   : > { %3082 = vmatpush.bf16.msra.mxu2 %v6096_v1 }
 0x2d9   : > { %v1246_v63 = vpop.f32.mrf.mxu3 }
 0x2da   : > { %v7202_v40 = vadd.f32 %v1246_v63, %v6781_v3  ;;  %v7217_v63 = vpop.f32.mrf.mxu0 }
 0x2db   : > { %v7204_v13 = vpop.f32.mrf.mxu1 }
 0x2dc   : > { %8541 = vst [vmem:[#allocation74_spill] sm:$0xff] %v7202_v40  ;;  %v2033_v40 = vld [vmem:[#allocation2 + $0xaf] sm:$0xff] }
 0x2dd   : > { %8542 = vst [vmem:[#allocation75_spill] sm:$0xff] %v7204_v13  ;;  %v2029_v13 = vld [vmem:[#allocation2 + $0x6f] sm:$0xff] }
 0x2e1   : > { %v1248_v39 = vpop.f32.mrf.mxu3 }
 0x2e2   : > { %v7207_v46 = vadd.f32 %v1248_v39, %v6794_v44 }
 0x2e3   : > { %v7209_v50 = vpop.f32.mrf.mxu1 }
 0x2e4   : > { %8543 = vst [vmem:[#allocation76_spill] sm:$0xff] %v7207_v46 }
 0x2e6   : > { %2147 = vmatmul.bf16.vlgmr.msra.gmra.mxu3 %v2058_v60  ;;  %2655 = vmatmul.bf16.gmra.mxu1 %v6948_v9  ;;  %v2059_v60 = vpack.c.bf16 %v2029_v13, %v2028_v5  ;;  %v7225_v9 = vpop.f32.mrf.mxu0 }
 0x2e9   : > { %v1251_v58 = vpop.f32.mrf.mxu3 }
 0x2ea   : > { %v7213_v0 = vadd.f32 %v1251_v58, %v6815_v25  ;;  %v6095_v25 = vld [vmem:[#allocation4 + $0x50] sm:$0xff] }
 0x2eb   : > { %v7215_v3 = vpop.f32.mrf.mxu1  ;;  %3083 = vmatpush.bf16.msra.mxu2 %v6095_v25 }
 0x2ec   : > { %8544 = vst [vmem:[#allocation77_spill] sm:$0xff] %v7213_v0  ;;  %v7232_v0 = vpop.f32.mrf.mxu2 }
 0x2f1   : > { %v1253_v44 = vpop.f32.mrf.mxu3 }
 0x2f2   : > { %v7220_v39 = vadd.f32 %v1253_v44, %v6833_v57  ;;  %v2031_v57 = vld [vmem:[#allocation2 + $0x8f] sm:$0xff]  ;;  %v7234_v44 = vpop.f32.mrf.mxu0 }
 0x2f3   : > { %v7222_v28 = vpop.f32.mrf.mxu1 }
 0x2f4   : > { %8545 = vst [vmem:[#allocation78_spill] sm:$0xff] %v7220_v39  ;;  %v7242_v25 = vpop.f32.mrf.mxu2 }
 0x2f6   : > { %2152 = vmatmul.bf16.gmra.mxu3 %v2059_v60  ;;  %2660 = vmatmul.bf16.gmra.mxu1 %v6964_v31  ;;  %v2030_v31 = vld [vmem:[#allocation2 + $0x87] sm:$0xff] }
 0x2f7   : > { %v2060_v60 = vpack.c.bf16 %v2031_v57, %v2030_v31 }
 0x2f9   : > { %v1256_v58 = vpop.f32.mrf.mxu3 }
 0x2fa   : > { %v7228_v36 = vadd.f32 %v1256_v58, %v6857_v30 }
 0x2fb   : > { %v7230_v1 = vpop.f32.mrf.mxu1 }
 0x2fc   : > { %8546 = vst [vmem:[#allocation79_spill] sm:$0xff] %v7228_v36  ;;  %v7247_v36 = vpop.f32.mrf.mxu0 }
 0x301   : > { %v1258_v39 = vpop.f32.mrf.mxu3 }
 0x302   : > { %v7237_v5 = vadd.f32 %v1258_v39, %v6871_v23 }
 0x303   : > { %v7239_v13 = vpop.f32.mrf.mxu1 }
 0x304   : > { %8547 = vst [vmem:[#allocation80_spill] sm:$0xff] %v7237_v5  ;;  %v2032_v5 = vld [vmem:[#allocation2 + $0xa7] sm:$0xff] }
 0x305   : > { %v2061_v31 = vpack.c.bf16 %v2033_v40, %v2032_v5  ;;  %v2035_v40 = vld [vmem:[#allocation2 + $0xcf] sm:$0xff] }
 0x306   : > { %2157 = vmatmul.bf16.gmra.mxu3 %v2060_v60  ;;  %2665 = vmatmul.bf16.gmra.mxu1 %v6991_v22  ;;  %v7256_v22 = vpop.f32.mrf.mxu2  ;;  %v7258_v60 = vpop.f32.mrf.mxu0 }
 0x309   : > { %v1261_v30 = vpop.f32.mrf.mxu3 }
 0x30a   : > { %v7245_v58 = vadd.f32 %v1261_v30, %v6889_v10  ;;  %v6094_v10 = vld [vmem:[#allocation4 + $0x48] sm:$0xff] }
 0x30b   : > { %v7249_v46 = vpop.f32.mrf.mxu1  ;;  %3084 = vmatpush.bf16.msra.mxu2 %v6094_v10 }
 0x30c   : > { %8548 = vst [vmem:[#allocation81_spill] sm:$0xff] %v7245_v58 }
 0x311   : > { %v1263_v23 = vpop.f32.mrf.mxu3 }
 0x312   : > { %v7252_v39 = vadd.f32 %v1263_v23, %v6898_v11  ;;  %v7266_v11 = vpop.f32.mrf.mxu2  ;;  %v7268_v23 = vpop.f32.mrf.mxu0 }
 0x313   : > { %v7254_v57 = vpop.f32.mrf.mxu1  ;;  %8551 = vst [vmem:[#allocation84_spill] sm:$0xff] %v7266_v11  ;;  %v2037_v11 = vld [vmem:[#allocation2 + $0xef] sm:$0xff] }
 0x314   : > { %8549 = vst [vmem:[#allocation82_spill] sm:$0xff] %v7252_v39 }
 0x315   : > { %8552 = vst [vmem:[#allocation85_spill] sm:$0xff] %v7268_v23 }
 0x316   : > { %2162 = vmatmul.bf16.gmra.mxu3 %v2061_v31  ;;  %2670 = vmatmul.bf16.gmra.mxu1 %v7014_v12  ;;  %v2034_v31 = vld [vmem:[#allocation2 + $0xc7] sm:$0xff] }
 0x317   : > { %v2062_v12 = vpack.c.bf16 %v2035_v40, %v2034_v31  ;;  %v2036_v40 = vld [vmem:[#allocation2 + $0xe7] sm:$0xff] }
 0x319   : > { %v1266_v30 = vpop.f32.mrf.mxu3 }
 0x31a   : > { %v7262_v58 = vadd.f32 %v1266_v30, %v6910_v48  ;;  %v7276_v48 = vpop.f32.mrf.mxu2  ;;  %v7278_v10 = vpop.f32.mrf.mxu0 }
 0x31b   : > { %v7264_v52 = vpop.f32.mrf.mxu1  ;;  %8554 = vst [vmem:[#allocation87_spill] sm:$0xff] %v7276_v48  ;;  %v6108_v48 = vld [vmem:[#allocation4 + $0xb8] sm:$0xff] }
 0x31c   : > { %8550 = vst [vmem:[#allocation83_spill] sm:$0xff] %v7262_v58  ;;  %3417 = vmatpush.bf16.msrb.mxu0 %v6108_v48 }
 0x31d   : > { %8555 = vst [vmem:[#allocation88_spill] sm:$0xff] %v7278_v10  ;;  %v6093_v10 = vld [vmem:[#allocation4 + $0x40] sm:$0xff] }
 0x31e   : > { %3085 = vmatpush.bf16.msra.mxu2 %v6093_v10  ;;  %v6105_v10 = vld [vmem:[#allocation4 + $0xa0] sm:$0xff] }
 0x321   : > { %v1268_v5 = vpop.f32.mrf.mxu3 }
 0x322   : > { %v7271_v39 = vadd.f32 %v1268_v5, %v6921_v41  ;;  %v7285_v5 = vpop.f32.mrf.mxu2  ;;  %v7290_v31 = vpop.f32.mrf.mxu0 }
 0x323   : > { %v7273_v59 = vpop.f32.mrf.mxu1  ;;  %8557 = vst [vmem:[#allocation90_spill] sm:$0xff] %v7285_v5 }
 0x324   : > { %8553 = vst [vmem:[#allocation86_spill] sm:$0xff] %v7271_v39 }
 0x325   : > { %8559 = vst [vmem:[#allocation92_spill] sm:$0xff] %v7290_v31 }
 0x326   : > { %2167 = vmatmul.bf16.gmra.mxu3 %v2062_v12  ;;  %2675 = vmatmul.bf16.gmra.mxu1 %v7047_v18  ;;  %v2063_v12 = vpack.c.bf16 %v2037_v11, %v2036_v40  ;;  %v6106_v11 = vld [vmem:[#allocation4 + $0xa8] sm:$0xff] }
 0x327   : > { %v2039_v40 = vld [vmem:[#allocation2 + $0x10f] sm:$0xff] }
 0x329   : > { %v1271_v30 = vpop.f32.mrf.mxu3 }
 0x32a   : > { %v7281_v58 = vadd.f32 %v1271_v30, %v6962_v45 }
 0x32b   : > { %v7283_v23 = vpop.f32.mrf.mxu1 }
 0x32c   : > { %8556 = vst [vmem:[#allocation89_spill] sm:$0xff] %v7281_v58 }
 0x331   : > { %v1273_v41 = vpop.f32.mrf.mxu3 }
 0x332   : > { %v7288_v39 = vadd.f32 %v1273_v41, %v6978_v51  ;;  %v7300_v51 = vpop.f32.mrf.mxu2  ;;  %v6107_v41 = vld [vmem:[#allocation4 + $0xb0] sm:$0xff] }
 0x333   : > { %v7292_v18 = vpop.f32.mrf.mxu1  ;;  %8561 = vst [vmem:[#allocation94_spill] sm:$0xff] %v7300_v51  ;;  %3418 = vmatpush.bf16.msrb.mxu0 %v6107_v41  ;;  %v6116_v51 = vld [vmem:[#allocation4 + $0xf8] sm:$0xff] }
 0x334   : > { %8558 = vst [vmem:[#allocation91_spill] sm:$0xff] %v7288_v39  ;;  %v7302_v39 = vpop.f32.mrf.mxu0  ;;  %v6104_v41 = vld [vmem:[#allocation4 + $0x98] sm:$0xff]  ;;  %3651 = vmatpush.bf16.msrb.mxu1 %v6116_v51  ;;  %v6103_v51 = vld [vmem:[#allocation4 + $0x90] sm:$0xff] }
 0x335   : > { %8562 = vst [vmem:[#allocation95_spill] sm:$0xff] %v7302_v39 }
 0x336   : > { %2172 = vmatmul.bf16.gmra.mxu3 %v2063_v12  ;;  %2680 = vmatmul.bf16.gmra.mxu1 %v7079_v37  ;;  %v2038_v37 = vld [vmem:[#allocation2 + $0x107] sm:$0xff] }
 0x337   : > { %3419 = vmatpush.bf16.msrb.mxu0 %v6106_v11 }
 0x339   : > { %v1276_v45 = vpop.f32.mrf.mxu3 }
 0x33a   : > { %v7296_v30 = vadd.f32 %v1276_v45, %v6989_v61  ;;  %v2064_v61 = vpack.c.bf16 %v2039_v40, %v2038_v37  ;;  %v6206_v45 = vld [vmem:[#allocation2] sm:$0xff]  ;;  %v7309_v5 = vpop.f32.mrf.mxu2  ;;  %v2041_v37 = vld [vmem:[#allocation2 + $0x12f] sm:$0xff] }
 0x33b   : > { %v7298_v58 = vpop.f32.mrf.mxu1  ;;  %8564 = vst [vmem:[#allocation97_spill] sm:$0xff] %v7309_v5  ;;  %3420 = vmatpush.bf16.msrb.mxu0 %v6105_v10 }
 0x33c   : > { %8560 = vst [vmem:[#allocation93_spill] sm:$0xff] %v7296_v30  ;;  %v2307_v30 = vpack.c.bf16 %v6206_v45, %v6206_v45  ;;  %v7312_v39 = vpop.f32.mrf.mxu0  ;;  %v2040_v45 = vld [vmem:[#allocation2 + $0x127] sm:$0xff] }
 0x33d   : > { %8565 = vst [vmem:[#allocation98_spill] sm:$0xff] %v7312_v39  ;;  %v6115_v39 = vld [vmem:[#allocation4 + $0xf0] sm:$0xff] }
 0x33e   : > { %2456 = vmatmul.bf16.gmra.mxu0 %v2307_v30  ;;  %3086 = vmatmul.bf16.vlgmr.msra.gmra.mxu2 %v2307_v30  ;;  %v2065_v30 = vpack.c.bf16 %v2041_v37, %v2040_v45  ;;  %v6113_v45 = vld [vmem:[#allocation4 + $0xe0] sm:$0xff] }
 0x33f   : > { %3421 = vmatpush.bf16.msrb.mxu0 %v6104_v41  ;;  %3652 = vmatpush.bf16.msrb.mxu1 %v6115_v39  ;;  %v6102_v41 = vld [vmem:[#allocation4 + $0x88] sm:$0xff] }
 0x340   : > { %v3304_v39 = vld [vmem:[#allocation3 + $0x9] sm:$0xff] }
 0x341   : > { %v1278_v12 = vpop.f32.mrf.mxu3 }
 0x342   : > { %v7305_v31 = vadd.f32 %v1278_v12, %v7001_v24  ;;  %v7319_v12 = vpop.f32.mrf.mxu2 }
 0x343   : > { %v7307_v48 = vpop.f32.mrf.mxu1  ;;  %8567 = vst [vmem:[#allocation100_spill] sm:$0xff] %v7319_v12  ;;  %3422 = vmatpush.bf16.msrb.mxu0 %v6103_v51  ;;  %v2525_v51 = vld [vmem:[#allocation2 + $0x231] sm:$0xff] }
 0x344   : > { %8563 = vst [vmem:[#allocation96_spill] sm:$0xff] %v7305_v31 }
 0x346   : > { %2177 = vmatmul.bf16.gmra.mxu3 %v2064_v61  ;;  %2685 = vmatmul.bf16.gmra.mxu1 %v7101_v16  ;;  %v7321_v61 = vpop.f32.mrf.mxu0 }
 0x347   : > { %8568 = vst [vmem:[#allocation101_spill] sm:$0xff] %v7321_v61  ;;  %3423 = vmatpush.bf16.msrb.mxu0 %v6102_v41 }
 0x349   : > { %v1281_v24 = vpop.f32.mrf.mxu3 }
 0x34a   : > { %v7315_v11 = vadd.f32 %v1281_v24, %v7010_v49  ;;  %v6092_v49 = vld [vmem:[#allocation4 + $0x38] sm:$0xff]  ;;  %v6114_v24 = vld [vmem:[#allocation4 + $0xe8] sm:$0xff]  ;;  %v7328_v12 = vpop.f32.mrf.mxu2 }
 0x34b   : > { %v7317_v40 = vpop.f32.mrf.mxu1  ;;  %3215 = vmatpush.bf16.msrb.mxu3 %v6092_v49  ;;  %8571 = vst [vmem:[#allocation104_spill] sm:$0xff] %v7328_v12  ;;  %3653 = vmatpush.bf16.msrb.mxu1 %v6114_v24  ;;  %v6124_v12 = vld [vmem:[#allocation4 + $0x138] sm:$0xff] }
 0x34c   : > { %8566 = vst [vmem:[#allocation99_spill] sm:$0xff] %v7315_v11  ;;  %3885 = vmatpush.bf16.msrb.mxu2 %v6124_v12 }
 0x34f   : > { %3654 = vmatpush.bf16.msrb.mxu1 %v6113_v45 }
 0x351   : > { %v1283_v16 = vpop.f32.mrf.mxu3 }
 0x352   : > { %v7324_v10 = vadd.f32 %v1283_v16, %v7026_v20  ;;  %v7333_v20 = vpop.f32.mrf.mxu0  ;;  %v6101_v16 = vld [vmem:[#allocation4 + $0x80] sm:$0xff] }
 0x353   : > { %v7326_v31 = vpop.f32.mrf.mxu1  ;;  %8573 = vst [vmem:[#allocation106_spill] sm:$0xff] %v7333_v20  ;;  %3424 = vmatpush.bf16.msrb.mxu0 %v6101_v16  ;;  %v7342_v16 = vpop.f32.mrf.mxu2 }
 0x354   : > { %8569 = vst [vmem:[#allocation102_spill] sm:$0xff] %v7324_v10  ;;  %v3305_v10 = vld [vmem:[#allocation3 + $0x11] sm:$0xff] }
 0x355   : > { %8570 = vst [vmem:[#allocation103_spill] sm:$0xff] %v7326_v31  ;;  %v3336_v5 = vpack.c.bf16 %v3305_v10, %v3304_v39  ;;  %v6112_v31 = vld [vmem:[#allocation4 + $0xd8] sm:$0xff] }
 0x356   : > { %2182 = vmatmul.bf16.gmra.mxu3 %v2065_v30  ;;  %v2524_v30 = vld [vmem:[#allocation2 + $0x229] sm:$0xff]  ;;  %3655 = vmatpush.bf16.msrb.mxu1 %v6112_v31 }
 0x357   : > { %v2541_v49 = vpack.c.bf16 %v2525_v51, %v2524_v30  ;;  %3425 = vmatmul.bf16.vlgmr.msrb.gmra.mxu0 %v3336_v5  ;;  %v6111_v30 = vld [vmem:[#allocation4 + $0xd0] sm:$0xff] }
 0x359   : > { %v1286_v11 = vpop.f32.mrf.mxu3  ;;  %2690 = vmatmul.bf16.gmra.mxu1 %v2541_v49 }
 0x35a   : > { %v7331_v61 = vadd.f32 %v1286_v11, %v7045_v34  ;;  %v1525_v34 = vadd.f32 %v6681_v4, %v7077_v62  ;;  %v2043_v11 = vld [vmem:[#allocation2 + $0x14f] sm:$0xff]  ;;  %v7347_v51 = vpop.f32.mrf.mxu0  ;;  %3656 = vmatpush.bf16.msrb.mxu1 %v6111_v30  ;;  %v1526_v62 = vadd.f32 %v6690_v14, %v7088_v38  ;;  %v8576_v38 = vld [vmem:[#allocation7_spill] sm:$0xff] }
 0x35b   : > { %v7335_v37 = vpop.f32.mrf.mxu1  ;;  %v6110_v4 = vld [vmem:[#allocation4 + $0xc8] sm:$0xff]  ;;  %v7359_v49 = vpop.f32.mrf.mxu2 }
 0x35c   : > { %8572 = vst [vmem:[#allocation105_spill] sm:$0xff] %v7331_v61  ;;  %v2042_v61 = vld [vmem:[#allocation2 + $0x147] sm:$0xff]  ;;  %v1759_v10 = vadd.f32 %v6862_v43, %v1525_v34  ;;  %v7356_v43 = vld [vmem:[%s8468_s4] ss:$0 sm:$0xff]  ;;  %v2045_v30 = vld [vmem:[#allocation2 + $0x16f] sm:$0xff] }
 0x35d   : > { %v2066_v20 = vpack.c.bf16 %v2043_v11, %v2042_v61  ;;  %v8575_v61 = vld [vmem:[#allocation20_spill] sm:$0xff] }
 0x35e   : > { %3657 = vmatpush.bf16.msrb.mxu1 %v6110_v4  ;;  %v1760_v39 = vadd.f32 %v8575_v61, %v1526_v62 }
 0x361   : > { %v1288_v41 = vpop.f32.mrf.mxu3 }
 0x362   : > { %v7340_v24 = vadd.f32 %v1288_v41, %v7063_v21  ;;  %v1993_v21 = vadd.f32 %v6986_v26, %v1759_v10  ;;  %v7364_v26 = vpop.f32.mrf.mxu0  ;;  %v8577_v41 = vld [vmem:[#allocation40_spill] sm:$0xff] }
 0x363   : > { %v7344_v45 = vpop.f32.mrf.mxu1  ;;  %v1994_v10 = vadd.f32 %v8577_v41, %v1760_v39  ;;  %v7375_v39 = vpop.f32.mrf.mxu2  ;;  %v8580_v41 = vld [vmem:[#allocation43_spill] sm:$0xff] }
 0x364   : > { %8574 = vst [vmem:[#allocation107_spill] sm:$0xff] %v7340_v24 }
 0x366   : > { %2187 = vmatmul.bf16.gmra.mxu3 %v2066_v20  ;;  %v6109_v20 = vld [vmem:[#allocation4 + $0xc0] sm:$0xff] }
 0x367   : > { %3658 = vmatpush.bf16.msrb.mxu1 %v6109_v20  ;;  %v6091_v20 = vld [vmem:[#allocation4 + $0x30] sm:$0xff] }
 0x368   : > { %3216 = vmatpush.bf16.msrb.mxu3 %v6091_v20  ;;  %v8583_v20 = vld [vmem:[#allocation47_spill] sm:$0xff] }
 0x369   : > { %v2148_v5 = vpop.f32.mrf.mxu3 }
 0x36a   : > { %v2228_v31 = vadd.f32 %v2148_v5, %v1993_v21  ;;  %v2044_v5 = vld [vmem:[#allocation2 + $0x167] sm:$0xff] }
 0x36b   : > { %v7362_v14 = vpop.f32.mrf.mxu1 }
 0x36c   : > { %v2462_v12 = vadd.f32 %v7134_v15, %v2228_v31  ;;  %v1527_v15 = vadd.f32 %v8576_v38, %v7097_v29  ;;  %v2067_v31 = vpack.c.bf16 %v2045_v30, %v2044_v5  ;;  %v8579_v29 = vld [vmem:[#allocation8_spill] sm:$0xff]  ;;  %v7381_v30 = vpop.f32.mrf.mxu0 }
 0x36e   : > { %v2696_v34 = vadd.f32 %v7209_v50, %v2462_v12  ;;  %v8578_v12 = vld [vmem:[#allocation22_spill] sm:$0xff] }
 0x36f   : > { %v1761_v61 = vadd.f32 %v8578_v12, %v1527_v15 }
 0x370   : > { %v2732_v11 = vadd.f32 %v7356_v43, %v2696_v34  ;;  %v1528_v34 = vadd.f32 %v8579_v29, %v7109_v42  ;;  %v6123_v42 = vld [vmem:[#allocation4 + $0x130] sm:$0xff] }
 0x371   : > { %v2150_v4 = vpop.f32.mrf.mxu3  ;;  %3886 = vmatpush.bf16.msrb.mxu2 %v6123_v42 }
 0x372   : > { %v2764_v62 = vmax.f32 %v2732_v11, 0.0  ;;  %v2229_v21 = vadd.f32 %v2150_v4, %v1994_v10  ;;  %v1995_v10 = vadd.f32 %v8580_v41, %v1761_v61 }
 0x373   : > { %v7378_v11 = vpop.f32.mrf.mxu1 }
 0x374   : > { %2869 = vst [vmem:[#allocation3 + $0x28] sm:$0xff] %v2764_v62  ;;  %v2463_v50 = vadd.f32 %v7144_v2, %v2229_v21  ;;  %v8581_v21 = vld [vmem:[#allocation24_spill] sm:$0xff] }
 0x375   : > { %v1762_v5 = vadd.f32 %v8581_v21, %v1528_v34  ;;  %v2046_v34 = vld [vmem:[#allocation2 + $0x187] sm:$0xff] }
 0x376   : > { %2192 = vmatmul.bf16.gmra.mxu3 %v2067_v31  ;;  %v2697_v24 = vadd.f32 %v7215_v3, %v2463_v50 }
 0x377   : > { %v1996_v29 = vadd.f32 %v8583_v20, %v1762_v5  ;;  %v8586_v20 = vld [vmem:[#allocation10_spill] sm:$0xff] }
 0x378   : > { %v2733_v38 = vadd.f32 %v7356_v43, %v2697_v24  ;;  %v8582_v24 = vld [vmem:[#allocation9_spill] sm:$0xff] }
 0x379   : > { %v2153_v2 = vpop.f32.mrf.mxu3  ;;  %v1529_v12 = vadd.f32 %v8582_v24, %v7121_v6 }
 0x37a   : > { %v2765_v15 = vmax.f32 %v2733_v38, 0.0  ;;  %v2230_v4 = vadd.f32 %v2153_v2, %v1995_v10  ;;  %v2047_v38 = vld [vmem:[#allocation2 + $0x18f] sm:$0xff]  ;;  %v7390_v10 = vpop.f32.mrf.mxu2 }
 0x37b   : > { %v7392_v2 = vpop.f32.mrf.mxu1 }
 0x37c   : > { %2870 = vst [vmem:[#allocation3 + $0x30] sm:$0xff] %v2765_v15  ;;  %v2464_v3 = vadd.f32 %v7158_v19, %v2230_v4  ;;  %v2998_v31 = vpack.c.bf16 %v2765_v15, %v2764_v62  ;;  %v3538_v15 = vld [vmem:[#allocation3 + $0x27] sm:$0xff]  ;;  %v2068_v4 = vpack.c.bf16 %v2047_v38, %v2046_v34 }
 0x37e   : > { %v2698_v50 = vadd.f32 %v7222_v28, %v2464_v3  ;;  %3091 = vmatmul.bf16.gmra.mxu2 %v2998_v31  ;;  %v7394_v28 = vpop.f32.mrf.mxu0 }
 0x37f   : > { %8584 = vst [vmem:[#allocation20_spill] sm:$0xff] %v7394_v28 }
 0x380   : > { %v2734_v61 = vadd.f32 %v7356_v43, %v2698_v50  ;;  %v8585_v50 = vld [vmem:[#allocation26_spill] sm:$0xff] }
 0x381   : > { %v2155_v41 = vpop.f32.mrf.mxu3  ;;  %v1763_v24 = vadd.f32 %v8585_v50, %v1529_v12  ;;  %v8590_v50 = vld [vmem:[#allocation53_spill] sm:$0xff] }
 0x382   : > { %v2766_v19 = vmax.f32 %v2734_v61, 0.0  ;;  %v2231_v62 = vadd.f32 %v2155_v41, %v1996_v29  ;;  %v1530_v29 = vadd.f32 %v8586_v20, %v7128_v27  ;;  %v8587_v41 = vld [vmem:[#allocation50_spill] sm:$0xff]  ;;  %v2049_v20 = vld [vmem:[#allocation2 + $0x1af] sm:$0xff] }
 0x383   : > { %v3306_v3 = vld [vmem:[#allocation3 + $0x29] sm:$0xff]  ;;  %v3307_v21 = vld [vmem:[#allocation3 + $0x31] sm:$0xff]  ;;  %v1997_v34 = vadd.f32 %v8587_v41, %v1763_v24  ;;  %v7408_v12 = vpop.f32.mrf.mxu1 }
 0x384   : > { %v3539_v6 = vld [vmem:[#allocation3 + $0x2f] sm:$0xff]  ;;  %2871 = vst [vmem:[#allocation3 + $0x48] sm:$0xff] %v2766_v19  ;;  %v2465_v31 = vadd.f32 %v7167_v56, %v2231_v62  ;;  %v3337_v5 = vpack.c.bf16 %v3307_v21, %v3306_v3 }
 0x385   : > { %v7397_v42 = vpack.c.bf16 %v3539_v6, %v3538_v15  ;;  %v7406_v15 = vpop.f32.mrf.mxu2 }
 0x386   : > { %2197 = vmatmul.bf16.gmra.mxu3 %v2068_v4  ;;  %v2699_v61 = vadd.f32 %v7230_v1, %v2465_v31  ;;  %3430 = vmatmul.bf16.gmra.mxu0 %v3337_v5  ;;  %v8588_v4 = vld [vmem:[#allocation27_spill] sm:$0xff]  ;;  %v7412_v6 = vpop.f32.mrf.mxu0 }
 0x387   : > { %3659 = vmatmul.bf16.vlgmr.msrb.gmra.mxu1 %v7397_v42  ;;  %v1764_v3 = vadd.f32 %v8588_v4, %v1530_v29  ;;  %v8589_v31 = vld [vmem:[#allocation11_spill] sm:$0xff] }
 0x388   : > { %v2735_v38 = vadd.f32 %v7356_v43, %v2699_v61  ;;  %v1531_v5 = vadd.f32 %v8589_v31, %v7137_v35  ;;  %v2048_v61 = vld [vmem:[#allocation2 + $0x1a7] sm:$0xff]  ;;  %v8591_v35 = vld [vmem:[#allocation29_spill] sm:$0xff] }
 0x389   : > { %v2158_v28 = vpop.f32.mrf.mxu3  ;;  %v1998_v24 = vadd.f32 %v8590_v50, %v1764_v3  ;;  %v2069_v29 = vpack.c.bf16 %v2049_v20, %v2048_v61 }
 0x38a   : > { %v2767_v56 = vmax.f32 %v2735_v38, 0.0  ;;  %v2232_v62 = vadd.f32 %v2158_v28, %v1997_v34 }
 0x38b   : > { %v3540_v34 = vld [vmem:[#allocation3 + $0x47] sm:$0xff]  ;;  %v7425_v31 = vpop.f32.mrf.mxu1 }
 0x38c   : > { %2872 = vst [vmem:[#allocation3 + $0x50] sm:$0xff] %v2767_v56  ;;  %v2466_v1 = vadd.f32 %v7174_v32, %v2232_v62  ;;  %v2999_v21 = vpack.c.bf16 %v2767_v56, %v2766_v19 }
 0x38d   : > { %v7423_v3 = vpop.f32.mrf.mxu2 }
 0x38e   : > { %v2700_v27 = vadd.f32 %v7239_v13, %v2466_v1  ;;  %3096 = vmatmul.bf16.gmra.mxu2 %v2999_v21  ;;  %v1765_v21 = vadd.f32 %v8591_v35, %v1531_v5  ;;  %v7429_v50 = vpop.f32.mrf.mxu0 }
 0x390   : > { %v2736_v28 = vadd.f32 %v7356_v43, %v2700_v27  ;;  %v6090_v27 = vld [vmem:[#allocation4 + $0x28] sm:$0xff]  ;;  %v1999_v5 = vadd.f32 %v7090_v55, %v1765_v21 }
 0x391   : > { %v2160_v38 = vpop.f32.mrf.mxu3  ;;  %3217 = vmatpush.bf16.msrb.mxu3 %v6090_v27  ;;  %v2051_v27 = vld [vmem:[#allocation2 + $0x1cf] sm:$0xff] }
 0x392   : > { %v2768_v41 = vmax.f32 %v2736_v28, 0.0  ;;  %v2233_v32 = vadd.f32 %v2160_v38, %v1998_v24 }
 0x393   : > { %v3308_v19 = vld [vmem:[#allocation3 + $0x49] sm:$0xff]  ;;  %v3309_v56 = vld [vmem:[#allocation3 + $0x51] sm:$0xff]  ;;  %v7442_v55 = vpop.f32.mrf.mxu1 }
 0x394   : > { %v3541_v62 = vld [vmem:[#allocation3 + $0x4f] sm:$0xff]  ;;  %2873 = vst [vmem:[#allocation3 + $0x68] sm:$0xff] %v2768_v41  ;;  %v2467_v13 = vadd.f32 %v7190_v7, %v2233_v32  ;;  %v3338_v1 = vpack.c.bf16 %v3309_v56, %v3308_v19 }
 0x395   : > { %v7420_v4 = vpack.c.bf16 %v3541_v62, %v3540_v34  ;;  %v8592_v7 = vld [vmem:[#allocation12_spill] sm:$0xff] }
 0x396   : > { %2202 = vmatmul.bf16.gmra.mxu3 %v2069_v29  ;;  %v2701_v28 = vadd.f32 %v7249_v46, %v2467_v13  ;;  %3435 = vmatmul.bf16.gmra.mxu0 %v3338_v1  ;;  %v1532_v24 = vadd.f32 %v8592_v7, %v7142_v33  ;;  %v8593_v46 = vld [vmem:[#allocation31_spill] sm:$0xff]  ;;  %v6122_v56 = vld [vmem:[#allocation4 + $0x128] sm:$0xff]  ;;  %v8594_v33 = vld [vmem:[#allocation13_spill] sm:$0xff]  ;;  %v7440_v1 = vpop.f32.mrf.mxu2 }
 0x397   : > { %3664 = vmatmul.bf16.gmra.mxu1 %v7420_v4  ;;  %3887 = vmatpush.bf16.msrb.mxu2 %v6122_v56  ;;  %v1533_v13 = vadd.f32 %v8594_v33, %v7154_v47 }
 0x398   : > { %v2737_v61 = vadd.f32 %v7356_v43, %v2701_v28  ;;  %v1766_v29 = vadd.f32 %v8593_v46, %v1532_v24  ;;  %v7446_v28 = vpop.f32.mrf.mxu0  ;;  %v8595_v46 = vld [vmem:[#allocation33_spill] sm:$0xff] }
 0x399   : > { %v2163_v20 = vpop.f32.mrf.mxu3 }
 0x39a   : > { %v2769_v38 = vmax.f32 %v2737_v61, 0.0  ;;  %v2234_v32 = vadd.f32 %v2163_v20, %v1999_v5  ;;  %v2000_v21 = vadd.f32 %v7105_v54, %v1766_v29  ;;  %v1767_v54 = vadd.f32 %v8595_v46, %v1533_v13 }
 0x39b   : > { %v3542_v24 = vld [vmem:[#allocation3 + $0x67] sm:$0xff] }
 0x39c   : > { %2874 = vst [vmem:[#allocation3 + $0x70] sm:$0xff] %v2769_v38  ;;  %v2468_v34 = vadd.f32 %v7217_v63, %v2234_v32  ;;  %v3000_v19 = vpack.c.bf16 %v2769_v38, %v2768_v41  ;;  %v2050_v63 = vld [vmem:[#allocation2 + $0x1c7] sm:$0xff]  ;;  %v2001_v33 = vadd.f32 %v7232_v0, %v1767_v54 }
 0x39d   : > { %v2070_v61 = vpack.c.bf16 %v2051_v27, %v2050_v63  ;;  %v8598_v0 = vld [vmem:[#allocation15_spill] sm:$0xff] }
 0x39e   : > { %v2702_v62 = vadd.f32 %v7254_v57, %v2468_v34  ;;  %3101 = vmatmul.bf16.gmra.mxu2 %v3000_v19  ;;  %v8596_v19 = vld [vmem:[#allocation14_spill] sm:$0xff] }
 0x39f   : > { %v1534_v56 = vadd.f32 %v8596_v19, %v7161_v53 }
 0x3a0   : > { %v2738_v35 = vadd.f32 %v7356_v43, %v2702_v62  ;;  %v7462_v27 = vpop.f32.mrf.mxu0 }
 0x3a1   : > { %v2165_v41 = vpop.f32.mrf.mxu3 }
 0x3a2   : > { %v2770_v7 = vmax.f32 %v2738_v35, 0.0  ;;  %v2235_v57 = vadd.f32 %v2165_v41, %v2000_v21  ;;  %v7460_v21 = vpop.f32.mrf.mxu1  ;;  %v8597_v41 = vld [vmem:[#allocation35_spill] sm:$0xff] }
 0x3a3   : > { %v3310_v5 = vld [vmem:[#allocation3 + $0x69] sm:$0xff]  ;;  %v3311_v20 = vld [vmem:[#allocation3 + $0x71] sm:$0xff] }
 0x3a4   : > { %v3543_v47 = vld [vmem:[#allocation3 + $0x6f] sm:$0xff]  ;;  %2875 = vst [vmem:[#allocation3 + $0x88] sm:$0xff] %v2770_v7  ;;  %v2469_v38 = vadd.f32 %v7225_v9, %v2235_v57  ;;  %v3339_v32 = vpack.c.bf16 %v3311_v20, %v3310_v5  ;;  %v7458_v9 = vpop.f32.mrf.mxu2  ;;  %v1768_v57 = vadd.f32 %v8597_v41, %v1534_v56 }
 0x3a5   : > { %v7449_v34 = vpack.c.bf16 %v3543_v47, %v3542_v24  ;;  %v2052_v47 = vld [vmem:[#allocation2 + $0x1e7] sm:$0xff] }
 0x3a6   : > { %2207 = vmatmul.bf16.gmra.mxu3 %v2070_v61  ;;  %v2703_v29 = vadd.f32 %v7264_v52, %v2469_v38  ;;  %3440 = vmatmul.bf16.gmra.mxu0 %v3339_v32  ;;  %v1535_v61 = vadd.f32 %v8598_v0, %v7170_v8  ;;  %v2002_v20 = vadd.f32 %v7242_v25, %v1768_v57  ;;  %v2053_v38 = vld [vmem:[#allocation2 + $0x1ef] sm:$0xff] }
 0x3a7   : > { %3669 = vmatmul.bf16.gmra.mxu1 %v7449_v34  ;;  %v8599_v25 = vld [vmem:[#allocation36_spill] sm:$0xff] }
 0x3a8   : > { %v2739_v62 = vadd.f32 %v7356_v43, %v2703_v29  ;;  %v8600_v57 = vld [vmem:[#allocation16_spill] sm:$0xff] }
 0x3a9   : > { %v2168_v35 = vpop.f32.mrf.mxu3 }
 0x3aa   : > { %v2771_v63 = vmax.f32 %v2739_v62, 0.0  ;;  %v2236_v13 = vadd.f32 %v2168_v35, %v2001_v33 }
 0x3ab   : > { %v3544_v29 = vld [vmem:[#allocation3 + $0x87] sm:$0xff] }
 0x3ac   : > { %2876 = vst [vmem:[#allocation3 + $0x90] sm:$0xff] %v2771_v63  ;;  %v2470_v52 = vadd.f32 %v7234_v44, %v2236_v13  ;;  %v3001_v24 = vpack.c.bf16 %v2771_v63, %v2770_v7  ;;  %v2071_v44 = vpack.c.bf16 %v2053_v38, %v2052_v47  ;;  %v7471_v62 = vpop.f32.mrf.mxu2  ;;  %v1769_v63 = vadd.f32 %v8599_v25, %v1535_v61  ;;  %v6089_v13 = vld [vmem:[#allocation4 + $0x20] sm:$0xff]  ;;  %v8601_v47 = vld [vmem:[#allocation38_spill] sm:$0xff]  ;;  %v2055_v25 = vld [vmem:[#allocation2 + $0x20f] sm:$0xff] }
 0x3ad   : > { %3218 = vmatpush.bf16.msrb.mxu3 %v6089_v13 }
 0x3ae   : > { %v2704_v53 = vadd.f32 %v7273_v59, %v2470_v52  ;;  %3106 = vmatmul.bf16.gmra.mxu2 %v3001_v24  ;;  %v7473_v59 = vpop.f32.mrf.mxu1  ;;  %v7479_v52 = vpop.f32.mrf.mxu0  ;;  %v1536_v24 = vadd.f32 %v8600_v57, %v7177_v17 }
 0x3b0   : > { %v2740_v5 = vadd.f32 %v7356_v43, %v2704_v53  ;;  %v2003_v53 = vadd.f32 %v7256_v22, %v1769_v63  ;;  %v1770_v38 = vadd.f32 %v8601_v47, %v1536_v24  ;;  %v8602_v22 = vld [vmem:[#allocation70_spill] sm:$0xff]  ;;  %v8606_v47 = vld [vmem:[#allocation41_spill] sm:$0xff] }
 0x3b1   : > { %v2170_v32 = vpop.f32.mrf.mxu3 }
 0x3b2   : > { %v2772_v46 = vmax.f32 %v2740_v5, 0.0  ;;  %v2237_v54 = vadd.f32 %v2170_v32, %v2002_v20  ;;  %v6121_v32 = vld [vmem:[#allocation4 + $0x120] sm:$0xff] }
 0x3b3   : > { %v3312_v19 = vld [vmem:[#allocation3 + $0x89] sm:$0xff]  ;;  %v3313_v56 = vld [vmem:[#allocation3 + $0x91] sm:$0xff]  ;;  %3888 = vmatpush.bf16.msrb.mxu2 %v6121_v32 }
 0x3b4   : > { %v3545_v7 = vld [vmem:[#allocation3 + $0x8f] sm:$0xff]  ;;  %2877 = vst [vmem:[#allocation3 + $0xa8] sm:$0xff] %v2772_v46  ;;  %v2471_v8 = vadd.f32 %v7247_v36, %v2237_v54  ;;  %v3340_v33 = vpack.c.bf16 %v3313_v56, %v3312_v19  ;;  %v6088_v54 = vld [vmem:[#allocation4 + $0x18] sm:$0xff] }
 0x3b5   : > { %v7476_v35 = vpack.c.bf16 %v3545_v7, %v3544_v29  ;;  %v7489_v29 = vpop.f32.mrf.mxu2  ;;  %3219 = vmatpush.bf16.msrb.mxu3 %v6088_v54  ;;  %v8603_v56 = vld [vmem:[#allocation17_spill] sm:$0xff]  ;;  %v6086_v54 = vld [vmem:[#allocation4 + $0x8] sm:$0xff] }
 0x3b6   : > { %2212 = vmatmul.bf16.gmra.mxu3 %v2071_v44  ;;  %v2705_v41 = vadd.f32 %v7283_v23, %v2471_v8  ;;  %3445 = vmatmul.bf16.gmra.mxu0 %v3340_v33  ;;  %v7491_v44 = vpop.f32.mrf.mxu1  ;;  %v7494_v19 = vpop.f32.mrf.mxu0  ;;  %v1537_v7 = vadd.f32 %v8603_v56, %v8602_v22  ;;  %v8604_v8 = vld [vmem:[#allocation84_spill] sm:$0xff]  ;;  %v6087_v32 = vld [vmem:[#allocation4 + $0x10] sm:$0xff]  ;;  %v8608_v56 = vld [vmem:[#allocation18_spill] sm:$0xff] }
 0x3b7   : > { %3674 = vmatmul.bf16.gmra.mxu1 %v7476_v35  ;;  %v2054_v33 = vld [vmem:[#allocation2 + $0x207] sm:$0xff] }
 0x3b8   : > { %v2741_v36 = vadd.f32 %v7356_v43, %v2705_v41  ;;  %v2072_v24 = vpack.c.bf16 %v2055_v25, %v2054_v33  ;;  %v8607_v22 = vld [vmem:[#allocation72_spill] sm:$0xff]  ;;  %v8609_v33 = vld [vmem:[#allocation87_spill] sm:$0xff] }
 0x3b9   : > { %v2173_v0 = vpop.f32.mrf.mxu3  ;;  %3220 = vmatpush.bf16.msrb.mxu3 %v6087_v32  ;;  %v8613_v32 = vld [vmem:[#allocation19_spill] sm:$0xff] }
 0x3ba   : > { %v2773_v5 = vmax.f32 %v2741_v36, 0.0  ;;  %v2238_v61 = vadd.f32 %v2173_v0, %v2003_v53  ;;  %v8605_v0 = vld [vmem:[#allocation85_spill] sm:$0xff] }
 0x3bb   : > { %v3546_v57 = vld [vmem:[#allocation3 + $0xa7] sm:$0xff] }
 0x3bc   : > { %2878 = vst [vmem:[#allocation3 + $0xb0] sm:$0xff] %v2773_v5  ;;  %v2472_v20 = vadd.f32 %v7258_v60, %v2238_v61  ;;  %v3002_v23 = vpack.c.bf16 %v2773_v5, %v2772_v46  ;;  %v2004_v46 = vadd.f32 %v8604_v8, %v1770_v38 }
 0x3bd   : > { %3221 = vmatpush.bf16.msrb.mxu3 %v6086_v54 }
 0x3be   : > { %v2706_v17 = vadd.f32 %v7292_v18, %v2472_v20  ;;  %3111 = vmatmul.bf16.gmra.mxu2 %v3002_v23  ;;  %v1771_v23 = vadd.f32 %v8606_v47, %v1537_v7  ;;  %v7510_v8 = vpop.f32.mrf.mxu1  ;;  %v7514_v25 = vpop.f32.mrf.mxu0  ;;  %v2057_v47 = vld [vmem:[#allocation2 + $0x22f] sm:$0xff] }
 0x3c0   : > { %v2742_v60 = vadd.f32 %v7356_v43, %v2706_v17  ;;  %v7506_v17 = vpop.f32.mrf.mxu2  ;;  %v2005_v7 = vadd.f32 %v8609_v33, %v1771_v23  ;;  %v8612_v23 = vld [vmem:[#allocation74_spill] sm:$0xff] }
 0x3c1   : > { %v2175_v63 = vpop.f32.mrf.mxu3 }
 0x3c2   : > { %v2774_v13 = vmax.f32 %v2742_v60, 0.0  ;;  %v2239_v41 = vadd.f32 %v2175_v63, %v2004_v46  ;;  %v1538_v60 = vadd.f32 %v8608_v56, %v8607_v22  ;;  %v8614_v56 = vld [vmem:[#allocation90_spill] sm:$0xff] }
 0x3c3   : > { %v3314_v18 = vld [vmem:[#allocation3 + $0xa9] sm:$0xff]  ;;  %v3315_v36 = vld [vmem:[#allocation3 + $0xb1] sm:$0xff] }
 0x3c4   : > { %v3547_v53 = vld [vmem:[#allocation3 + $0xaf] sm:$0xff]  ;;  %2879 = vst [vmem:[#allocation3 + $0xc8] sm:$0xff] %v2774_v13  ;;  %v2473_v5 = vadd.f32 %v8605_v0, %v2239_v41  ;;  %v3341_v61 = vpack.c.bf16 %v3315_v36, %v3314_v18  ;;  %v6085_v0 = vld [vmem:[#allocation4] sm:$0xff] }
 0x3c5   : > { %v7501_v20 = vpack.c.bf16 %v3547_v53, %v3546_v57  ;;  %v8610_v57 = vld [vmem:[#allocation88_spill] sm:$0xff]  ;;  %3222 = vmatpush.bf16.msrb.mxu3 %v6085_v0 }
 0x3c6   : > { %2217 = vmatmul.bf16.gmra.mxu3 %v2072_v24  ;;  %v2707_v38 = vadd.f32 %v7298_v58, %v2473_v5  ;;  %3450 = vmatmul.bf16.gmra.mxu0 %v3341_v61  ;;  %v8611_v18 = vld [vmem:[#allocation44_spill] sm:$0xff] }
 0x3c7   : > { %3679 = vmatmul.bf16.gmra.mxu1 %v7501_v20  ;;  %v1772_v36 = vadd.f32 %v8611_v18, %v1538_v60  ;;  %v2056_v61 = vld [vmem:[#allocation2 + $0x227] sm:$0xff]  ;;  %v7525_v60 = vpop.f32.mrf.mxu1 }
 0x3c8   : > { %v2743_v46 = vadd.f32 %v7356_v43, %v2707_v38  ;;  %v1539_v38 = vadd.f32 %v8613_v32, %v8612_v23  ;;  %v2073_v33 = vpack.c.bf16 %v2057_v47, %v2056_v61  ;;  %v8617_v18 = vld [vmem:[#allocation92_spill] sm:$0xff]  ;;  %v8620_v32 = vld [vmem:[#allocation21_spill] sm:$0xff] }
 0x3c9   : > { %v2178_v63 = vpop.f32.mrf.mxu3  ;;  %v2006_v54 = vadd.f32 %v8614_v56, %v1772_v36  ;;  %v8618_v36 = vld [vmem:[#allocation46_spill] sm:$0xff]  ;;  %v8619_v23 = vld [vmem:[#allocation76_spill] sm:$0xff] }
 0x3ca   : > { %v2775_v58 = vmax.f32 %v2743_v46, 0.0  ;;  %v2240_v41 = vadd.f32 %v2178_v63, %v2005_v7  ;;  %v7523_v7 = vpop.f32.mrf.mxu2  ;;  %v1773_v61 = vadd.f32 %v8618_v36, %v1539_v38  ;;  %v8627_v36 = vld [vmem:[#allocation103_spill] sm:$0xff] }
 0x3cb   : > { %8615 = vst [vmem:[#allocation7_spill] sm:$0xff] %v7523_v7 }
 0x3cc   : > { %2880 = vst [vmem:[#allocation3 + $0xd0] sm:$0xff] %v2775_v58  ;;  %v2474_v24 = vadd.f32 %v8610_v57, %v2240_v41  ;;  %v3003_v53 = vpack.c.bf16 %v2775_v58, %v2774_v13  ;;  %v7527_v58 = vpop.f32.mrf.mxu0 }
 0x3cd   : > { %8616 = vst [vmem:[#allocation40_spill] sm:$0xff] %v7527_v58 }
 0x3ce   : > { %v2708_v5 = vadd.f32 %v7307_v48, %v2474_v24  ;;  %3116 = vmatmul.bf16.gmra.mxu2 %v3003_v53  ;;  %v3548_v48 = vld [vmem:[#allocation3 + $0xc7] sm:$0xff] }
 0x3cf   : > { %v7543_v38 = vpop.f32.mrf.mxu1 }
 0x3d0   : > { %v2744_v22 = vadd.f32 %v7356_v43, %v2708_v5  ;;  %8624 = vst [vmem:[#allocation43_spill] sm:$0xff] %v7543_v38  ;;  %v8632_v38 = vld [vmem:[#allocation51_spill] sm:$0xff] }
 0x3d1   : > { %v2180_v46 = vpop.f32.mrf.mxu3 }
 0x3d2   : > { %v2776_v13 = vmax.f32 %v2744_v22, 0.0  ;;  %v2241_v63 = vadd.f32 %v2180_v46, %v2006_v54  ;;  %v1540_v22 = vadd.f32 %v8620_v32, %v8619_v23  ;;  %v8621_v54 = vld [vmem:[#allocation94_spill] sm:$0xff]  ;;  %v2902_v23 = vld [vmem:[#allocation3 + $0xf] sm:$0xff]  ;;  %v8629_v32 = vld [vmem:[#allocation23_spill] sm:$0xff] }
 0x3d3   : > { %v3316_v41 = vld [vmem:[#allocation3 + $0xc9] sm:$0xff]  ;;  %v3317_v57 = vld [vmem:[#allocation3 + $0xd1] sm:$0xff]  ;;  %v2007_v46 = vadd.f32 %v8621_v54, %v1773_v61 }
 0x3d4   : > { %v3549_v24 = vld [vmem:[#allocation3 + $0xcf] sm:$0xff]  ;;  %2881 = vst [vmem:[#allocation3 + $0xe8] sm:$0xff] %v2776_v13  ;;  %v2475_v53 = vadd.f32 %v8617_v18, %v2241_v63  ;;  %v3342_v0 = vpack.c.bf16 %v3317_v57, %v3316_v41  ;;  %v7541_v57 = vpop.f32.mrf.mxu2  ;;  %v2901_v61 = vld [vmem:[#allocation3 + $0x7] sm:$0xff] }
 0x3d5   : > { %v7530_v5 = vpack.c.bf16 %v3549_v24, %v3548_v48  ;;  %v7539_v48 = vpop.f32.mrf.mxu0  ;;  %8623 = vst [vmem:[#allocation8_spill] sm:$0xff] %v7541_v57  ;;  %v8626_v24 = vld [vmem:[#allocation48_spill] sm:$0xff]  ;;  %v2933_v7 = vpack.c.bf16 %v2902_v23, %v2901_v61  ;;  %v8635_v23 = vld [vmem:[#allocation25_spill] sm:$0xff] }
 0x3d6   : > { %2222 = vmatmul.bf16.gmra.mxu3 %v2073_v33  ;;  %v2709_v47 = vadd.f32 %v7317_v40, %v2475_v53  ;;  %3455 = vmatmul.bf16.gmra.mxu0 %v3342_v0  ;;  %8622 = vst [vmem:[#allocation22_spill] sm:$0xff] %v7539_v48  ;;  %v8625_v40 = vld [vmem:[#allocation95_spill] sm:$0xff]  ;;  %v1774_v18 = vadd.f32 %v8626_v24, %v1540_v22  ;;  %v6120_v0 = vld [vmem:[#allocation4 + $0x118] sm:$0xff] }
 0x3d7   : > { %3684 = vmatmul.bf16.gmra.mxu1 %v7530_v5  ;;  %3889 = vmatpush.bf16.msrb.mxu2 %v6120_v0  ;;  %v7560_v61 = vpop.f32.mrf.mxu1 }
 0x3d8   : > { %v2745_v56 = vadd.f32 %v7356_v43, %v2709_v47 }
 0x3d9   : > { %v2183_v58 = vpop.f32.mrf.mxu3 }
 0x3da   : > { %v2777_v63 = vmax.f32 %v2745_v56, 0.0  ;;  %v2242_v41 = vadd.f32 %v2183_v58, %v2007_v46  ;;  %v8628_v58 = vld [vmem:[#allocation77_spill] sm:$0xff] }
 0x3db   : > { %v1541_v56 = vadd.f32 %v8629_v32, %v8628_v58  ;;  %v8630_v46 = vld [vmem:[#allocation97_spill] sm:$0xff]  ;;  %v3550_v22 = vld [vmem:[#allocation3 + $0xe7] sm:$0xff] }
 0x3dc   : > { %2882 = vst [vmem:[#allocation3 + $0xf0] sm:$0xff] %v2777_v63  ;;  %v2476_v33 = vadd.f32 %v8625_v40, %v2242_v41  ;;  %v3004_v53 = vpack.c.bf16 %v2777_v63, %v2776_v13  ;;  %v2008_v48 = vadd.f32 %v8630_v46, %v1774_v18  ;;  %v7558_v18 = vpop.f32.mrf.mxu2  ;;  %v8636_v46 = vld [vmem:[#allocation100_spill] sm:$0xff] }
 0x3dd   : > { %v1775_v58 = vadd.f32 %v8632_v38, %v1541_v56 }
 0x3de   : > { %v2710_v47 = vadd.f32 %v8627_v36, %v2476_v33  ;;  %3121 = vmatmul.bf16.gmra.mxu2 %v3004_v53  ;;  %v8631_v33 = vld [vmem:[#allocation98_spill] sm:$0xff] }
 0x3e0   : > { %v2746_v54 = vadd.f32 %v7356_v43, %v2710_v47  ;;  %v7556_v47 = vpop.f32.mrf.mxu0 }
 0x3e1   : > { %v2185_v57 = vpop.f32.mrf.mxu3  ;;  %8633 = vst [vmem:[#allocation24_spill] sm:$0xff] %v7556_v47 }
 0x3e2   : > { %v2778_v41 = vmax.f32 %v2746_v54, 0.0  ;;  %v2243_v40 = vadd.f32 %v2185_v57, %v2008_v48  ;;  %v8634_v57 = vld [vmem:[#allocation78_spill] sm:$0xff] }
 0x3e3   : > { %v3318_v13 = vld [vmem:[#allocation3 + $0xe9] sm:$0xff]  ;;  %v3319_v63 = vld [vmem:[#allocation3 + $0xf1] sm:$0xff]  ;;  %v1542_v32 = vadd.f32 %v8635_v23, %v8634_v57 }
 0x3e4   : > { %v3551_v24 = vld [vmem:[#allocation3 + $0xef] sm:$0xff]  ;;  %2883 = vst [vmem:[#allocation3 + $0x108] sm:$0xff] %v2778_v41  ;;  %v2477_v53 = vadd.f32 %v8631_v33, %v2243_v40  ;;  %v3343_v36 = vpack.c.bf16 %v3319_v63, %v3318_v13  ;;  %v2009_v40 = vadd.f32 %v8636_v46, %v1775_v58  ;;  %v8638_v63 = vld [vmem:[#allocation54_spill] sm:$0xff] }
 0x3e5   : > { %v7553_v0 = vpack.c.bf16 %v3551_v24, %v3550_v22  ;;  %v8637_v22 = vld [vmem:[#allocation101_spill] sm:$0xff]  ;;  %v1776_v24 = vadd.f32 %v8638_v63, %v1542_v32  ;;  %v8642_v58 = vld [vmem:[#allocation28_spill] sm:$0xff] }
 0x3e6   : > { %3223 = vmatmul.bf16.vlgmr.msrb.gmra.mxu3 %v2933_v7  ;;  %v2711_v48 = vadd.f32 %v7335_v37, %v2477_v53  ;;  %3460 = vmatmul.bf16.gmra.mxu0 %v3343_v36  ;;  %v7571_v53 = vpop.f32.mrf.mxu2  ;;  %v7573_v36 = vpop.f32.mrf.mxu1  ;;  %v8643_v46 = vld [vmem:[#allocation104_spill] sm:$0xff] }
 0x3e7   : > { %3689 = vmatmul.bf16.gmra.mxu1 %v7553_v0  ;;  %8639 = vst [vmem:[#allocation9_spill] sm:$0xff] %v7571_v53 }
 0x3e8   : > { %v2747_v54 = vadd.f32 %v7356_v43, %v2711_v48  ;;  %v7575_v57 = vpop.f32.mrf.mxu0  ;;  %v8641_v48 = vld [vmem:[#allocation79_spill] sm:$0xff] }
 0x3e9   : > { %v2188_v38 = vpop.f32.mrf.mxu3  ;;  %8640 = vst [vmem:[#allocation47_spill] sm:$0xff] %v7575_v57  ;;  %v1543_v23 = vadd.f32 %v8642_v58, %v8641_v48  ;;  %v8645_v57 = vld [vmem:[#allocation56_spill] sm:$0xff]  ;;  %v8647_v48 = vld [vmem:[#allocation30_spill] sm:$0xff] }
 0x3ea   : > { %v2779_v7 = vmax.f32 %v2747_v54, 0.0  ;;  %v2244_v56 = vadd.f32 %v2188_v38, %v2009_v40  ;;  %v2010_v40 = vadd.f32 %v8643_v46, %v1776_v24  ;;  %v8646_v24 = vld [vmem:[#allocation80_spill] sm:$0xff] }
 0x3eb   : > { %v1777_v47 = vadd.f32 %v8645_v57, %v1543_v23  ;;  %v1544_v58 = vadd.f32 %v8647_v48, %v8646_v24 }
 0x3ec   : > { %2884 = vst [vmem:[#allocation3 + $0x110] sm:$0xff] %v2779_v7  ;;  %v2478_v13 = vadd.f32 %v8637_v22, %v2244_v56  ;;  %v3005_v33 = vpack.c.bf16 %v2779_v7, %v2778_v41  ;;  %v3552_v41 = vld [vmem:[#allocation3 + $0x107] sm:$0xff] }
 0x3ed   : > { %v2011_v46 = vadd.f32 %v7342_v16, %v1777_v47  ;;  %v8649_v16 = vld [vmem:[#allocation81_spill] sm:$0xff]  ;;  %v8650_v47 = vld [vmem:[#allocation32_spill] sm:$0xff] }
 0x3ee   : > { %v2712_v37 = vadd.f32 %v7344_v45, %v2478_v13  ;;  %3126 = vmatmul.bf16.gmra.mxu2 %v3005_v33  ;;  %v8644_v13 = vld [vmem:[#allocation106_spill] sm:$0xff] }
 0x3f0   : > { %v2748_v54 = vadd.f32 %v7356_v43, %v2712_v37  ;;  %v7596_v57 = vpop.f32.mrf.mxu0 }
 0x3f1   : > { %v2190_v38 = vpop.f32.mrf.mxu3 }
 0x3f2   : > { %v2780_v56 = vmax.f32 %v2748_v54, 0.0  ;;  %v2245_v32 = vadd.f32 %v2190_v38, %v2010_v40  ;;  %v7592_v40 = vpop.f32.mrf.mxu2  ;;  %v7594_v38 = vpop.f32.mrf.mxu1 }
 0x3f3   : > { %v3320_v7 = vld [vmem:[#allocation3 + $0x109] sm:$0xff]  ;;  %v3321_v45 = vld [vmem:[#allocation3 + $0x111] sm:$0xff] }
 0x3f4   : > { %v3553_v22 = vld [vmem:[#allocation3 + $0x10f] sm:$0xff]  ;;  %2885 = vst [vmem:[#allocation3 + $0x128] sm:$0xff] %v2780_v56  ;;  %v2479_v63 = vadd.f32 %v8644_v13, %v2245_v32  ;;  %v3344_v33 = vpack.c.bf16 %v3321_v45, %v3320_v7 }
 0x3f5   : > { %v7582_v53 = vpack.c.bf16 %v3553_v22, %v3552_v41  ;;  %v8648_v41 = vld [vmem:[#allocation58_spill] sm:$0xff]  ;;  %v6119_v22 = vld [vmem:[#allocation4 + $0x110] sm:$0xff] }
 0x3f6   : > { %3228 = vmatmul.bf16.gmra.mxu3 %v7397_v42  ;;  %v2713_v37 = vadd.f32 %v7362_v14, %v2479_v63  ;;  %3465 = vmatmul.bf16.gmra.mxu0 %v3344_v33  ;;  %v1778_v7 = vadd.f32 %v8648_v41, %v1544_v58  ;;  %v1545_v63 = vadd.f32 %v8650_v47, %v8649_v16 }
 0x3f7   : > { %3694 = vmatmul.bf16.gmra.mxu1 %v7582_v53  ;;  %3890 = vmatpush.bf16.msrb.mxu2 %v6119_v22  ;;  %v8652_v22 = vld [vmem:[#allocation82_spill] sm:$0xff] }
 0x3f8   : > { %v2749_v54 = vadd.f32 %v7356_v43, %v2713_v37  ;;  %v2012_v37 = vadd.f32 %v7359_v49, %v1778_v7  ;;  %v8651_v49 = vld [vmem:[#allocation59_spill] sm:$0xff] }
 0x3f9   : > { %v2193_v32 = vpop.f32.mrf.mxu3  ;;  %v1779_v7 = vadd.f32 %v8651_v49, %v1545_v63 }
 0x3fa   : > { %v2781_v42 = vmax.f32 %v2749_v54, 0.0  ;;  %v2246_v23 = vadd.f32 %v2193_v32, %v2011_v46 }
 0x3fb   : > { %v3554_v46 = vld [vmem:[#allocation3 + $0x127] sm:$0xff] }
 0x3fc   : > { %2886 = vst [vmem:[#allocation3 + $0x130] sm:$0xff] %v2781_v42  ;;  %v2480_v14 = vadd.f32 %v7347_v51, %v2246_v23  ;;  %v3006_v45 = vpack.c.bf16 %v2781_v42, %v2780_v56 }
 0x3fe   : > { %v2714_v13 = vadd.f32 %v7378_v11, %v2480_v14  ;;  %3131 = vmatmul.bf16.gmra.mxu2 %v3006_v45 }
 0x400   : > { %v2750_v33 = vadd.f32 %v7356_v43, %v2714_v13  ;;  %v8653_v13 = vld [vmem:[#allocation34_spill] sm:$0xff] }
 0x401   : > { %v2195_v24 = vpop.f32.mrf.mxu3  ;;  %v7605_v48 = vpop.f32.mrf.mxu2  ;;  %v1546_v16 = vadd.f32 %v8653_v13, %v8652_v22 }
 0x402   : > { %v2782_v54 = vmax.f32 %v2750_v33, 0.0  ;;  %v2247_v51 = vadd.f32 %v2195_v24, %v2012_v37  ;;  %v2013_v33 = vadd.f32 %v7375_v39, %v1779_v7  ;;  %v8656_v39 = vld [vmem:[#allocation37_spill] sm:$0xff] }
 0x403   : > { %v7607_v58 = vpop.f32.mrf.mxu0  ;;  %v3322_v11 = vld [vmem:[#allocation3 + $0x129] sm:$0xff]  ;;  %v3323_v32 = vld [vmem:[#allocation3 + $0x131] sm:$0xff] }
 0x404   : > { %v7609_v56 = vpop.f32.mrf.mxu1  ;;  %v3555_v42 = vld [vmem:[#allocation3 + $0x12f] sm:$0xff]  ;;  %2887 = vst [vmem:[#allocation3 + $0x148] sm:$0xff] %v2782_v54  ;;  %v2481_v23 = vadd.f32 %v7364_v26, %v2247_v51  ;;  %v3345_v14 = vpack.c.bf16 %v3323_v32, %v3322_v11 }
 0x405   : > { %v7612_v41 = vpack.c.bf16 %v3555_v42, %v3554_v46  ;;  %v8654_v46 = vld [vmem:[#allocation61_spill] sm:$0xff] }
 0x406   : > { %3233 = vmatmul.bf16.gmra.mxu3 %v7420_v4  ;;  %v2715_v45 = vadd.f32 %v7392_v2, %v2481_v23  ;;  %3470 = vmatmul.bf16.gmra.mxu0 %v3345_v14  ;;  %v1780_v11 = vadd.f32 %v8654_v46, %v1546_v16  ;;  %v8655_v23 = vld [vmem:[#allocation83_spill] sm:$0xff] }
 0x407   : > { %3699 = vmatmul.bf16.gmra.mxu1 %v7612_v41  ;;  %v1547_v14 = vadd.f32 %v8656_v39, %v8655_v23  ;;  %v8660_v23 = vld [vmem:[#allocation39_spill] sm:$0xff] }
 0x408   : > { %v2751_v47 = vadd.f32 %v7356_v43, %v2715_v45  ;;  %v2014_v7 = vadd.f32 %v7390_v10, %v1780_v11  ;;  %v8658_v10 = vld [vmem:[#allocation63_spill] sm:$0xff] }
 0x409   : > { %v2198_v26 = vpop.f32.mrf.mxu3  ;;  %v7622_v37 = vpop.f32.mrf.mxu2  ;;  %v1781_v11 = vadd.f32 %v8658_v10, %v1547_v14  ;;  %v8663_v10 = vld [vmem:[#allocation42_spill] sm:$0xff] }
 0x40a   : > { %v2783_v24 = vmax.f32 %v2751_v47, 0.0  ;;  %v2248_v51 = vadd.f32 %v2198_v26, %v2013_v33 }
 0x40b   : > { %v7624_v63 = vpop.f32.mrf.mxu0  ;;  %v3556_v33 = vld [vmem:[#allocation3 + $0x147] sm:$0xff] }
 0x40c   : > { %v7626_v4 = vpop.f32.mrf.mxu1  ;;  %2888 = vst [vmem:[#allocation3 + $0x150] sm:$0xff] %v2783_v24  ;;  %v2482_v2 = vadd.f32 %v7381_v30, %v2248_v51  ;;  %v3007_v32 = vpack.c.bf16 %v2783_v24, %v2782_v54  ;;  %v8657_v24 = vld [vmem:[#allocation20_spill] sm:$0xff] }
 0x40e   : > { %v2716_v42 = vadd.f32 %v7408_v12, %v2482_v2  ;;  %3136 = vmatmul.bf16.gmra.mxu2 %v3007_v32 }
 0x410   : > { %v2752_v49 = vadd.f32 %v7356_v43, %v2716_v42  ;;  %v8659_v42 = vld [vmem:[#allocation86_spill] sm:$0xff] }
 0x411   : > { %v2200_v45 = vpop.f32.mrf.mxu3  ;;  %v7635_v22 = vpop.f32.mrf.mxu2  ;;  %v1548_v39 = vadd.f32 %v8660_v23, %v8659_v42 }
 0x412   : > { %v2784_v13 = vmax.f32 %v2752_v49, 0.0  ;;  %v2249_v47 = vadd.f32 %v2200_v45, %v2014_v7  ;;  %v2015_v7 = vadd.f32 %v7406_v15, %v1781_v11  ;;  %v8662_v15 = vld [vmem:[#allocation89_spill] sm:$0xff] }
 0x413   : > { %v7637_v30 = vpop.f32.mrf.mxu0  ;;  %v3324_v54 = vld [vmem:[#allocation3 + $0x149] sm:$0xff]  ;;  %v3325_v12 = vld [vmem:[#allocation3 + $0x151] sm:$0xff]  ;;  %v1549_v11 = vadd.f32 %v8663_v10, %v8662_v15 }
 0x414   : > { %v7639_v16 = vpop.f32.mrf.mxu1  ;;  %v3557_v26 = vld [vmem:[#allocation3 + $0x14f] sm:$0xff]  ;;  %2889 = vst [vmem:[#allocation3 + $0x168] sm:$0xff] %v2784_v13  ;;  %v2483_v51 = vadd.f32 %v8657_v24, %v2249_v47  ;;  %v3346_v2 = vpack.c.bf16 %v3325_v12, %v3324_v54 }
 0x415   : > { %v7642_v46 = vpack.c.bf16 %v3557_v26, %v3556_v33  ;;  %v8661_v12 = vld [vmem:[#allocation64_spill] sm:$0xff]  ;;  %v8666_v15 = vld [vmem:[#allocation45_spill] sm:$0xff] }
 0x416   : > { %3238 = vmatmul.bf16.gmra.mxu3 %v7449_v34  ;;  %v2717_v32 = vadd.f32 %v7425_v31, %v2483_v51  ;;  %3475 = vmatmul.bf16.gmra.mxu0 %v3346_v2  ;;  %v1782_v26 = vadd.f32 %v8661_v12, %v1548_v39  ;;  %v6118_v51 = vld [vmem:[#allocation4 + $0x108] sm:$0xff] }
 0x417   : > { %3704 = vmatmul.bf16.gmra.mxu1 %v7642_v46  ;;  %3891 = vmatpush.bf16.msrb.mxu2 %v6118_v51 }
 0x418   : > { %v2753_v49 = vadd.f32 %v7356_v43, %v2717_v32  ;;  %v2016_v42 = vadd.f32 %v7423_v3, %v1782_v26  ;;  %v8664_v3 = vld [vmem:[#allocation65_spill] sm:$0xff] }
 0x419   : > { %v2203_v45 = vpop.f32.mrf.mxu3  ;;  %v7652_v47 = vpop.f32.mrf.mxu2  ;;  %v1783_v26 = vadd.f32 %v8664_v3, %v1549_v11 }
 0x41a   : > { %v2785_v33 = vmax.f32 %v2753_v49, 0.0  ;;  %v2250_v54 = vadd.f32 %v2203_v45, %v2015_v7 }
 0x41b   : > { %v7654_v14 = vpop.f32.mrf.mxu0  ;;  %v3558_v45 = vld [vmem:[#allocation3 + $0x167] sm:$0xff] }
 0x41c   : > { %v7656_v34 = vpop.f32.mrf.mxu1  ;;  %2890 = vst [vmem:[#allocation3 + $0x170] sm:$0xff] %v2785_v33  ;;  %v2484_v31 = vadd.f32 %v7412_v6, %v2250_v54  ;;  %v3008_v24 = vpack.c.bf16 %v2785_v33, %v2784_v13 }
 0x41e   : > { %v2718_v2 = vadd.f32 %v7442_v55, %v2484_v31  ;;  %3141 = vmatmul.bf16.gmra.mxu2 %v3008_v24 }
 0x420   : > { %v2754_v32 = vadd.f32 %v7356_v43, %v2718_v2  ;;  %v8665_v2 = vld [vmem:[#allocation91_spill] sm:$0xff] }
 0x421   : > { %v2205_v23 = vpop.f32.mrf.mxu3  ;;  %v7665_v49 = vpop.f32.mrf.mxu2  ;;  %v1550_v10 = vadd.f32 %v8666_v15, %v8665_v2 }
 0x422   : > { %v2786_v7 = vmax.f32 %v2754_v32, 0.0  ;;  %v2251_v6 = vadd.f32 %v2205_v23, %v2016_v42  ;;  %v2017_v42 = vadd.f32 %v7440_v1, %v1783_v26  ;;  %v8669_v1 = vld [vmem:[#allocation49_spill] sm:$0xff] }
 0x423   : > { %v7667_v39 = vpop.f32.mrf.mxu0  ;;  %v3326_v55 = vld [vmem:[#allocation3 + $0x169] sm:$0xff]  ;;  %v3327_v33 = vld [vmem:[#allocation3 + $0x171] sm:$0xff] }
 0x424   : > { %v7669_v13 = vpop.f32.mrf.mxu1  ;;  %v3559_v54 = vld [vmem:[#allocation3 + $0x16f] sm:$0xff]  ;;  %2891 = vst [vmem:[#allocation3 + $0x188] sm:$0xff] %v2786_v7  ;;  %v2485_v31 = vadd.f32 %v7429_v50, %v2251_v6  ;;  %v3347_v12 = vpack.c.bf16 %v3327_v33, %v3326_v55  ;;  %v8667_v55 = vld [vmem:[#allocation66_spill] sm:$0xff] }
 0x425   : > { %v7672_v24 = vpack.c.bf16 %v3559_v54, %v3558_v45  ;;  %v1784_v33 = vadd.f32 %v8667_v55, %v1550_v10 }
 0x426   : > { %3243 = vmatmul.bf16.gmra.mxu3 %v7476_v35  ;;  %v2719_v51 = vadd.f32 %v7460_v21, %v2485_v31  ;;  %3480 = vmatmul.bf16.gmra.mxu0 %v3347_v12  ;;  %v8668_v12 = vld [vmem:[#allocation93_spill] sm:$0xff] }
 0x427   : > { %3709 = vmatmul.bf16.gmra.mxu1 %v7672_v24  ;;  %v1551_v3 = vadd.f32 %v8669_v1, %v8668_v12  ;;  %v8672_v12 = vld [vmem:[#allocation52_spill] sm:$0xff] }
 0x428   : > { %v2755_v32 = vadd.f32 %v7356_v43, %v2719_v51  ;;  %v2018_v51 = vadd.f32 %v7458_v9, %v1784_v33  ;;  %v8670_v9 = vld [vmem:[#allocation67_spill] sm:$0xff] }
 0x429   : > { %v2208_v50 = vpop.f32.mrf.mxu3  ;;  %v7682_v23 = vpop.f32.mrf.mxu2  ;;  %v1785_v33 = vadd.f32 %v8670_v9, %v1551_v3  ;;  %v8675_v9 = vld [vmem:[#allocation55_spill] sm:$0xff] }
 0x42a   : > { %v2787_v6 = vmax.f32 %v2755_v32, 0.0  ;;  %v2252_v45 = vadd.f32 %v2208_v50, %v2017_v42 }
 0x42b   : > { %v7684_v11 = vpop.f32.mrf.mxu0  ;;  %v3560_v50 = vld [vmem:[#allocation3 + $0x187] sm:$0xff] }
 0x42c   : > { %v7686_v35 = vpop.f32.mrf.mxu1  ;;  %2892 = vst [vmem:[#allocation3 + $0x190] sm:$0xff] %v2787_v6  ;;  %v2486_v21 = vadd.f32 %v7446_v28, %v2252_v45  ;;  %v3009_v54 = vpack.c.bf16 %v2787_v6, %v2786_v7 }
 0x42e   : > { %v2720_v31 = vadd.f32 %v7473_v59, %v2486_v21  ;;  %3146 = vmatmul.bf16.gmra.mxu2 %v3009_v54 }
 0x430   : > { %v2756_v26 = vadd.f32 %v7356_v43, %v2720_v31  ;;  %v8671_v31 = vld [vmem:[#allocation96_spill] sm:$0xff] }
 0x431   : > { %v2210_v2 = vpop.f32.mrf.mxu3  ;;  %v7695_v15 = vpop.f32.mrf.mxu2  ;;  %v1552_v1 = vadd.f32 %v8672_v12, %v8671_v31 }
 0x432   : > { %v2788_v32 = vmax.f32 %v2756_v26, 0.0  ;;  %v2253_v42 = vadd.f32 %v2210_v2, %v2018_v51 }
 0x433   : > { %v3328_v10 = vld [vmem:[#allocation3 + $0x189] sm:$0xff]  ;;  %v3329_v7 = vld [vmem:[#allocation3 + $0x191] sm:$0xff]  ;;  %v7700_v45 = vpop.f32.mrf.mxu0 }
 0x434   : > { %v7697_v28 = vpop.f32.mrf.mxu1  ;;  %v3561_v6 = vld [vmem:[#allocation3 + $0x18f] sm:$0xff]  ;;  %2893 = vst [vmem:[#allocation3 + $0x1a8] sm:$0xff] %v2788_v32  ;;  %v2487_v59 = vadd.f32 %v7462_v27, %v2253_v42  ;;  %v3348_v21 = vpack.c.bf16 %v3329_v7, %v3328_v10  ;;  %v2019_v27 = vadd.f32 %v7471_v62, %v1785_v33  ;;  %v8674_v62 = vld [vmem:[#allocation99_spill] sm:$0xff] }
 0x435   : > { %v7702_v55 = vpack.c.bf16 %v3561_v6, %v3560_v50  ;;  %v6117_v6 = vld [vmem:[#allocation4 + $0x100] sm:$0xff]  ;;  %v1553_v33 = vadd.f32 %v8675_v9, %v8674_v62  ;;  %v8677_v62 = vld [vmem:[#allocation102_spill] sm:$0xff]  ;;  %v8678_v9 = vld [vmem:[#allocation57_spill] sm:$0xff] }
 0x436   : > { %3248 = vmatmul.bf16.gmra.mxu3 %v7501_v20  ;;  %v2721_v54 = vadd.f32 %v7491_v44, %v2487_v59  ;;  %3485 = vmatmul.bf16.gmra.mxu0 %v3348_v21  ;;  %v8673_v20 = vld [vmem:[#allocation68_spill] sm:$0xff]  ;;  %v6140_v59 = vld [vmem:[#allocation4 + $0x1b8] sm:$0xff] }
 0x437   : > { %3714 = vmatmul.bf16.gmra.mxu1 %v7702_v55  ;;  %v1786_v10 = vadd.f32 %v8673_v20, %v1552_v1  ;;  %4354 = vmatpush.bf16.msra.mxu0 %v6140_v59 }
 0x438   : > { %v2757_v26 = vadd.f32 %v7356_v43, %v2721_v54  ;;  %3892 = vmatpush.bf16.msrb.mxu2 %v6117_v6  ;;  %v7726_v54 = vld [vmem:[%s8468_s4] ss:$0 sm:$0xff]  ;;  %v8676_v6 = vld [vmem:[#allocation69_spill] sm:$0xff] }
 0x439   : > { %v2213_v51 = vpop.f32.mrf.mxu3  ;;  %v7712_v2 = vpop.f32.mrf.mxu2  ;;  %v1787_v59 = vadd.f32 %v8676_v6, %v1553_v33  ;;  %v8681_v6 = vld [vmem:[#allocation43_spill] sm:$0xff] }
 0x43a   : > { %v2789_v42 = vmax.f32 %v2757_v26, 0.0  ;;  %v2254_v50 = vadd.f32 %v2213_v51, %v2019_v27 }
 0x43b   : > { %v7719_v43 = vpop.f32.mrf.mxu0  ;;  %v3562_v26 = vld [vmem:[#allocation3 + $0x1a7] sm:$0xff] }
 0x43c   : > { %v7714_v3 = vpop.f32.mrf.mxu1  ;;  %2894 = vst [vmem:[#allocation3 + $0x1b0] sm:$0xff] %v2789_v42  ;;  %v2488_v44 = vadd.f32 %v7479_v52, %v2254_v50  ;;  %v3010_v7 = vpack.c.bf16 %v2789_v42, %v2788_v32  ;;  %v2020_v32 = vadd.f32 %v7489_v29, %v1786_v10  ;;  %v6139_v29 = vld [vmem:[#allocation4 + $0x1b0] sm:$0xff] }
 0x43d   : > { %4355 = vmatpush.bf16.msra.mxu0 %v6139_v29 }
 0x43e   : > { %v2722_v21 = vadd.f32 %v7510_v8, %v2488_v44  ;;  %3151 = vmatmul.bf16.gmra.mxu2 %v3010_v7 }
 0x440   : > { %v2758_v52 = vadd.f32 %v7726_v54, %v2722_v21  ;;  %v6138_v21 = vld [vmem:[#allocation4 + $0x1a8] sm:$0xff] }
 0x441   : > { %v2215_v31 = vpop.f32.mrf.mxu3  ;;  %v7730_v12 = vpop.f32.mrf.mxu2  ;;  %4356 = vmatpush.bf16.msra.mxu0 %v6138_v21  ;;  %v8683_v21 = vld [vmem:[#allocation60_spill] sm:$0xff] }
 0x442   : > { %v2790_v8 = vmax.f32 %v2758_v52, 0.0  ;;  %v2255_v1 = vadd.f32 %v2215_v31, %v2020_v32  ;;  %v2021_v31 = vadd.f32 %v7506_v17, %v1787_v59  ;;  %v6147_v17 = vld [vmem:[#allocation4 + $0x1f0] sm:$0xff]  ;;  %v6132_v59 = vld [vmem:[#allocation4 + $0x178] sm:$0xff] }
 0x443   : > { %v3330_v27 = vld [vmem:[#allocation3 + $0x1a9] sm:$0xff]  ;;  %v3331_v51 = vld [vmem:[#allocation3 + $0x1b1] sm:$0xff]  ;;  %v7744_v32 = vpop.f32.mrf.mxu0  ;;  %4119 = vmatpush.bf16.msra.mxu3 %v6132_v59 }
 0x444   : > { %v3563_v42 = vld [vmem:[#allocation3 + $0x1af] sm:$0xff]  ;;  %2895 = vst [vmem:[#allocation3 + $0x1c8] sm:$0xff] %v2790_v8  ;;  %v2489_v50 = vadd.f32 %v7494_v19, %v2255_v1  ;;  %v7733_v44 = vpop.f32.mrf.mxu1  ;;  %v3349_v20 = vpack.c.bf16 %v3331_v51, %v3330_v27  ;;  %v1554_v19 = vadd.f32 %v8678_v9, %v8677_v62  ;;  %v8680_v27 = vld [vmem:[#allocation71_spill] sm:$0xff]  ;;  %v6136_v62 = vld [vmem:[#allocation4 + $0x198] sm:$0xff] }
 0x445   : > { %v7735_v7 = vpack.c.bf16 %v3563_v42, %v3562_v26  ;;  %v8682_v9 = vld [vmem:[#allocation105_spill] sm:$0xff] }
 0x446   : > { %3253 = vmatmul.bf16.gmra.mxu3 %v7530_v5  ;;  %v2723_v10 = vadd.f32 %v7525_v60, %v2489_v50  ;;  %3490 = vmatmul.bf16.gmra.mxu0 %v3349_v20  ;;  %v1788_v51 = vadd.f32 %v8680_v27, %v1554_v19  ;;  %v6137_v50 = vld [vmem:[#allocation4 + $0x1a0] sm:$0xff]  ;;  %v6148_v20 = vld [vmem:[#allocation4 + $0x1f8] sm:$0xff] }
 0x447   : > { %3719 = vmatmul.bf16.gmra.mxu1 %v7735_v7  ;;  %4357 = vmatpush.bf16.msra.mxu0 %v6137_v50  ;;  %v6146_v50 = vld [vmem:[#allocation4 + $0x1e8] sm:$0xff] }
 0x448   : > { %v2759_v52 = vadd.f32 %v7726_v54, %v2723_v10  ;;  %4588 = vmatpush.bf16.msra.mxu1 %v6148_v20 }
 0x449   : > { %v2218_v33 = vpop.f32.mrf.mxu3  ;;  %v7747_v1 = vpop.f32.mrf.mxu2 }
 0x44a   : > { %8679 = vst [vmem:[#allocation26_spill] sm:$0xff] %v7747_v1  ;;  %v2791_v5 = vmax.f32 %v2759_v52, 0.0  ;;  %v2256_v26 = vadd.f32 %v2218_v33, %v2021_v31  ;;  %v1555_v52 = vadd.f32 %v8683_v21, %v8682_v9  ;;  %v8684_v31 = vld [vmem:[#allocation7_spill] sm:$0xff]  ;;  %v8687_v21 = vld [vmem:[#allocation73_spill] sm:$0xff] }
 0x44b   : > { %v2022_v19 = vadd.f32 %v8684_v31, %v1788_v51  ;;  %v3564_v27 = vld [vmem:[#allocation3 + $0x1c7] sm:$0xff]  ;;  %4358 = vmatpush.bf16.msra.mxu0 %v6136_v62 }
 0x44c   : > { %2896 = vst [vmem:[#allocation3 + $0x1d0] sm:$0xff] %v2791_v5  ;;  %v2490_v60 = vadd.f32 %v7514_v25, %v2256_v26  ;;  %v3011_v42 = vpack.c.bf16 %v2791_v5, %v2790_v8  ;;  %v7752_v10 = vpop.f32.mrf.mxu1  ;;  %v7760_v26 = vpop.f32.mrf.mxu0  ;;  %4589 = vmatpush.bf16.msra.mxu1 %v6147_v17  ;;  %v1789_v31 = vadd.f32 %v8687_v21, %v1555_v52  ;;  %v6156_v17 = vld [vmem:[#allocation4 + $0x238] sm:$0xff]  ;;  %v6145_v62 = vld [vmem:[#allocation4 + $0x1e0] sm:$0xff]  ;;  %v8690_v52 = vld [vmem:[#allocation8_spill] sm:$0xff] }
 0x44d   : > { %4822 = vmatpush.bf16.msra.mxu2 %v6156_v17  ;;  %v8693_v21 = vld [vmem:[#allocation75_spill] sm:$0xff]  ;;  %v6143_v17 = vld [vmem:[#allocation4 + $0x1d0] sm:$0xff] }
 0x44e   : > { %v2724_v29 = vadd.f32 %v8681_v6, %v2490_v60  ;;  %3156 = vmatmul.bf16.gmra.mxu2 %v3011_v42  ;;  %v6135_v42 = vld [vmem:[#allocation4 + $0x190] sm:$0xff] }
 0x44f   : > { %4359 = vmatpush.bf16.msra.mxu0 %v6135_v42  ;;  %v6133_v42 = vld [vmem:[#allocation4 + $0x180] sm:$0xff] }
 0x450   : > { %v2760_v25 = vadd.f32 %v7726_v54, %v2724_v29  ;;  %v8686_v29 = vld [vmem:[#allocation40_spill] sm:$0xff]  ;;  %4590 = vmatpush.bf16.msra.mxu1 %v6146_v50  ;;  %v6144_v50 = vld [vmem:[#allocation4 + $0x1d8] sm:$0xff] }
 0x451   : > { %v2220_v8 = vpop.f32.mrf.mxu3  ;;  %v7758_v33 = vpop.f32.mrf.mxu2 }
 0x452   : > { %8685 = vst [vmem:[#allocation10_spill] sm:$0xff] %v7758_v33  ;;  %v2792_v5 = vmax.f32 %v2760_v25, 0.0  ;;  %v2257_v60 = vadd.f32 %v2220_v8, %v2022_v19  ;;  %v6134_v19 = vld [vmem:[#allocation4 + $0x188] sm:$0xff]  ;;  %v8688_v8 = vld [vmem:[#allocation107_spill] sm:$0xff]  ;;  %v8689_v33 = vld [vmem:[#allocation62_spill] sm:$0xff] }
 0x453   : > { %v3332_v20 = vld [vmem:[#allocation3 + $0x1c9] sm:$0xff]  ;;  %v3333_v6 = vld [vmem:[#allocation3 + $0x1d1] sm:$0xff]  ;;  %4360 = vmatpush.bf16.msra.mxu0 %v6134_v19 }
 0x454   : > { %v3565_v1 = vld [vmem:[#allocation3 + $0x1cf] sm:$0xff]  ;;  %2897 = vst [vmem:[#allocation3 + $0x1e8] sm:$0xff] %v2792_v5  ;;  %v2491_v9 = vadd.f32 %v8686_v29, %v2257_v60  ;;  %v3350_v51 = vpack.c.bf16 %v3333_v6, %v3332_v20  ;;  %v1556_v60 = vadd.f32 %v8689_v33, %v8688_v8  ;;  %v2023_v20 = vadd.f32 %v8690_v52, %v1789_v31  ;;  %v8692_v33 = vld [vmem:[#allocation22_spill] sm:$0xff] }
 0x455   : > { %v7763_v59 = vpack.c.bf16 %v3565_v1, %v3564_v27  ;;  %v7772_v27 = vpop.f32.mrf.mxu1  ;;  %4591 = vmatpush.bf16.msra.mxu1 %v6145_v62 }
 0x456   : > { %3258 = vmatmul.bf16.gmra.mxu3 %v7553_v0  ;;  %v2725_v25 = vadd.f32 %v7560_v61, %v2491_v9  ;;  %3495 = vmatmul.bf16.gmra.mxu0 %v3350_v51  ;;  %v7777_v9 = vpop.f32.mrf.mxu0 }
 0x457   : > { %3724 = vmatmul.bf16.gmra.mxu1 %v7763_v59  ;;  %4361 = vmatpush.bf16.msra.mxu0 %v6133_v42  ;;  %v8695_v42 = vld [vmem:[#allocation24_spill] sm:$0xff] }
 0x458   : > { %v2761_v1 = vadd.f32 %v7726_v54, %v2725_v25  ;;  %v1790_v25 = vadd.f32 %v8693_v21, %v1556_v60  ;;  %v6142_v60 = vld [vmem:[#allocation4 + $0x1c8] sm:$0xff] }
 0x459   : > { %v2223_v0 = vpop.f32.mrf.mxu3  ;;  %v7775_v61 = vpop.f32.mrf.mxu2  ;;  %4592 = vmatpush.bf16.msra.mxu1 %v6144_v50 }
 0x45a   : > { %8691 = vst [vmem:[#allocation50_spill] sm:$0xff] %v7775_v61  ;;  %v2793_v6 = vmax.f32 %v2761_v1, 0.0  ;;  %v2258_v29 = vadd.f32 %v2223_v0, %v2023_v20  ;;  %v2024_v19 = vadd.f32 %v7558_v18, %v1790_v25 }
 0x45c   : > { %2898 = vst [vmem:[#allocation3 + $0x1f0] sm:$0xff] %v2793_v6  ;;  %v2492_v51 = vadd.f32 %v8692_v33, %v2258_v29  ;;  %v3012_v8 = vpack.c.bf16 %v2793_v6, %v2792_v5  ;;  %v3566_v33 = vld [vmem:[#allocation3 + $0x1e7] sm:$0xff] }
 0x45d   : > { %v7786_v0 = vpop.f32.mrf.mxu1  ;;  %4593 = vmatpush.bf16.msra.mxu1 %v6143_v17 }
 0x45e   : > { %v2726_v31 = vadd.f32 %v7573_v36, %v2492_v51  ;;  %3161 = vmatmul.bf16.gmra.mxu2 %v3012_v8  ;;  %v7792_v18 = vpop.f32.mrf.mxu0  ;;  %v6141_v8 = vld [vmem:[#allocation4 + $0x1c0] sm:$0xff] }
 0x45f   : > { %8696 = vst [vmem:[#allocation11_spill] sm:$0xff] %v7792_v18 }
 0x460   : > { %v2762_v1 = vadd.f32 %v7726_v54, %v2726_v31 }
 0x461   : > { %v2225_v62 = vpop.f32.mrf.mxu3  ;;  %v7784_v52 = vpop.f32.mrf.mxu2  ;;  %4594 = vmatpush.bf16.msra.mxu1 %v6142_v60 }
 0x462   : > { %8694 = vst [vmem:[#allocation27_spill] sm:$0xff] %v7784_v52  ;;  %v2794_v20 = vmax.f32 %v2762_v1, 0.0  ;;  %v2259_v29 = vadd.f32 %v2225_v62, %v2024_v19  ;;  %v3773_v19 = vld [vmem:[#allocation3 + $0x30] sm:$0xff] }
 0x463   : > { %v3334_v5 = vld [vmem:[#allocation3 + $0x1e9] sm:$0xff]  ;;  %v3335_v6 = vld [vmem:[#allocation3 + $0x1f1] sm:$0xff] }
 0x464   : > { %v3567_v36 = vld [vmem:[#allocation3 + $0x1ef] sm:$0xff]  ;;  %2899 = vst [vmem:[#allocation3 + $0x208] sm:$0xff] %v2794_v20  ;;  %v2493_v50 = vadd.f32 %v8695_v42, %v2259_v29  ;;  %v3351_v51 = vpack.c.bf16 %v3335_v6, %v3334_v5  ;;  %v4241_v42 = vld [vmem:[#allocation3 + $0x47] sm:$0xff] }
 0x465   : > { %v7789_v21 = vpack.c.bf16 %v3567_v36, %v3566_v33  ;;  %v3772_v20 = vld [vmem:[#allocation3 + $0x28] sm:$0xff]  ;;  %4595 = vmatpush.bf16.msra.mxu1 %v6141_v8  ;;  %v6155_v8 = vld [vmem:[#allocation4 + $0x230] sm:$0xff] }
 0x466   : > { %3263 = vmatmul.bf16.gmra.mxu3 %v7582_v53  ;;  %v2727_v25 = vadd.f32 %v7594_v38, %v2493_v50  ;;  %3500 = vmatmul.bf16.gmra.mxu0 %v3351_v51  ;;  %v7801_v53 = vpop.f32.mrf.mxu1  ;;  %v3804_v29 = vpack.c.bf16 %v3773_v19, %v3772_v20  ;;  %v6131_v38 = vld [vmem:[#allocation4 + $0x170] sm:$0xff]  ;;  %v7803_v33 = vpop.f32.mrf.mxu0 }
 0x467   : > { %3729 = vmatmul.bf16.gmra.mxu1 %v7789_v21  ;;  %8698 = vst [vmem:[#allocation29_spill] sm:$0xff] %v7801_v53  ;;  %4120 = vmatpush.bf16.msra.mxu3 %v6131_v38 }
 0x468   : > { %v2763_v31 = vadd.f32 %v7726_v54, %v2727_v25  ;;  %8699 = vst [vmem:[#allocation12_spill] sm:$0xff] %v7803_v33  ;;  %v4242_v54 = vld [vmem:[#allocation3 + $0x4f] sm:$0xff]  ;;  %4823 = vmatpush.bf16.msra.mxu2 %v6155_v8 }
 0x469   : > { %v7797_v17 = vpop.f32.mrf.mxu3  ;;  %v7799_v1 = vpop.f32.mrf.mxu2  ;;  %v4273_v51 = vpack.c.bf16 %v4242_v54, %v4241_v42  ;;  %v4243_v42 = vld [vmem:[#allocation3 + $0x67] sm:$0xff] }
 0x46a   : > { %8697 = vst [vmem:[#allocation53_spill] sm:$0xff] %v7799_v1  ;;  %v2795_v62 = vmax.f32 %v2763_v31, 0.0  ;;  %v6130_v1 = vld [vmem:[#allocation4 + $0x168] sm:$0xff] }
 0x46b   : > { %v3568_v6 = vld [vmem:[#allocation3 + $0x207] sm:$0xff]  ;;  %4121 = vmatpush.bf16.msra.mxu3 %v6130_v1 }
 0x46c   : > { %2900 = vst [vmem:[#allocation3 + $0x210] sm:$0xff] %v2795_v62  ;;  %v3775_v62 = vld [vmem:[#allocation3 + $0x50] sm:$0xff] }
 0x46e   : > { %3893 = vmatmul.bf16.vlgmr.msrb.gmra.mxu2 %v3804_v29  ;;  %v7812_v25 = vpop.f32.mrf.mxu1  ;;  %v7819_v20 = vpop.f32.mrf.mxu0  ;;  %v3774_v29 = vld [vmem:[#allocation3 + $0x48] sm:$0xff] }
 0x46f   : > { %8702 = vst [vmem:[#allocation33_spill] sm:$0xff] %v7812_v25  ;;  %v3805_v38 = vpack.c.bf16 %v3775_v62, %v3774_v29  ;;  %v3777_v62 = vld [vmem:[#allocation3 + $0x70] sm:$0xff] }
 0x470   : > { %8704 = vst [vmem:[#allocation35_spill] sm:$0xff] %v7819_v20  ;;  %v3776_v20 = vld [vmem:[#allocation3 + $0x68] sm:$0xff] }
 0x471   : > { %v7805_v60 = vpop.f32.mrf.mxu3  ;;  %v7807_v5 = vpop.f32.mrf.mxu2 }
 0x472   : > { %8700 = vst [vmem:[#allocation31_spill] sm:$0xff] %v7807_v5 }
 0x473   : > { %v3569_v36 = vld [vmem:[#allocation3 + $0x20f] sm:$0xff] }
 0x474   : > { %v7809_v50 = vpack.c.bf16 %v3569_v36, %v3568_v6  ;;  %v4244_v6 = vld [vmem:[#allocation3 + $0x6f] sm:$0xff] }
 0x475   : > { %v4274_v8 = vpack.c.bf16 %v4244_v6, %v4243_v42  ;;  %v4246_v6 = vld [vmem:[#allocation3 + $0x8f] sm:$0xff] }
 0x476   : > { %8701 = vst [vmem:[#allocation13_spill] sm:$0xff] %v7809_v50  ;;  %3268 = vmatmul.bf16.gmra.mxu3 %v7612_v41  ;;  %4362 = vmatmul.bf16.vlgmr.msra.gmra.mxu0 %v4273_v51  ;;  %v7821_v54 = vpop.f32.mrf.mxu1  ;;  %v7827_v51 = vpop.f32.mrf.mxu0 }
 0x477   : > { %3734 = vmatmul.bf16.gmra.mxu1 %v7809_v50  ;;  %8705 = vst [vmem:[#allocation15_spill] sm:$0xff] %v7821_v54  ;;  %v3806_v54 = vpack.c.bf16 %v3777_v62, %v3776_v20 }
 0x478   : > { %8707 = vst [vmem:[#allocation16_spill] sm:$0xff] %v7827_v51  ;;  %v3778_v51 = vld [vmem:[#allocation3 + $0x88] sm:$0xff] }
 0x479   : > { %v7815_v31 = vpop.f32.mrf.mxu3  ;;  %v7817_v19 = vpop.f32.mrf.mxu2 }
 0x47a   : > { %8703 = vst [vmem:[#allocation14_spill] sm:$0xff] %v7817_v19 }
 0x47e   : > { %3898 = vmatmul.bf16.gmra.mxu2 %v3805_v38  ;;  %v7834_v29 = vpop.f32.mrf.mxu1  ;;  %v7836_v33 = vpop.f32.mrf.mxu0 }
 0x47f   : > { %8709 = vst [vmem:[#allocation70_spill] sm:$0xff] %v7834_v29 }
 0x480   : > { %8710 = vst [vmem:[#allocation17_spill] sm:$0xff] %v7836_v33  ;;  %v3779_v33 = vld [vmem:[#allocation3 + $0x90] sm:$0xff] }
 0x481   : > { %v7823_v41 = vpop.f32.mrf.mxu3  ;;  %v7825_v36 = vpop.f32.mrf.mxu2  ;;  %v3807_v29 = vpack.c.bf16 %v3779_v33, %v3778_v51  ;;  %v3781_v51 = vld [vmem:[#allocation3 + $0xb0] sm:$0xff] }
 0x482   : > { %8706 = vst [vmem:[#allocation36_spill] sm:$0xff] %v7825_v36 }
 0x486   : > { %3273 = vmatmul.bf16.gmra.mxu3 %v7642_v46  ;;  %4367 = vmatmul.bf16.gmra.mxu0 %v4274_v8  ;;  %v7842_v42 = vpop.f32.mrf.mxu1  ;;  %v7845_v20 = vpop.f32.mrf.mxu0 }
 0x487   : > { %4596 = vmatmul.bf16.vlgmr.msra.gmra.mxu1 %v3805_v38  ;;  %v4245_v38 = vld [vmem:[#allocation3 + $0x87] sm:$0xff]  ;;  %8712 = vst [vmem:[#allocation85_spill] sm:$0xff] %v7842_v42 }
 0x488   : > { %v4275_v8 = vpack.c.bf16 %v4246_v6, %v4245_v38  ;;  %8713 = vst [vmem:[#allocation41_spill] sm:$0xff] %v7845_v20  ;;  %v4248_v6 = vld [vmem:[#allocation3 + $0xaf] sm:$0xff]  ;;  %v4247_v38 = vld [vmem:[#allocation3 + $0xa7] sm:$0xff] }
 0x489   : > { %v7830_v19 = vpop.f32.mrf.mxu3  ;;  %v7832_v5 = vpop.f32.mrf.mxu2  ;;  %v3780_v20 = vld [vmem:[#allocation3 + $0xa8] sm:$0xff] }
 0x48a   : > { %8708 = vst [vmem:[#allocation38_spill] sm:$0xff] %v7832_v5  ;;  %v6154_v5 = vld [vmem:[#allocation4 + $0x228] sm:$0xff]  ;;  %v3808_v25 = vpack.c.bf16 %v3781_v51, %v3780_v20  ;;  %v6128_v20 = vld [vmem:[#allocation4 + $0x158] sm:$0xff] }
 0x48b   : > { %4824 = vmatpush.bf16.msra.mxu2 %v6154_v5 }
 0x48e   : > { %3903 = vmatmul.bf16.gmra.mxu2 %v3806_v54 }
 0x491   : > { %v7838_v36 = vpop.f32.mrf.mxu3  ;;  %v7840_v46 = vpop.f32.mrf.mxu2 }
 0x492   : > { %8711 = vst [vmem:[#allocation84_spill] sm:$0xff] %v7840_v46  ;;  %v7851_v46 = vpop.f32.mrf.mxu1 }
 0x493   : > { %8715 = vst [vmem:[#allocation18_spill] sm:$0xff] %v7851_v46 }
 0x496   : > { %3278 = vmatmul.bf16.gmra.mxu3 %v7672_v24  ;;  %4372 = vmatmul.bf16.gmra.mxu0 %v4275_v8  ;;  %v4276_v8 = vpack.c.bf16 %v4248_v6, %v4247_v38  ;;  %v4250_v6 = vld [vmem:[#allocation3 + $0xcf] sm:$0xff]  ;;  %v4249_v38 = vld [vmem:[#allocation3 + $0xc7] sm:$0xff] }
 0x497   : > { %4601 = vmatmul.bf16.gmra.mxu1 %v3806_v54  ;;  %v7857_v54 = vpop.f32.mrf.mxu0 }
 0x498   : > { %8717 = vst [vmem:[#allocation88_spill] sm:$0xff] %v7857_v54 }
 0x499   : > { %v7847_v62 = vpop.f32.mrf.mxu3  ;;  %v7849_v1 = vpop.f32.mrf.mxu2 }
 0x49a   : > { %8714 = vst [vmem:[#allocation72_spill] sm:$0xff] %v7849_v1  ;;  %v7860_v5 = vpop.f32.mrf.mxu1 }
 0x49b   : > { %8718 = vst [vmem:[#allocation44_spill] sm:$0xff] %v7860_v5  ;;  %v3783_v5 = vld [vmem:[#allocation3 + $0xd0] sm:$0xff] }
 0x49e   : > { %3908 = vmatmul.bf16.gmra.mxu2 %v3807_v29 }
 0x49f   : > { %v7866_v46 = vpop.f32.mrf.mxu0 }
 0x4a0   : > { %8720 = vst [vmem:[#allocation19_spill] sm:$0xff] %v7866_v46  ;;  %v6153_v46 = vld [vmem:[#allocation4 + $0x220] sm:$0xff] }
 0x4a1   : > { %v7853_v42 = vpop.f32.mrf.mxu3  ;;  %v7855_v24 = vpop.f32.mrf.mxu2  ;;  %4825 = vmatpush.bf16.msra.mxu2 %v6153_v46 }
 0x4a2   : > { %8716 = vst [vmem:[#allocation87_spill] sm:$0xff] %v7855_v24  ;;  %v6129_v24 = vld [vmem:[#allocation4 + $0x160] sm:$0xff] }
 0x4a3   : > { %4122 = vmatpush.bf16.msra.mxu3 %v6129_v24 }
 0x4a6   : > { %3283 = vmatmul.bf16.gmra.mxu3 %v7702_v55  ;;  %4377 = vmatmul.bf16.gmra.mxu0 %v4276_v8  ;;  %v4277_v8 = vpack.c.bf16 %v4250_v6, %v4249_v38  ;;  %v6127_v6 = vld [vmem:[#allocation4 + $0x150] sm:$0xff] }
 0x4a7   : > { %4606 = vmatmul.bf16.gmra.mxu1 %v3807_v29  ;;  %v7872_v29 = vpop.f32.mrf.mxu1  ;;  %4123 = vmatpush.bf16.msra.mxu3 %v6128_v20  ;;  %v4251_v20 = vld [vmem:[#allocation3 + $0xe7] sm:$0xff] }
 0x4a8   : > { %8722 = vst [vmem:[#allocation92_spill] sm:$0xff] %v7872_v29 }
 0x4a9   : > { %v7862_v1 = vpop.f32.mrf.mxu3  ;;  %v7864_v33 = vpop.f32.mrf.mxu2 }
 0x4aa   : > { %8719 = vst [vmem:[#allocation74_spill] sm:$0xff] %v7864_v33  ;;  %v7875_v33 = vpop.f32.mrf.mxu0 }
 0x4ab   : > { %8723 = vst [vmem:[#allocation46_spill] sm:$0xff] %v7875_v33  ;;  %4124 = vmatpush.bf16.msra.mxu3 %v6127_v6  ;;  %v3785_v6 = vld [vmem:[#allocation3 + $0xf0] sm:$0xff] }
 0x4ae   : > { %3913 = vmatmul.bf16.gmra.mxu2 %v3808_v25 }
 0x4af   : > { %v7881_v52 = vpop.f32.mrf.mxu1 }
 0x4b0   : > { %8725 = vst [vmem:[#allocation21_spill] sm:$0xff] %v7881_v52  ;;  %v3784_v52 = vld [vmem:[#allocation3 + $0xe8] sm:$0xff] }
 0x4b1   : > { %v7868_v54 = vpop.f32.mrf.mxu3  ;;  %v7870_v55 = vpop.f32.mrf.mxu2 }
 0x4b2   : > { %8721 = vst [vmem:[#allocation90_spill] sm:$0xff] %v7870_v55  ;;  %v3782_v55 = vld [vmem:[#allocation3 + $0xc8] sm:$0xff]  ;;  %v7883_v38 = vpop.f32.mrf.mxu0 }
 0x4b3   : > { %v3809_v29 = vpack.c.bf16 %v3783_v5, %v3782_v55  ;;  %8726 = vst [vmem:[#allocation94_spill] sm:$0xff] %v7883_v38 }
 0x4b6   : > { %3288 = vmatmul.bf16.gmra.mxu3 %v7735_v7  ;;  %4382 = vmatmul.bf16.gmra.mxu0 %v4277_v8  ;;  %v6126_v7 = vld [vmem:[#allocation4 + $0x148] sm:$0xff] }
 0x4b7   : > { %4611 = vmatmul.bf16.gmra.mxu1 %v3808_v25  ;;  %v4252_v8 = vld [vmem:[#allocation3 + $0xef] sm:$0xff]  ;;  %4125 = vmatpush.bf16.msra.mxu3 %v6126_v7  ;;  %v7890_v50 = vpop.f32.mrf.mxu1 }
 0x4b8   : > { %v4278_v33 = vpack.c.bf16 %v4252_v8, %v4251_v20  ;;  %8728 = vst [vmem:[#allocation48_spill] sm:$0xff] %v7890_v50  ;;  %v3786_v50 = vld [vmem:[#allocation3 + $0x108] sm:$0xff] }
 0x4b9   : > { %v7877_v24 = vpop.f32.mrf.mxu3  ;;  %v7879_v51 = vpop.f32.mrf.mxu2 }
 0x4ba   : > { %8724 = vst [vmem:[#allocation76_spill] sm:$0xff] %v7879_v51  ;;  %v6125_v51 = vld [vmem:[#allocation4 + $0x140] sm:$0xff]  ;;  %v7896_v38 = vpop.f32.mrf.mxu0 }
 0x4bb   : > { %4126 = vmatpush.bf16.msra.mxu3 %v6125_v51  ;;  %8730 = vst [vmem:[#allocation77_spill] sm:$0xff] %v7896_v38 }
 0x4be   : > { %3918 = vmatmul.bf16.gmra.mxu2 %v3809_v29 }
 0x4bf   : > { %v7898_v7 = vpop.f32.mrf.mxu1 }
 0x4c0   : > { %8731 = vst [vmem:[#allocation23_spill] sm:$0xff] %v7898_v7 }
 0x4c1   : > { %v7885_v25 = vpop.f32.mrf.mxu3  ;;  %v7887_v46 = vpop.f32.mrf.mxu2 }
 0x4c2   : > { %8727 = vst [vmem:[#allocation95_spill] sm:$0xff] %v7887_v46  ;;  %v3810_v46 = vpack.c.bf16 %v3785_v6, %v3784_v52  ;;  %v3787_v6 = vld [vmem:[#allocation3 + $0x110] sm:$0xff] }
 0x4c3   : > { %v3811_v18 = vpack.c.bf16 %v3787_v6, %v3786_v50 }
 0x4c6   : > { %3293 = vmatmul.bf16.gmra.mxu3 %v7763_v59  ;;  %4387 = vmatmul.bf16.gmra.mxu0 %v4278_v33  ;;  %v4254_v59 = vld [vmem:[#allocation3 + $0x10f] sm:$0xff]  ;;  %v4253_v33 = vld [vmem:[#allocation3 + $0x107] sm:$0xff] }
 0x4c7   : > { %4616 = vmatmul.bf16.gmra.mxu1 %v3809_v29  ;;  %v7904_v29 = vpop.f32.mrf.mxu0  ;;  %v4279_v51 = vpack.c.bf16 %v4254_v59, %v4253_v33  ;;  %v7911_v7 = vpop.f32.mrf.mxu1  ;;  %v4007_v59 = vld [vmem:[#allocation3 + $0x31] sm:$0xff] }
 0x4c8   : > { %8734 = vst [vmem:[#allocation51_spill] sm:$0xff] %v7904_v29  ;;  %v4006_v29 = vld [vmem:[#allocation3 + $0x29] sm:$0xff] }
 0x4c9   : > { %v7892_v5 = vpop.f32.mrf.mxu3  ;;  %v7894_v55 = vpop.f32.mrf.mxu2  ;;  %8737 = vst [vmem:[#allocation100_spill] sm:$0xff] %v7911_v7  ;;  %v8741_v7 = vld [vmem:[#allocation9_spill] sm:$0xff] }
 0x4ca   : > { %8729 = vst [vmem:[#allocation103_spill] sm:$0xff] %v7894_v55  ;;  %v6152_v55 = vld [vmem:[#allocation4 + $0x218] sm:$0xff]  ;;  %v3225_v50 = vadd.f32 %v7797_v17, %v8741_v7 }
 0x4cb   : > { %4826 = vmatpush.bf16.msra.mxu2 %v6152_v55  ;;  %v4038_v55 = vpack.c.bf16 %v4007_v59, %v4006_v29 }
 0x4ce   : > { %3923 = vmatmul.bf16.gmra.mxu2 %v3810_v46 }
 0x4d1   : > { %v7900_v8 = vpop.f32.mrf.mxu3  ;;  %v7902_v20 = vpop.f32.mrf.mxu2 }
 0x4d2   : > { %8732 = vst [vmem:[#allocation97_spill] sm:$0xff] %v7900_v8  ;;  %v3788_v8 = vld [vmem:[#allocation3 + $0x128] sm:$0xff] }
 0x4d3   : > { %8733 = vst [vmem:[#allocation98_spill] sm:$0xff] %v7902_v20  ;;  %v7913_v20 = vpop.f32.mrf.mxu0 }
 0x4d4   : > { %8738 = vst [vmem:[#allocation101_spill] sm:$0xff] %v7913_v20 }
 0x4d6   : > { %3298 = vmatmul.bf16.gmra.mxu3 %v7789_v21  ;;  %4392 = vmatmul.bf16.gmra.mxu0 %v4279_v51  ;;  %v4256_v21 = vld [vmem:[#allocation3 + $0x12f] sm:$0xff]  ;;  %v4255_v51 = vld [vmem:[#allocation3 + $0x127] sm:$0xff] }
 0x4d7   : > { %4621 = vmatmul.bf16.gmra.mxu1 %v3810_v46 }
 0x4d9   : > { %v7907_v38 = vpop.f32.mrf.mxu3  ;;  %v7909_v52 = vpop.f32.mrf.mxu2 }
 0x4da   : > { %8735 = vst [vmem:[#allocation78_spill] sm:$0xff] %v7907_v38  ;;  %v7919_v38 = vpop.f32.mrf.mxu1 }
 0x4db   : > { %8736 = vst [vmem:[#allocation25_spill] sm:$0xff] %v7909_v52  ;;  %v4280_v52 = vpack.c.bf16 %v4256_v21, %v4255_v51  ;;  %v7923_v6 = vpop.f32.mrf.mxu0  ;;  %v4009_v21 = vld [vmem:[#allocation3 + $0x51] sm:$0xff] }
 0x4dc   : > { %8742 = vst [vmem:[#allocation28_spill] sm:$0xff] %v7923_v6 }
 0x4de   : > { %3928 = vmatmul.bf16.gmra.mxu2 %v3811_v18 }
 0x4e1   : > { %v7915_v33 = vpop.f32.mrf.mxu3  ;;  %v7917_v46 = vpop.f32.mrf.mxu2 }
 0x4e2   : > { %8739 = vst [vmem:[#allocation54_spill] sm:$0xff] %v7915_v33  ;;  %v3789_v33 = vld [vmem:[#allocation3 + $0x130] sm:$0xff]  ;;  %v7930_v61 = vpop.f32.mrf.mxu1 }
 0x4e3   : > { %8740 = vst [vmem:[#allocation79_spill] sm:$0xff] %v7917_v46  ;;  %v8744_v46 = vld [vmem:[#allocation47_spill] sm:$0xff]  ;;  %v3812_v59 = vpack.c.bf16 %v3789_v33, %v3788_v8 }
 0x4e4   : > { %v3506_v29 = vadd.f32 %v8744_v46, %v3225_v50  ;;  %v4257_v8 = vld [vmem:[#allocation3 + $0x147] sm:$0xff] }
 0x4e6   : > { %4127 = vmatmul.bf16.vlgmr.msra.gmra.mxu3 %v4038_v55  ;;  %4397 = vmatmul.bf16.gmra.mxu0 %v4280_v52  ;;  %v4008_v52 = vld [vmem:[#allocation3 + $0x49] sm:$0xff]  ;;  %v3740_v17 = vadd.f32 %v7609_v56, %v3506_v29  ;;  %v3230_v56 = vadd.f32 %v7815_v31, %v7605_v48  ;;  %v3232_v48 = vadd.f32 %v7823_v41, %v7622_v37 }
 0x4e7   : > { %4626 = vmatmul.bf16.gmra.mxu1 %v3811_v18  ;;  %v3227_v18 = vadd.f32 %v7805_v60, %v7592_v40  ;;  %v4258_v55 = vld [vmem:[#allocation3 + $0x14f] sm:$0xff]  ;;  %v7941_v46 = vpack.c.bf16 %v4009_v21, %v4008_v52 }
 0x4e8   : > { %v4281_v50 = vpack.c.bf16 %v4258_v55, %v4257_v8  ;;  %v6151_v40 = vld [vmem:[#allocation4 + $0x210] sm:$0xff] }
 0x4e9   : > { %v7925_v20 = vpop.f32.mrf.mxu3  ;;  %v7927_v53 = vpop.f32.mrf.mxu2  ;;  %v3507_v33 = vadd.f32 %v7596_v57, %v3227_v18  ;;  %4827 = vmatpush.bf16.msra.mxu2 %v6151_v40  ;;  %v3791_v21 = vld [vmem:[#allocation3 + $0x150] sm:$0xff]  ;;  %v3790_v57 = vld [vmem:[#allocation3 + $0x148] sm:$0xff]  ;;  %v3508_v18 = vadd.f32 %v7607_v58, %v3230_v56 }
 0x4ea   : > { %8743 = vst [vmem:[#allocation104_spill] sm:$0xff] %v7927_v53  ;;  %v7937_v53 = vpop.f32.mrf.mxu0  ;;  %v7947_v60 = vpop.f32.mrf.mxu1  ;;  %v4010_v31 = vld [vmem:[#allocation3 + $0x69] sm:$0xff]  ;;  %v4011_v8 = vld [vmem:[#allocation3 + $0x71] sm:$0xff] }
 0x4eb   : > { %v3741_v29 = vadd.f32 %v7626_v4, %v3507_v33  ;;  %v3742_v4 = vadd.f32 %v7639_v16, %v3508_v18  ;;  %v7966_v58 = vpack.c.bf16 %v4011_v8, %v4010_v31  ;;  %v4259_v56 = vld [vmem:[#allocation3 + $0x167] sm:$0xff]  ;;  %v3235_v16 = vadd.f32 %v7830_v19, %v7635_v22  ;;  %v3793_v31 = vld [vmem:[#allocation3 + $0x170] sm:$0xff] }
 0x4ec   : > { %v4012_v22 = vld [vmem:[#allocation3 + $0x89] sm:$0xff] }
 0x4ee   : > { %3933 = vmatmul.bf16.gmra.mxu2 %v3812_v59 }
 0x4f1   : > { %v7935_v7 = vpop.f32.mrf.mxu3  ;;  %v3894_v51 = vpop.f32.mrf.mxu2 }
 0x4f2   : > { %v7939_v6 = vadd.f32 %v3894_v51, %v3740_v17  ;;  %v7955_v55 = vpop.f32.mrf.mxu0 }
 0x4f6   : > { %4132 = vmatmul.bf16.gmra.mxu3 %v7941_v46  ;;  %4402 = vmatmul.bf16.gmra.mxu0 %v4281_v50  ;;  %v4260_v50 = vld [vmem:[#allocation3 + $0x16f] sm:$0xff] }
 0x4f7   : > { %4631 = vmatmul.bf16.gmra.mxu1 %v3812_v59  ;;  %v3813_v59 = vpack.c.bf16 %v3791_v21, %v3790_v57  ;;  %v3509_v21 = vadd.f32 %v7624_v63, %v3232_v48  ;;  %v4282_v57 = vpack.c.bf16 %v4260_v50, %v4259_v56  ;;  %v3510_v63 = vadd.f32 %v7637_v30, %v3235_v16  ;;  %v4261_v16 = vld [vmem:[#allocation3 + $0x187] sm:$0xff] }
 0x4f9   : > { %v7950_v17 = vpop.f32.mrf.mxu3  ;;  %v3896_v52 = vpop.f32.mrf.mxu2  ;;  %v3743_v41 = vadd.f32 %v7656_v34, %v3509_v21  ;;  %v4013_v34 = vld [vmem:[#allocation3 + $0x91] sm:$0xff]  ;;  %v3744_v19 = vadd.f32 %v7669_v13, %v3510_v63  ;;  %v3240_v13 = vadd.f32 %v7847_v62, %v7665_v49 }
 0x4fa   : > { %v7952_v51 = vadd.f32 %v3896_v52, %v3741_v29  ;;  %v7962_v29 = vpop.f32.mrf.mxu1  ;;  %v7970_v37 = vpop.f32.mrf.mxu0  ;;  %v7991_v30 = vpack.c.bf16 %v4013_v34, %v4012_v22  ;;  %v3795_v34 = vld [vmem:[#allocation3 + $0x190] sm:$0xff] }
 0x4fb   : > { %v4015_v62 = vld [vmem:[#allocation3 + $0xb1] sm:$0xff] }
 0x4fe   : > { %3938 = vmatmul.bf16.gmra.mxu2 %v3813_v59 }
 0x501   : > { %v7960_v33 = vpop.f32.mrf.mxu3  ;;  %v3899_v40 = vpop.f32.mrf.mxu2 }
 0x502   : > { %v7964_v52 = vadd.f32 %v3899_v40, %v3742_v4  ;;  %v3792_v40 = vld [vmem:[#allocation3 + $0x168] sm:$0xff]  ;;  %v7980_v48 = vpop.f32.mrf.mxu1  ;;  %v7984_v56 = vpop.f32.mrf.mxu0 }
 0x503   : > { %v3814_v50 = vpack.c.bf16 %v3793_v31, %v3792_v40 }
 0x506   : > { %4137 = vmatmul.bf16.gmra.mxu3 %v7966_v58  ;;  %4407 = vmatmul.bf16.gmra.mxu0 %v4282_v57  ;;  %v4262_v57 = vld [vmem:[#allocation3 + $0x18f] sm:$0xff] }
 0x507   : > { %4636 = vmatmul.bf16.gmra.mxu1 %v3813_v59  ;;  %v3237_v59 = vadd.f32 %v7838_v36, %v7652_v47  ;;  %v4283_v40 = vpack.c.bf16 %v4262_v57, %v4261_v16  ;;  %v6150_v36 = vld [vmem:[#allocation4 + $0x208] sm:$0xff]  ;;  %v3512_v57 = vadd.f32 %v7667_v39, %v3240_v13 }
 0x508   : > { %4828 = vmatpush.bf16.msra.mxu2 %v6150_v36  ;;  %v4264_v36 = vld [vmem:[#allocation3 + $0x1af] sm:$0xff]  ;;  %v4263_v39 = vld [vmem:[#allocation3 + $0x1a7] sm:$0xff] }
 0x509   : > { %v7975_v18 = vpop.f32.mrf.mxu3  ;;  %v3901_v4 = vpop.f32.mrf.mxu2  ;;  %v3511_v31 = vadd.f32 %v7654_v14, %v3237_v59  ;;  %v3794_v59 = vld [vmem:[#allocation3 + $0x188] sm:$0xff] }
 0x50a   : > { %v7977_v8 = vadd.f32 %v3901_v4, %v3743_v41  ;;  %v7995_v47 = vpop.f32.mrf.mxu1  ;;  %v3815_v16 = vpack.c.bf16 %v3795_v34, %v3794_v59 }
 0x50b   : > { %v3745_v63 = vadd.f32 %v7686_v35, %v3511_v31  ;;  %v4014_v35 = vld [vmem:[#allocation3 + $0xa9] sm:$0xff]  ;;  %v3746_v31 = vadd.f32 %v7697_v28, %v3512_v57  ;;  %v3245_v28 = vadd.f32 %v7862_v1, %v7695_v15  ;;  %v3247_v15 = vadd.f32 %v7868_v54, %v7712_v2  ;;  %v6149_v2 = vld [vmem:[#allocation4 + $0x200] sm:$0xff] }
 0x50c   : > { %v3797_v57 = vld [vmem:[#allocation3 + $0x1b0] sm:$0xff]  ;;  %4829 = vmatpush.bf16.msra.mxu2 %v6149_v2 }
 0x50d   : > { %v4016_v1 = vld [vmem:[#allocation3 + $0xc9] sm:$0xff] }
 0x50e   : > { %3943 = vmatmul.bf16.gmra.mxu2 %v3814_v50  ;;  %v4268_v2 = vld [vmem:[#allocation3 + $0x1ef] sm:$0xff] }
 0x511   : > { %v7987_v21 = vpop.f32.mrf.mxu3  ;;  %v3904_v41 = vpop.f32.mrf.mxu2 }
 0x512   : > { %v7989_v4 = vadd.f32 %v3904_v41, %v3744_v19  ;;  %v8002_v41 = vpop.f32.mrf.mxu0  ;;  %v8009_v49 = vpop.f32.mrf.mxu1 }
 0x513   : > { %8745 = vst [vmem:[#allocation106_spill] sm:$0xff] %v8002_v41 }
 0x516   : > { %4142 = vmatmul.bf16.gmra.mxu3 %v7991_v30  ;;  %4412 = vmatmul.bf16.gmra.mxu0 %v4283_v40 }
 0x517   : > { %4641 = vmatmul.bf16.gmra.mxu1 %v3814_v50  ;;  %v3242_v50 = vadd.f32 %v7853_v42, %v7682_v23  ;;  %v4284_v23 = vpack.c.bf16 %v4264_v36, %v4263_v39 }
 0x519   : > { %v8000_v19 = vpop.f32.mrf.mxu3  ;;  %v3906_v22 = vpop.f32.mrf.mxu2  ;;  %v3513_v13 = vadd.f32 %v7684_v11, %v3242_v50  ;;  %v3796_v11 = vld [vmem:[#allocation3 + $0x1a8] sm:$0xff]  ;;  %v3514_v50 = vadd.f32 %v7700_v45, %v3245_v28  ;;  %v3515_v28 = vadd.f32 %v7719_v43, %v3247_v15  ;;  %v3799_v43 = vld [vmem:[#allocation3 + $0x1d0] sm:$0xff] }
 0x51a   : > { %v8004_v14 = vadd.f32 %v3906_v22, %v3745_v63  ;;  %v8016_v22 = vpack.c.bf16 %v4015_v62, %v4014_v35  ;;  %v8019_v34 = vpop.f32.mrf.mxu0  ;;  %v8027_v35 = vpop.f32.mrf.mxu1  ;;  %v4265_v45 = vld [vmem:[#allocation3 + $0x1c7] sm:$0xff] }
 0x51b   : > { %v3747_v42 = vadd.f32 %v7714_v3, %v3513_v13  ;;  %v4017_v3 = vld [vmem:[#allocation3 + $0xd1] sm:$0xff] }
 0x51c   : > { %v4266_v13 = vld [vmem:[#allocation3 + $0x1cf] sm:$0xff] }
 0x51e   : > { %3948 = vmatmul.bf16.gmra.mxu2 %v3815_v16 }
 0x521   : > { %v8012_v40 = vpop.f32.mrf.mxu3  ;;  %v3909_v41 = vpop.f32.mrf.mxu2 }
 0x522   : > { %v8014_v63 = vadd.f32 %v3909_v41, %v3746_v31  ;;  %v3816_v31 = vpack.c.bf16 %v3797_v57, %v3796_v11  ;;  %v8032_v36 = vpop.f32.mrf.mxu0  ;;  %v8044_v57 = vpop.f32.mrf.mxu1  ;;  %v4285_v11 = vpack.c.bf16 %v4266_v13, %v4265_v45  ;;  %v8751_v45 = vld [vmem:[#allocation26_spill] sm:$0xff] }
 0x523   : > { %8746 = vst [vmem:[#allocation56_spill] sm:$0xff] %v8032_v36 }
 0x526   : > { %4147 = vmatmul.bf16.gmra.mxu3 %v8016_v22  ;;  %4417 = vmatmul.bf16.gmra.mxu0 %v4284_v23 }
 0x527   : > { %4646 = vmatmul.bf16.gmra.mxu1 %v3815_v16  ;;  %v3748_v16 = vadd.f32 %v7733_v44, %v3514_v50  ;;  %v3250_v44 = vadd.f32 %v7877_v24, %v7730_v12  ;;  %v3749_v50 = vadd.f32 %v7752_v10, %v3515_v28  ;;  %v3252_v12 = vadd.f32 %v7885_v25, %v8751_v45  ;;  %v4018_v24 = vld [vmem:[#allocation3 + $0xe9] sm:$0xff]  ;;  %v8754_v25 = vld [vmem:[#allocation10_spill] sm:$0xff] }
 0x529   : > { %v8025_v59 = vpop.f32.mrf.mxu3  ;;  %v3911_v41 = vpop.f32.mrf.mxu2  ;;  %v3516_v13 = vadd.f32 %v7744_v32, %v3250_v44  ;;  %v4267_v44 = vld [vmem:[#allocation3 + $0x1e7] sm:$0xff] }
 0x52a   : > { %v8029_v62 = vadd.f32 %v3911_v41, %v3747_v42  ;;  %v8041_v41 = vpack.c.bf16 %v4017_v3, %v4016_v1  ;;  %v8049_v54 = vpop.f32.mrf.mxu0 }
 0x52b   : > { %8748 = vst [vmem:[#allocation30_spill] sm:$0xff] %v8049_v54  ;;  %v3750_v10 = vadd.f32 %v7772_v27, %v3516_v13  ;;  %v3255_v27 = vadd.f32 %v7892_v5, %v8754_v25  ;;  %v4021_v25 = vld [vmem:[#allocation3 + $0x111] sm:$0xff]  ;;  %v4022_v54 = vld [vmem:[#allocation3 + $0x129] sm:$0xff] }
 0x52e   : > { %3953 = vmatmul.bf16.gmra.mxu2 %v3816_v31 }
 0x531   : > { %v8037_v39 = vpop.f32.mrf.mxu3  ;;  %v3914_v23 = vpop.f32.mrf.mxu2 }
 0x532   : > { %v8039_v42 = vadd.f32 %v3914_v23, %v3748_v16  ;;  %v3798_v16 = vld [vmem:[#allocation3 + $0x1c8] sm:$0xff] }
 0x533   : > { %v3817_v23 = vpack.c.bf16 %v3799_v43, %v3798_v16  ;;  %v3517_v43 = vadd.f32 %v7760_v26, %v3252_v12  ;;  %v4286_v16 = vpack.c.bf16 %v4268_v2, %v4267_v44  ;;  %v3518_v26 = vadd.f32 %v7777_v9, %v3255_v27  ;;  %v8759_v44 = vld [vmem:[#allocation97_spill] sm:$0xff]  ;;  %v8763_v9 = vld [vmem:[#allocation11_spill] sm:$0xff] }
 0x534   : > { %8747 = vst [vmem:[#allocation80_spill] sm:$0xff] %v8039_v42 }
 0x535   : > { %v3751_v45 = vadd.f32 %v7786_v0, %v3517_v43 }
 0x536   : > { %4152 = vmatmul.bf16.gmra.mxu3 %v8041_v41  ;;  %4422 = vmatmul.bf16.gmra.mxu0 %v4285_v11  ;;  %v4019_v11 = vld [vmem:[#allocation3 + $0xf1] sm:$0xff] }
 0x537   : > { %4651 = vmatmul.bf16.gmra.mxu1 %v3816_v31  ;;  %v8057_v31 = vpop.f32.mrf.mxu1  ;;  %v8068_v32 = vpack.c.bf16 %v4019_v11, %v4018_v24  ;;  %v3801_v24 = vld [vmem:[#allocation3 + $0x1f0] sm:$0xff] }
 0x538   : > { %8750 = vst [vmem:[#allocation81_spill] sm:$0xff] %v8057_v31 }
 0x539   : > { %v8052_v1 = vpop.f32.mrf.mxu3  ;;  %v3916_v3 = vpop.f32.mrf.mxu2 }
 0x53a   : > { %v8054_v15 = vadd.f32 %v3916_v3, %v3749_v50  ;;  %v8064_v50 = vpop.f32.mrf.mxu0 }
 0x53b   : > { %8752 = vst [vmem:[#allocation32_spill] sm:$0xff] %v8064_v50 }
 0x53c   : > { %8749 = vst [vmem:[#allocation58_spill] sm:$0xff] %v8054_v15 }
 0x53e   : > { %3958 = vmatmul.bf16.gmra.mxu2 %v3817_v23 }
 0x53f   : > { %v8074_v13 = vpop.f32.mrf.mxu1 }
 0x540   : > { %8755 = vst [vmem:[#allocation82_spill] sm:$0xff] %v8074_v13 }
 0x541   : > { %v8062_v28 = vpop.f32.mrf.mxu3  ;;  %v3919_v42 = vpop.f32.mrf.mxu2 }
 0x542   : > { %v8066_v3 = vadd.f32 %v3919_v42, %v3750_v10  ;;  %v3800_v10 = vld [vmem:[#allocation3 + $0x1e8] sm:$0xff]  ;;  %v8082_v12 = vpop.f32.mrf.mxu0 }
 0x543   : > { %8757 = vst [vmem:[#allocation61_spill] sm:$0xff] %v8082_v12  ;;  %v3818_v2 = vpack.c.bf16 %v3801_v24, %v3800_v10  ;;  %v8765_v10 = vld [vmem:[#allocation13_spill] sm:$0xff] }
 0x544   : > { %8753 = vst [vmem:[#allocation59_spill] sm:$0xff] %v8066_v3  ;;  %v8760_v3 = vld [vmem:[#allocation29_spill] sm:$0xff] }
 0x545   : > { %v3752_v0 = vadd.f32 %v8760_v3, %v3518_v26  ;;  %v8767_v3 = vld [vmem:[#allocation78_spill] sm:$0xff] }
 0x546   : > { %4157 = vmatmul.bf16.gmra.mxu3 %v8068_v32  ;;  %4427 = vmatmul.bf16.gmra.mxu0 %v4286_v16  ;;  %v4020_v16 = vld [vmem:[#allocation3 + $0x109] sm:$0xff] }
 0x547   : > { %4656 = vmatmul.bf16.gmra.mxu1 %v3817_v23  ;;  %v8758_v23 = vld [vmem:[#allocation50_spill] sm:$0xff]  ;;  %v8089_v13 = vpop.f32.mrf.mxu1 }
 0x548   : > { %v3257_v5 = vadd.f32 %v8759_v44, %v8758_v23  ;;  %8761 = vst [vmem:[#allocation83_spill] sm:$0xff] %v8089_v13  ;;  %v8766_v23 = vld [vmem:[#allocation27_spill] sm:$0xff]  ;;  %v8768_v44 = vld [vmem:[#allocation33_spill] sm:$0xff] }
 0x549   : > { %v8077_v15 = vpop.f32.mrf.mxu3  ;;  %v3921_v42 = vpop.f32.mrf.mxu2  ;;  %v3260_v26 = vadd.f32 %v8767_v3, %v8766_v23  ;;  %v4023_v23 = vld [vmem:[#allocation3 + $0x131] sm:$0xff]  ;;  %v8773_v3 = vld [vmem:[#allocation15_spill] sm:$0xff] }
 0x54a   : > { %v8079_v11 = vadd.f32 %v3921_v42, %v3751_v45  ;;  %v8093_v42 = vpack.c.bf16 %v4021_v25, %v4020_v16  ;;  %v3519_v27 = vadd.f32 %v8763_v9, %v3257_v5  ;;  %v8097_v24 = vpop.f32.mrf.mxu0  ;;  %v3802_v25 = vld [vmem:[#allocation3 + $0x208] sm:$0xff] }
 0x54b   : > { %8764 = vst [vmem:[#allocation20_spill] sm:$0xff] %v8097_v24  ;;  %v8770_v5 = vld [vmem:[#allocation12_spill] sm:$0xff] }
 0x54c   : > { %8756 = vst [vmem:[#allocation34_spill] sm:$0xff] %v8079_v11  ;;  %v3753_v11 = vadd.f32 %v8768_v44, %v3519_v27  ;;  %v3520_v9 = vadd.f32 %v8770_v5, %v3260_v26 }
 0x54e   : > { %3963 = vmatmul.bf16.gmra.mxu2 %v3818_v2  ;;  %v3754_v27 = vadd.f32 %v8773_v3, %v3520_v9 }
 0x551   : > { %v8087_v43 = vpop.f32.mrf.mxu3  ;;  %v3924_v50 = vpop.f32.mrf.mxu2 }
 0x552   : > { %v8091_v45 = vadd.f32 %v3924_v50, %v3752_v0  ;;  %v3803_v0 = vld [vmem:[#allocation3 + $0x210] sm:$0xff] }
 0x553   : > { %v3819_v24 = vpack.c.bf16 %v3803_v0, %v3802_v25  ;;  %v8776_v25 = vld [vmem:[#allocation31_spill] sm:$0xff] }
 0x554   : > { %8762 = vst [vmem:[#allocation37_spill] sm:$0xff] %v8091_v45  ;;  %v8108_v45 = vpop.f32.mrf.mxu1  ;;  %v3265_v5 = vadd.f32 %v7925_v20, %v8776_v25 }
 0x556   : > { %4162 = vmatmul.bf16.gmra.mxu3 %v8093_v42  ;;  %4432 = vmatmul.bf16.gmra.mxu0 %v8765_v10  ;;  %v8771_v10 = vld [vmem:[#allocation53_spill] sm:$0xff] }
 0x557   : > { %4661 = vmatmul.bf16.gmra.mxu1 %v3818_v2  ;;  %v8772_v2 = vld [vmem:[#allocation54_spill] sm:$0xff] }
 0x558   : > { %v3262_v13 = vadd.f32 %v8772_v2, %v8771_v10  ;;  %v8777_v10 = vld [vmem:[#allocation70_spill] sm:$0xff] }
 0x559   : > { %v8103_v12 = vpop.f32.mrf.mxu3  ;;  %v3926_v50 = vpop.f32.mrf.mxu2 }
 0x55a   : > { %v8105_v16 = vadd.f32 %v3926_v50, %v3753_v11  ;;  %v8117_v11 = vpack.c.bf16 %v4023_v23, %v4022_v54  ;;  %v8775_v50 = vld [vmem:[#allocation35_spill] sm:$0xff]  ;;  %v8778_v54 = vld [vmem:[#allocation16_spill] sm:$0xff] }
 0x55b   : > { %v3521_v26 = vadd.f32 %v8775_v50, %v3262_v13  ;;  %v3522_v23 = vadd.f32 %v8778_v54, %v3265_v5  ;;  %v8779_v13 = vld [vmem:[#allocation14_spill] sm:$0xff] }
 0x55c   : > { %8769 = vst [vmem:[#allocation63_spill] sm:$0xff] %v8105_v16  ;;  %v8121_v0 = vpop.f32.mrf.mxu1  ;;  %v4025_v50 = vld [vmem:[#allocation3 + $0x151] sm:$0xff] }
 0x55d   : > { %v3755_v2 = vadd.f32 %v8777_v10, %v3521_v26 }
 0x55e   : > { %3968 = vmatmul.bf16.gmra.mxu2 %v3819_v24 }
 0x561   : > { %v8113_v44 = vpop.f32.mrf.mxu3  ;;  %v3929_v31 = vpop.f32.mrf.mxu2 }
 0x562   : > { %v8115_v36 = vadd.f32 %v3929_v31, %v3754_v27  ;;  %v3267_v27 = vadd.f32 %v7935_v7, %v8779_v13 }
 0x564   : > { %8774 = vst [vmem:[#allocation86_spill] sm:$0xff] %v8115_v36  ;;  %v8780_v36 = vld [vmem:[#allocation85_spill] sm:$0xff] }
 0x565   : > { %v3756_v20 = vadd.f32 %v8780_v36, %v3522_v23 }
 0x566   : > { %4167 = vmatmul.bf16.gmra.mxu3 %v8117_v11 }
 0x567   : > { %4666 = vmatmul.bf16.gmra.mxu1 %v3819_v24  ;;  %v4024_v24 = vld [vmem:[#allocation3 + $0x149] sm:$0xff] }
 0x569   : > { %v4128_v9 = vpop.f32.mrf.mxu3  ;;  %v3931_v3 = vpop.f32.mrf.mxu2 }
 0x56a   : > { %v8127_v16 = vadd.f32 %v4128_v9, %v7939_v6  ;;  %v8129_v31 = vadd.f32 %v3931_v3, %v3755_v2  ;;  %v8141_v2 = vpack.c.bf16 %v4025_v50, %v4024_v24  ;;  %v8781_v9 = vld [vmem:[#allocation17_spill] sm:$0xff]  ;;  %v8783_v3 = vld [vmem:[#allocation18_spill] sm:$0xff] }
 0x56b   : > { %v3523_v5 = vadd.f32 %v8781_v9, %v3267_v27  ;;  %v8785_v24 = vld [vmem:[#allocation38_spill] sm:$0xff]  ;;  %v4026_v50 = vld [vmem:[#allocation3 + $0x169] sm:$0xff] }
 0x56c   : > { %v3272_v27 = vadd.f32 %v7960_v33, %v8785_v24  ;;  %v8786_v9 = vld [vmem:[#allocation44_spill] sm:$0xff] }
 0x56d   : > { %v3757_v54 = vadd.f32 %v8783_v3, %v3523_v5 }
 0x56e   : > { %4830 = vmatmul.bf16.vlgmr.msra.gmra.mxu2 %v7941_v46  ;;  %v8782_v46 = vld [vmem:[#allocation36_spill] sm:$0xff] }
 0x56f   : > { %v3270_v7 = vadd.f32 %v7950_v17, %v8782_v46 }
 0x571   : > { %v4130_v25 = vpop.f32.mrf.mxu3  ;;  %v3934_v26 = vpop.f32.mrf.mxu2 }
 0x572   : > { %v8137_v10 = vadd.f32 %v4130_v25, %v7952_v51  ;;  %v8139_v6 = vadd.f32 %v3934_v26, %v3756_v20  ;;  %v8784_v20 = vld [vmem:[#allocation41_spill] sm:$0xff] }
 0x573   : > { %v3524_v25 = vadd.f32 %v8784_v20, %v3270_v7  ;;  %v4027_v26 = vld [vmem:[#allocation3 + $0x171] sm:$0xff] }
 0x575   : > { %v3758_v17 = vadd.f32 %v8786_v9, %v3524_v25 }
 0x576   : > { %4172 = vmatmul.bf16.gmra.mxu3 %v8141_v2 }
 0x579   : > { %v4133_v13 = vpop.f32.mrf.mxu3  ;;  %v3936_v36 = vpop.f32.mrf.mxu2 }
 0x57a   : > { %v8149_v23 = vadd.f32 %v4133_v13, %v7964_v52  ;;  %v8151_v51 = vadd.f32 %v3936_v36, %v3757_v54  ;;  %v8163_v54 = vpack.c.bf16 %v4027_v26, %v4026_v50  ;;  %v8787_v13 = vld [vmem:[#allocation88_spill] sm:$0xff] }
 0x57b   : > { %v3525_v7 = vadd.f32 %v8787_v13, %v3272_v27  ;;  %v8789_v36 = vld [vmem:[#allocation92_spill] sm:$0xff]  ;;  %v8792_v13 = vld [vmem:[#allocation21_spill] sm:$0xff] }
 0x57c   : > { %v8791_v50 = vld [vmem:[#allocation72_spill] sm:$0xff] }
 0x57d   : > { %v3759_v20 = vadd.f32 %v8789_v36, %v3525_v7  ;;  %v3277_v27 = vadd.f32 %v7987_v21, %v8791_v50  ;;  %v4028_v26 = vld [vmem:[#allocation3 + $0x189] sm:$0xff] }
 0x57e   : > { %4835 = vmatmul.bf16.gmra.mxu2 %v7966_v58  ;;  %v8788_v58 = vld [vmem:[#allocation84_spill] sm:$0xff] }
 0x57f   : > { %v3275_v33 = vadd.f32 %v7975_v18, %v8788_v58 }
 0x581   : > { %v4135_v46 = vpop.f32.mrf.mxu3  ;;  %v3939_v5 = vpop.f32.mrf.mxu2 }
 0x582   : > { %v8159_v3 = vadd.f32 %v4135_v46, %v7977_v8  ;;  %v8161_v52 = vadd.f32 %v3939_v5, %v3758_v17  ;;  %v8790_v17 = vld [vmem:[#allocation19_spill] sm:$0xff]  ;;  %v4029_v5 = vld [vmem:[#allocation3 + $0x191] sm:$0xff] }
 0x583   : > { %v3526_v46 = vadd.f32 %v8790_v17, %v3275_v33 }
 0x585   : > { %v3760_v18 = vadd.f32 %v8792_v13, %v3526_v46 }
 0x586   : > { %4177 = vmatmul.bf16.gmra.mxu3 %v8163_v54 }
 0x589   : > { %v4138_v24 = vpop.f32.mrf.mxu3  ;;  %v3941_v25 = vpop.f32.mrf.mxu2 }
 0x58a   : > { %v8171_v9 = vadd.f32 %v4138_v24, %v7989_v4  ;;  %v8173_v8 = vadd.f32 %v3941_v25, %v3759_v20  ;;  %v8185_v20 = vpack.c.bf16 %v4029_v5, %v4028_v26  ;;  %v8793_v24 = vld [vmem:[#allocation46_spill] sm:$0xff]  ;;  %v8795_v25 = vld [vmem:[#allocation48_spill] sm:$0xff] }
 0x58b   : > { %v3527_v33 = vadd.f32 %v8793_v24, %v3277_v27  ;;  %v8798_v26 = vld [vmem:[#allocation74_spill] sm:$0xff]  ;;  %v4030_v5 = vld [vmem:[#allocation3 + $0x1a9] sm:$0xff]  ;;  %v8799_v24 = vld [vmem:[#allocation23_spill] sm:$0xff] }
 0x58c   : > { %v3282_v27 = vadd.f32 %v8012_v40, %v8798_v26 }
 0x58d   : > { %v3761_v17 = vadd.f32 %v8795_v25, %v3527_v33 }
 0x58e   : > { %4840 = vmatmul.bf16.gmra.mxu2 %v7991_v30  ;;  %v8794_v30 = vld [vmem:[#allocation87_spill] sm:$0xff] }
 0x58f   : > { %v3280_v21 = vadd.f32 %v8000_v19, %v8794_v30 }
 0x591   : > { %v4140_v58 = vpop.f32.mrf.mxu3  ;;  %v3944_v7 = vpop.f32.mrf.mxu2 }
 0x592   : > { %v8181_v36 = vadd.f32 %v4140_v58, %v8004_v14  ;;  %v8183_v4 = vadd.f32 %v3944_v7, %v3760_v18  ;;  %v8797_v18 = vld [vmem:[#allocation94_spill] sm:$0xff] }
 0x593   : > { %v3528_v58 = vadd.f32 %v8797_v18, %v3280_v21  ;;  %v4031_v7 = vld [vmem:[#allocation3 + $0x1b1] sm:$0xff] }
 0x595   : > { %v3762_v19 = vadd.f32 %v8799_v24, %v3528_v58  ;;  %v8803_v24 = vld [vmem:[#allocation51_spill] sm:$0xff] }
 0x596   : > { %4182 = vmatmul.bf16.gmra.mxu3 %v8185_v20 }
 0x599   : > { %v4143_v50 = vpop.f32.mrf.mxu3  ;;  %v3946_v46 = vpop.f32.mrf.mxu2 }
 0x59a   : > { %v8193_v13 = vadd.f32 %v4143_v50, %v8014_v63  ;;  %v8195_v14 = vadd.f32 %v3946_v46, %v3761_v17  ;;  %v8207_v17 = vpack.c.bf16 %v4031_v7, %v4030_v5  ;;  %v8800_v50 = vld [vmem:[#allocation77_spill] sm:$0xff]  ;;  %v8802_v46 = vld [vmem:[#allocation100_spill] sm:$0xff] }
 0x59b   : > { %v3529_v21 = vadd.f32 %v8800_v50, %v3282_v27  ;;  %v4032_v7 = vld [vmem:[#allocation3 + $0x1c9] sm:$0xff] }
 0x59c   : > { %8796 = vst [vmem:[#allocation39_spill] sm:$0xff] %v8195_v14  ;;  %v8805_v50 = vld [vmem:[#allocation101_spill] sm:$0xff] }
 0x59d   : > { %v3763_v18 = vadd.f32 %v8802_v46, %v3529_v21  ;;  %v8228_v46 = vpop.f32.mrf.mxu0 }
 0x59e   : > { %4845 = vmatmul.bf16.gmra.mxu2 %v8016_v22  ;;  %v8801_v22 = vld [vmem:[#allocation90_spill] sm:$0xff] }
 0x59f   : > { %v3285_v40 = vadd.f32 %v8025_v59, %v8801_v22  ;;  %v8226_v22 = vpop.f32.mrf.mxu1 }
 0x5a1   : > { %v4145_v30 = vpop.f32.mrf.mxu3  ;;  %v3949_v33 = vpop.f32.mrf.mxu2  ;;  %v3530_v14 = vadd.f32 %v8803_v24, %v3285_v40  ;;  %v4271_v24 = vld [vmem:[#allocation3 + $0x227] sm:$0xff] }
 0x5a2   : > { %v8203_v25 = vadd.f32 %v4145_v30, %v8029_v62  ;;  %v8205_v63 = vadd.f32 %v3949_v33, %v3762_v19  ;;  %v8804_v62 = vld [vmem:[#allocation76_spill] sm:$0xff]  ;;  %v4033_v19 = vld [vmem:[#allocation3 + $0x1d1] sm:$0xff] }
 0x5a3   : > { %v3287_v5 = vadd.f32 %v8037_v39, %v8804_v62  ;;  %v3764_v27 = vadd.f32 %v7919_v38, %v3530_v14  ;;  %v8223_v59 = vpack.c.bf16 %v4033_v19, %v4032_v7  ;;  %v8807_v14 = vld [vmem:[#allocation28_spill] sm:$0xff]  ;;  %v6208_v7 = vld [vmem:[#allocation2] sm:$0xff] }
 0x5a4   : > { %v4272_v62 = vld [vmem:[#allocation3 + $0x22f] sm:$0xff] }
 0x5a5   : > { %v3531_v21 = vadd.f32 %v8805_v50, %v3287_v5  ;;  %v4522_v5 = vpack.c.bf16 %v6208_v7, %v6208_v7  ;;  %v4288_v19 = vpack.c.bf16 %v4272_v62, %v4271_v24  ;;  %v4034_v50 = vld [vmem:[#allocation3 + $0x1e9] sm:$0xff] }
 0x5a6   : > { %4187 = vmatmul.bf16.gmra.mxu3 %v8207_v17 }
 0x5a7   : > { %v3765_v40 = vadd.f32 %v7930_v61, %v3531_v21  ;;  %v4035_v21 = vld [vmem:[#allocation3 + $0x1f1] sm:$0xff] }
 0x5a9   : > { %v3951_v26 = vpop.f32.mrf.mxu2 }
 0x5aa   : > { %v8214_v58 = vadd.f32 %v3951_v26, %v3763_v18 }
 0x5ae   : > { %4850 = vmatmul.bf16.gmra.mxu2 %v8041_v41  ;;  %v8806_v41 = vld [vmem:[#allocation95_spill] sm:$0xff] }
 0x5af   : > { %v3290_v39 = vadd.f32 %v8052_v1, %v8806_v41  ;;  %v8808_v1 = vld [vmem:[#allocation103_spill] sm:$0xff] }
 0x5b0   : > { %v3292_v61 = vadd.f32 %v8062_v28, %v8808_v1  ;;  %v4037_v1 = vld [vmem:[#allocation3 + $0x211] sm:$0xff] }
 0x5b1   : > { %v3954_v30 = vpop.f32.mrf.mxu2  ;;  %v3532_v26 = vadd.f32 %v8807_v14, %v3290_v39 }
 0x5b2   : > { %v8221_v33 = vadd.f32 %v3954_v30, %v3764_v27  ;;  %v8237_v27 = vpop.f32.mrf.mxu1  ;;  %4671 = vmatmul.bf16.gmra.mxu1 %v4522_v5  ;;  %v8240_v30 = vpop.f32.mrf.mxu0  ;;  %4437 = vmatmul.bf16.gmra.mxu0 %v4288_v19  ;;  %v3533_v14 = vadd.f32 %v7937_v53, %v3292_v61  ;;  %v4036_v19 = vld [vmem:[#allocation3 + $0x209] sm:$0xff] }
 0x5b3   : > { %v3766_v41 = vadd.f32 %v7947_v60, %v3532_v26  ;;  %v8810_v60 = vld [vmem:[#allocation25_spill] sm:$0xff] }
 0x5b4   : > { %v3767_v62 = vadd.f32 %v7962_v29, %v3533_v14  ;;  %v3297_v26 = vadd.f32 %v8087_v43, %v8810_v60 }
 0x5b6   : > { %4192 = vmatmul.bf16.gmra.mxu3 %v8223_v59  ;;  %v3535_v29 = vadd.f32 %v7970_v37, %v3297_v26 }
 0x5b9   : > { %v3956_v18 = vpop.f32.mrf.mxu2 }
 0x5ba   : > { %v8234_v38 = vadd.f32 %v3956_v18, %v3765_v40  ;;  %v8247_v18 = vpack.c.bf16 %v4035_v21, %v4034_v50  ;;  %v8811_v21 = vld [vmem:[#allocation79_spill] sm:$0xff] }
 0x5be   : > { %4855 = vmatmul.bf16.gmra.mxu2 %v8068_v32  ;;  %v8809_v32 = vld [vmem:[#allocation98_spill] sm:$0xff] }
 0x5bf   : > { %v3295_v24 = vadd.f32 %v8077_v15, %v8809_v32  ;;  %v8263_v15 = vpack.c.bf16 %v4037_v1, %v4036_v19  ;;  %v4979_v1 = vld [vmem:[#allocation2 + $0x28] sm:$0xff] }
 0x5c1   : > { %v3959_v39 = vpop.f32.mrf.mxu2  ;;  %v3534_v5 = vadd.f32 %v7955_v55, %v3295_v24  ;;  %v3300_v55 = vadd.f32 %v8103_v12, %v8811_v21 }
 0x5c2   : > { %v8245_v40 = vadd.f32 %v3959_v39, %v3766_v41 }
 0x5c3   : > { %v3768_v53 = vadd.f32 %v7980_v48, %v3534_v5  ;;  %v3536_v39 = vadd.f32 %v7984_v56, %v3300_v55  ;;  %v8812_v48 = vld [vmem:[#allocation104_spill] sm:$0xff]  ;;  %v4443_v56 = vadd.f32 %v8019_v34, %v8127_v16  ;;  %v8301_v34 = vpop.f32.mrf.mxu3  ;;  %v8815_v16 = vld [vmem:[#allocation81_spill] sm:$0xff] }
 0x5c4   : > { %v3302_v14 = vadd.f32 %v8113_v44, %v8812_v48  ;;  %v8311_v48 = vpop.f32.mrf.mxu1 }
 0x5c5   : > { %v3770_v37 = vadd.f32 %v8009_v49, %v3536_v39  ;;  %v8290_v49 = vld [vmem:[%s8470_s6] ss:$0 sm:$0xff] }
 0x5c6   : > { %4197 = vmatmul.bf16.gmra.mxu3 %v8247_v18 }
 0x5c9   : > { %v3961_v7 = vpop.f32.mrf.mxu2 }
 0x5ca   : > { %v8254_v28 = vadd.f32 %v3961_v7, %v3767_v62  ;;  %v8813_v62 = vld [vmem:[#allocation106_spill] sm:$0xff] }
 0x5cb   : > { %v3537_v12 = vadd.f32 %v8813_v62, %v3302_v14  ;;  %v8314_v62 = vpop.f32.mrf.mxu3 }
 0x5ce   : > { %4860 = vmatmul.bf16.gmra.mxu2 %v8093_v42  ;;  %v3769_v42 = vadd.f32 %v7995_v47, %v3535_v29  ;;  %v3771_v47 = vadd.f32 %v8027_v35, %v3537_v12  ;;  %v8814_v35 = vld [vmem:[#allocation56_spill] sm:$0xff] }
 0x5cf   : > { %v4444_v26 = vadd.f32 %v8814_v35, %v8137_v10  ;;  %v8816_v10 = vld [vmem:[#allocation30_spill] sm:$0xff]  ;;  %v8819_v35 = vld [vmem:[#allocation83_spill] sm:$0xff] }
 0x5d0   : > { %v4445_v21 = vadd.f32 %v8816_v10, %v8149_v23  ;;  %v8818_v23 = vld [vmem:[#allocation32_spill] sm:$0xff] }
 0x5d1   : > { %v3964_v61 = vpop.f32.mrf.mxu2 }
 0x5d2   : > { %v8261_v50 = vadd.f32 %v3964_v61, %v3768_v53 }
 0x5d6   : > { %4202 = vmatmul.bf16.gmra.mxu3 %v8263_v15 }
 0x5d9   : > { %v3966_v41 = vpop.f32.mrf.mxu2 }
 0x5da   : > { %v8270_v43 = vadd.f32 %v3966_v41, %v3769_v42  ;;  %v8308_v42 = vpop.f32.mrf.mxu0  ;;  %v4980_v41 = vld [vmem:[#allocation2 + $0x30] sm:$0xff] }
 0x5de   : > { %4865 = vmatmul.bf16.gmra.mxu2 %v8117_v11  ;;  %v4677_v11 = vadd.f32 %v8044_v57, %v4443_v56 }
 0x5e1   : > { %v3969_v32 = vpop.f32.mrf.mxu2 }
 0x5e2   : > { %v8277_v24 = vadd.f32 %v3969_v32, %v3770_v37  ;;  %v8817_v37 = vld [vmem:[#allocation82_spill] sm:$0xff] }
 0x5e3   : > { %v4679_v32 = vadd.f32 %v8817_v37, %v4445_v21  ;;  %v8821_v37 = vld [vmem:[#allocation20_spill] sm:$0xff] }
 0x5e9   : > { %v3971_v7 = vpop.f32.mrf.mxu2 }
 0x5ea   : > { %v8281_v5 = vadd.f32 %v3971_v7, %v3771_v47  ;;  %v4446_v7 = vadd.f32 %v8818_v23, %v8159_v3 }
 0x5ee   : > { %4870 = vmatmul.bf16.gmra.mxu2 %v8141_v2  ;;  %v4678_v2 = vadd.f32 %v8815_v16, %v4444_v26  ;;  %v4680_v26 = vadd.f32 %v8819_v35, %v4446_v7  ;;  %v8820_v16 = vld [vmem:[#allocation61_spill] sm:$0xff] }
 0x5ef   : > { %v4447_v3 = vadd.f32 %v8820_v16, %v8171_v9  ;;  %v4448_v9 = vadd.f32 %v8821_v37, %v8181_v36 }
 0x5f1   : > { %v4831_v44 = vpop.f32.mrf.mxu2  ;;  %v4681_v21 = vadd.f32 %v8108_v45, %v4447_v3  ;;  %v4682_v45 = vadd.f32 %v8121_v0, %v4448_v9 }
 0x5f2   : > { %v4911_v60 = vadd.f32 %v4831_v44, %v4677_v11  ;;  %v4981_v11 = vld [vmem:[#allocation2 + $0x48] sm:$0xff] }
 0x5f4   : > { %v4947_v19 = vadd.f32 %v8290_v49, %v4911_v60  ;;  %v8320_v60 = vpop.f32.mrf.mxu0 }
 0x5f6   : > { %v5011_v53 = vadd.f32 %v4979_v1, %v4947_v19  ;;  %v8323_v1 = vpop.f32.mrf.mxu1 }
 0x5f8   : > { %v5043_v57 = vmax.f32 %v5011_v53, 0.0 }
 0x5f9   : > { %v4833_v61 = vpop.f32.mrf.mxu2 }
 0x5fa   : > { %5075 = vst [vmem:[%s8299_s19] sm:$0xff] %v5043_v57  ;;  %v4912_v29 = vadd.f32 %v4833_v61, %v4678_v2  ;;  %v8326_v57 = vpop.f32.mrf.mxu3  ;;  %v4982_v61 = vld [vmem:[#allocation2 + $0x50] sm:$0xff] }
 0x5fc   : > { %v4948_v55 = vadd.f32 %v8290_v49, %v4912_v29 }
 0x5fe   : > { %v5012_v39 = vadd.f32 %v4980_v41, %v4948_v55  ;;  %4875 = vmatmul.bf16.gmra.mxu2 %v8163_v54  ;;  %v8333_v55 = vpop.f32.mrf.mxu0 }
 0x600   : > { %v5044_v14 = vmax.f32 %v5012_v39, 0.0 }
 0x601   : > { %v4836_v12 = vpop.f32.mrf.mxu2 }
 0x602   : > { %5076 = vst [vmem:[%s8299_s19 + $0x8] sm:$0xff] %v5044_v14  ;;  %v4913_v47 = vadd.f32 %v4836_v12, %v4679_v32  ;;  %v8336_v14 = vpop.f32.mrf.mxu1  ;;  %v8341_v12 = vpop.f32.mrf.mxu3 }
 0x604   : > { %v4949_v56 = vadd.f32 %v8290_v49, %v4913_v47  ;;  %v4983_v47 = vld [vmem:[#allocation2 + $0x68] sm:$0xff] }
 0x606   : > { %v5013_v44 = vadd.f32 %v4981_v11, %v4949_v56  ;;  %v8345_v11 = vpop.f32.mrf.mxu0 }
 0x608   : > { %v5045_v54 = vmax.f32 %v5013_v44, 0.0  ;;  %v4449_v44 = vadd.f32 %v8228_v46, %v8193_v13  ;;  %v4450_v13 = vadd.f32 %v8240_v30, %v8203_v25 }
 0x609   : > { %v4838_v19 = vpop.f32.mrf.mxu2 }
 0x60a   : > { %5077 = vst [vmem:[%s8299_s19 + $0x10] sm:$0xff] %v5045_v54  ;;  %v4914_v53 = vadd.f32 %v4838_v19, %v4680_v26  ;;  %v4984_v54 = vld [vmem:[#allocation2 + $0x70] sm:$0xff]  ;;  %v8350_v35 = vpop.f32.mrf.mxu1  ;;  %v8353_v19 = vpop.f32.mrf.mxu3  ;;  %v4683_v0 = vadd.f32 %v8226_v22, %v4449_v44 }
 0x60c   : > { %v4950_v2 = vadd.f32 %v8290_v49, %v4914_v53 }
 0x60e   : > { %v5014_v29 = vadd.f32 %v4982_v61, %v4950_v2  ;;  %4880 = vmatmul.bf16.gmra.mxu2 %v8185_v20  ;;  %v4393_v2 = vpop.f32.mrf.mxu0  ;;  %v4985_v61 = vld [vmem:[#allocation2 + $0x88] sm:$0xff] }
 0x610   : > { %v5046_v10 = vmax.f32 %v5014_v29, 0.0 }
 0x611   : > { %v4841_v41 = vpop.f32.mrf.mxu2 }
 0x612   : > { %5078 = vst [vmem:[%s8299_s19 + $0x18] sm:$0xff] %v5046_v10  ;;  %v4915_v39 = vadd.f32 %v4841_v41, %v4681_v21  ;;  %v8360_v10 = vpop.f32.mrf.mxu1  ;;  %v4160_v22 = vpop.f32.mrf.mxu3 }
 0x614   : > { %v4951_v32 = vadd.f32 %v8290_v49, %v4915_v39  ;;  %v4684_v39 = vadd.f32 %v8237_v27, %v4450_v13 }
 0x616   : > { %v5015_v20 = vadd.f32 %v4983_v47, %v4951_v32  ;;  %v4986_v32 = vld [vmem:[#allocation2 + $0x90] sm:$0xff] }
 0x618   : > { %v5047_v23 = vmax.f32 %v5015_v20, 0.0  ;;  %v4395_v20 = vpop.f32.mrf.mxu0 }
 0x619   : > { %v4843_v7 = vpop.f32.mrf.mxu2 }
 0x61a   : > { %5079 = vst [vmem:[%s8299_s19 + $0x20] sm:$0xff] %v5047_v23  ;;  %v4916_v56 = vadd.f32 %v4843_v7, %v4682_v45  ;;  %v8823_v23 = vld [vmem:[#allocation58_spill] sm:$0xff] }
 0x61c   : > { %v4952_v36 = vadd.f32 %v8290_v49, %v4916_v56  ;;  %v8372_v56 = vpop.f32.mrf.mxu1 }
 0x61e   : > { %v5016_v26 = vadd.f32 %v4984_v54, %v4952_v36  ;;  %4885 = vmatmul.bf16.gmra.mxu2 %v8207_v17  ;;  %v8822_v17 = vld [vmem:[#allocation80_spill] sm:$0xff] }
 0x61f   : > { %v4216_v21 = vadd.f32 %v8301_v34, %v8822_v17  ;;  %v4217_v34 = vadd.f32 %v8314_v62, %v8823_v23  ;;  %v4988_v17 = vld [vmem:[#allocation2 + $0xb0] sm:$0xff] }
 0x620   : > { %v5048_v53 = vmax.f32 %v5016_v26, 0.0  ;;  %v4987_v26 = vld [vmem:[#allocation2 + $0xa8] sm:$0xff] }
 0x621   : > { %v4846_v16 = vpop.f32.mrf.mxu2  ;;  %v4451_v25 = vadd.f32 %v8308_v42, %v4216_v21  ;;  %v4163_v42 = vpop.f32.mrf.mxu3  ;;  %v4452_v36 = vadd.f32 %v8320_v60, %v4217_v34 }
 0x622   : > { %5080 = vst [vmem:[%s8299_s19 + $0x28] sm:$0xff] %v5048_v53  ;;  %v4917_v3 = vadd.f32 %v4846_v16, %v4683_v0  ;;  %v8824_v53 = vld [vmem:[#allocation59_spill] sm:$0xff] }
 0x623   : > { %v4685_v27 = vadd.f32 %v8311_v48, %v4451_v25  ;;  %v4218_v0 = vadd.f32 %v8326_v57, %v8824_v53  ;;  %v4686_v16 = vadd.f32 %v8323_v1, %v4452_v36  ;;  %v4398_v48 = vpop.f32.mrf.mxu0  ;;  %v8825_v57 = vld [vmem:[#allocation34_spill] sm:$0xff]  ;;  %v8827_v53 = vld [vmem:[#allocation63_spill] sm:$0xff] }
 0x624   : > { %v4953_v46 = vadd.f32 %v8290_v49, %v4917_v3 }
 0x626   : > { %v5017_v29 = vadd.f32 %v4985_v61, %v4953_v46  ;;  %v8381_v46 = vpop.f32.mrf.mxu1  ;;  %v4453_v61 = vadd.f32 %v8333_v55, %v4218_v0  ;;  %v4221_v0 = vadd.f32 %v4160_v22, %v8827_v53 }
 0x628   : > { %v5049_v41 = vmax.f32 %v5017_v29, 0.0 }
 0x629   : > { %v4848_v37 = vpop.f32.mrf.mxu2  ;;  %v4165_v29 = vpop.f32.mrf.mxu3 }
 0x62a   : > { %5081 = vst [vmem:[%s8299_s19 + $0x30] sm:$0xff] %v5049_v41  ;;  %v4918_v9 = vadd.f32 %v4848_v37, %v4684_v39  ;;  %v4219_v41 = vadd.f32 %v8341_v12, %v8825_v57  ;;  %v4687_v39 = vadd.f32 %v8336_v14, %v4453_v61  ;;  %v4991_v61 = vld [vmem:[#allocation2 + $0xe8] sm:$0xff]  ;;  %v4740_v57 = vld [vmem:[#allocation3 + $0x231] sm:$0xff] }
 0x62b   : > { %v4400_v25 = vpop.f32.mrf.mxu0 }
 0x62c   : > { %v4954_v30 = vadd.f32 %v8290_v49, %v4918_v9  ;;  %v4454_v55 = vadd.f32 %v8345_v11, %v4219_v41 }
 0x62e   : > { %v5018_v47 = vadd.f32 %v4986_v32, %v4954_v30  ;;  %4890 = vmatmul.bf16.gmra.mxu2 %v8223_v59  ;;  %v4989_v32 = vld [vmem:[#allocation2 + $0xc8] sm:$0xff] }
 0x630   : > { %v5050_v45 = vmax.f32 %v5018_v47, 0.0  ;;  %v4634_v47 = vpop.f32.mrf.mxu1 }
 0x631   : > { %v4851_v7 = vpop.f32.mrf.mxu2  ;;  %v4168_v34 = vpop.f32.mrf.mxu3 }
 0x632   : > { %5082 = vst [vmem:[%s8299_s19 + $0x38] sm:$0xff] %v5050_v45  ;;  %v4919_v44 = vadd.f32 %v4851_v7, %v4685_v27  ;;  %v4688_v27 = vadd.f32 %v8350_v35, %v4454_v55 }
 0x633   : > { %v4403_v11 = vpop.f32.mrf.mxu0 }
 0x634   : > { %v4955_v54 = vadd.f32 %v8290_v49, %v4919_v44 }
 0x636   : > { %v5019_v59 = vadd.f32 %v4987_v26, %v4955_v54  ;;  %v4990_v54 = vld [vmem:[#allocation2 + $0xd0] sm:$0xff] }
 0x638   : > { %v5051_v62 = vmax.f32 %v5019_v59, 0.0  ;;  %v4637_v59 = vpop.f32.mrf.mxu1 }
 0x639   : > { %v4853_v3 = vpop.f32.mrf.mxu2 }
 0x63a   : > { %5083 = vst [vmem:[%s8299_s19 + $0x40] sm:$0xff] %v5051_v62  ;;  %v4920_v13 = vadd.f32 %v4853_v3, %v4686_v16  ;;  %v4170_v16 = vpop.f32.mrf.mxu3 }
 0x63c   : > { %v4956_v60 = vadd.f32 %v8290_v49, %v4920_v13  ;;  %v4456_v13 = vadd.f32 %v4395_v20, %v4221_v0 }
 0x63e   : > { %v5020_v21 = vadd.f32 %v4988_v17, %v4956_v60  ;;  %4895 = vmatmul.bf16.gmra.mxu2 %v8247_v18  ;;  %v8826_v18 = vld [vmem:[#allocation37_spill] sm:$0xff]  ;;  %v4405_v17 = vpop.f32.mrf.mxu0  ;;  %v4690_v22 = vadd.f32 %v8372_v56, %v4456_v13 }
 0x63f   : > { %v4220_v45 = vadd.f32 %v8353_v19, %v8826_v18  ;;  %v4223_v18 = vadd.f32 %v4165_v29, %v8129_v31 }
 0x640   : > { %v5052_v1 = vmax.f32 %v5020_v21, 0.0  ;;  %v4739_v21 = vld [vmem:[#allocation3 + $0x229] sm:$0xff] }
 0x641   : > { %v4856_v37 = vpop.f32.mrf.mxu2  ;;  %v4455_v44 = vadd.f32 %v4393_v2, %v4220_v45 }
 0x642   : > { %5084 = vst [vmem:[%s8299_s19 + $0x48] sm:$0xff] %v5052_v1  ;;  %v4921_v9 = vadd.f32 %v4856_v37, %v4687_v39  ;;  %v4173_v55 = vpop.f32.mrf.mxu3 }
 0x643   : > { %v4689_v19 = vadd.f32 %v8360_v10, %v4455_v44  ;;  %v4639_v10 = vpop.f32.mrf.mxu1 }
 0x644   : > { %v4957_v30 = vadd.f32 %v8290_v49, %v4921_v9  ;;  %v4756_v9 = vpack.c.bf16 %v4740_v57, %v4739_v21 }
 0x646   : > { %v5021_v23 = vadd.f32 %v4989_v32, %v4957_v30  ;;  %v4992_v32 = vld [vmem:[#allocation2 + $0xf0] sm:$0xff]  ;;  %v4408_v56 = vpop.f32.mrf.mxu0 }
 0x648   : > { %v5053_v12 = vmax.f32 %v5021_v23, 0.0 }
 0x649   : > { %v4858_v14 = vpop.f32.mrf.mxu2 }
 0x64a   : > { %5085 = vst [vmem:[%s8299_s19 + $0x50] sm:$0xff] %v5053_v12  ;;  %v4922_v7 = vadd.f32 %v4858_v14, %v4688_v27 }
 0x64b   : > { %v4642_v14 = vpop.f32.mrf.mxu1 }
 0x64c   : > { %v4958_v36 = vadd.f32 %v8290_v49, %v4922_v7  ;;  %v4458_v7 = vadd.f32 %v4400_v25, %v4223_v18 }
 0x64e   : > { %v5022_v26 = vadd.f32 %v4990_v54, %v4958_v36  ;;  %4900 = vmatmul.bf16.gmra.mxu2 %v8263_v15  ;;  %v8828_v15 = vld [vmem:[#allocation86_spill] sm:$0xff]  ;;  %v4993_v36 = vld [vmem:[#allocation2 + $0x108] sm:$0xff]  ;;  %v4692_v31 = vadd.f32 %v4634_v47, %v4458_v7 }
 0x64f   : > { %v4222_v41 = vadd.f32 %v4163_v42, %v8828_v15  ;;  %v4995_v15 = vld [vmem:[#allocation2 + $0x128] sm:$0xff] }
 0x650   : > { %v5054_v62 = vmax.f32 %v5022_v26, 0.0  ;;  %v4224_v26 = vadd.f32 %v4168_v34, %v8139_v6 }
 0x651   : > { %v4861_v35 = vpop.f32.mrf.mxu2  ;;  %v4457_v20 = vadd.f32 %v4398_v48, %v4222_v41  ;;  %v4175_v48 = vpop.f32.mrf.mxu3 }
 0x652   : > { %5086 = vst [vmem:[%s8299_s19 + $0x58] sm:$0xff] %v5054_v62  ;;  %v4923_v3 = vadd.f32 %v4861_v35, %v4689_v19  ;;  %v4459_v62 = vadd.f32 %v4403_v11, %v4224_v26  ;;  %v4994_v35 = vld [vmem:[#allocation2 + $0x110] sm:$0xff] }
 0x653   : > { %v4691_v42 = vadd.f32 %v8381_v46, %v4457_v20  ;;  %v4410_v46 = vpop.f32.mrf.mxu0  ;;  %v4996_v20 = vld [vmem:[#allocation2 + $0x130] sm:$0xff] }
 0x654   : > { %v4959_v2 = vadd.f32 %v8290_v49, %v4923_v3  ;;  %v4644_v3 = vpop.f32.mrf.mxu1 }
 0x656   : > { %v5023_v60 = vadd.f32 %v4991_v61, %v4959_v2  ;;  %v4225_v2 = vadd.f32 %v4170_v16, %v8151_v51 }
 0x658   : > { %v5055_v1 = vmax.f32 %v5023_v60, 0.0  ;;  %v4693_v60 = vadd.f32 %v4637_v59, %v4459_v62  ;;  %v4460_v47 = vadd.f32 %v4405_v17, %v4225_v2 }
 0x659   : > { %v4863_v39 = vpop.f32.mrf.mxu2  ;;  %v4178_v13 = vpop.f32.mrf.mxu3 }
 0x65a   : > { %5087 = vst [vmem:[%s8299_s19 + $0x60] sm:$0xff] %v5055_v1  ;;  %v4924_v37 = vadd.f32 %v4863_v39, %v4690_v22  ;;  %v4226_v1 = vadd.f32 %v4173_v55, %v8161_v52  ;;  %v4694_v39 = vadd.f32 %v4639_v10, %v4460_v47  ;;  %v4228_v7 = vadd.f32 %v4178_v13, %v8183_v4 }
 0x65b   : > { %v4413_v57 = vpop.f32.mrf.mxu0 }
 0x65c   : > { %v4960_v30 = vadd.f32 %v8290_v49, %v4924_v37  ;;  %v4647_v41 = vpop.f32.mrf.mxu1  ;;  %v4461_v59 = vadd.f32 %v4408_v56, %v4226_v1  ;;  %v4463_v26 = vadd.f32 %v4413_v57, %v4228_v7 }
 0x65e   : > { %v5024_v23 = vadd.f32 %v4992_v32, %v4960_v30  ;;  %4905 = vmatmul.bf16.gmra.mxu2 %v4756_v9  ;;  %v4227_v32 = vadd.f32 %v4175_v48, %v8173_v8  ;;  %v4695_v18 = vadd.f32 %v4642_v14, %v4461_v59 }
 0x660   : > { %v5056_v45 = vmax.f32 %v5024_v23, 0.0 }
 0x661   : > { %v4866_v12 = vpop.f32.mrf.mxu2  ;;  %v4180_v37 = vpop.f32.mrf.mxu3 }
 0x662   : > { %5088 = vst [vmem:[%s8299_s19 + $0x68] sm:$0xff] %v5056_v45  ;;  %v4925_v27 = vadd.f32 %v4866_v12, %v4691_v42  ;;  %v4462_v42 = vadd.f32 %v4410_v46, %v4227_v32  ;;  %v8829_v46 = vld [vmem:[#allocation39_spill] sm:$0xff] }
 0x663   : > { %v4415_v30 = vpop.f32.mrf.mxu0  ;;  %v4229_v62 = vadd.f32 %v4180_v37, %v8829_v46  ;;  %v5003_v46 = vld [vmem:[#allocation2 + $0x1a8] sm:$0xff] }
 0x664   : > { %v4961_v44 = vadd.f32 %v8290_v49, %v4925_v27  ;;  %v4649_v52 = vpop.f32.mrf.mxu1  ;;  %v4997_v27 = vld [vmem:[#allocation2 + $0x148] sm:$0xff] }
 0x665   : > { %v4464_v13 = vadd.f32 %v4415_v30, %v4229_v62 }
 0x666   : > { %v5025_v54 = vadd.f32 %v4993_v36, %v4961_v44  ;;  %v4696_v36 = vadd.f32 %v4644_v3, %v4462_v42 }
 0x667   : > { %v4698_v57 = vadd.f32 %v4649_v52, %v4464_v13 }
 0x668   : > { %v5057_v53 = vmax.f32 %v5025_v54, 0.0 }
 0x669   : > { %v4868_v29 = vpop.f32.mrf.mxu2  ;;  %v4183_v10 = vpop.f32.mrf.mxu3 }
 0x66a   : > { %5089 = vst [vmem:[%s8299_s19 + $0x70] sm:$0xff] %v5057_v53  ;;  %v4926_v0 = vadd.f32 %v4868_v29, %v4692_v31  ;;  %v4998_v29 = vld [vmem:[#allocation2 + $0x150] sm:$0xff]  ;;  %v4230_v47 = vadd.f32 %v4183_v10, %v8205_v63 }
 0x66b   : > { %v4418_v54 = vpop.f32.mrf.mxu0 }
 0x66c   : > { %v4962_v19 = vadd.f32 %v8290_v49, %v4926_v0  ;;  %v4652_v14 = vpop.f32.mrf.mxu1 }
 0x66e   : > { %v5026_v25 = vadd.f32 %v4994_v35, %v4962_v19  ;;  %v4697_v35 = vadd.f32 %v4647_v41, %v4463_v26  ;;  %v4465_v41 = vadd.f32 %v4418_v54, %v4230_v47 }
 0x670   : > { %v5058_v61 = vmax.f32 %v5026_v25, 0.0 }
 0x671   : > { %v4871_v6 = vpop.f32.mrf.mxu2  ;;  %v4185_v31 = vpop.f32.mrf.mxu3 }
 0x672   : > { %5090 = vst [vmem:[%s8299_s19 + $0x78] sm:$0xff] %v5058_v61  ;;  %v4927_v34 = vadd.f32 %v4871_v6, %v4693_v60  ;;  %v4999_v61 = vld [vmem:[#allocation2 + $0x168] sm:$0xff] }
 0x673   : > { %v4420_v3 = vpop.f32.mrf.mxu0 }
 0x674   : > { %v4963_v21 = vadd.f32 %v8290_v49, %v4927_v34  ;;  %v4654_v60 = vpop.f32.mrf.mxu1 }
 0x676   : > { %v5027_v11 = vadd.f32 %v4995_v15, %v4963_v21 }
 0x678   : > { %v5059_v22 = vmax.f32 %v5027_v11, 0.0 }
 0x679   : > { %v4873_v51 = vpop.f32.mrf.mxu2  ;;  %v4188_v34 = vpop.f32.mrf.mxu3 }
 0x67a   : > { %5091 = vst [vmem:[%s8299_s19 + $0x80] sm:$0xff] %v5059_v22  ;;  %v4928_v16 = vadd.f32 %v4873_v51, %v4694_v39  ;;  %v5000_v39 = vld [vmem:[#allocation2 + $0x170] sm:$0xff]  ;;  %v4232_v52 = vadd.f32 %v4188_v34, %v8221_v33 }
 0x67b   : > { %v4423_v22 = vpop.f32.mrf.mxu0 }
 0x67c   : > { %v4964_v9 = vadd.f32 %v8290_v49, %v4928_v16  ;;  %v4657_v51 = vpop.f32.mrf.mxu1  ;;  %v4231_v16 = vadd.f32 %v4185_v31, %v8214_v58 }
 0x67e   : > { %v5028_v17 = vadd.f32 %v4996_v20, %v4964_v9  ;;  %v4699_v9 = vadd.f32 %v4652_v14, %v4465_v41  ;;  %v4466_v30 = vadd.f32 %v4420_v3, %v4231_v16 }
 0x680   : > { %v5060_v23 = vmax.f32 %v5028_v17, 0.0  ;;  %v4700_v10 = vadd.f32 %v4654_v60, %v4466_v30  ;;  %v5006_v30 = vld [vmem:[#allocation2 + $0x1d0] sm:$0xff] }
 0x681   : > { %v4876_v45 = vpop.f32.mrf.mxu2  ;;  %v4190_v20 = vpop.f32.mrf.mxu3 }
 0x682   : > { %5092 = vst [vmem:[%s8299_s19 + $0x88] sm:$0xff] %v5060_v23  ;;  %v4929_v55 = vadd.f32 %v4876_v45, %v4695_v18  ;;  %v5001_v23 = vld [vmem:[#allocation2 + $0x188] sm:$0xff]  ;;  %v4233_v54 = vadd.f32 %v4190_v20, %v8234_v38 }
 0x683   : > { %v4425_v45 = vpop.f32.mrf.mxu0 }
 0x684   : > { %v4965_v12 = vadd.f32 %v8290_v49, %v4929_v55  ;;  %v4659_v58 = vpop.f32.mrf.mxu1  ;;  %v4468_v31 = vadd.f32 %v4425_v45, %v4233_v54 }
 0x686   : > { %v5029_v56 = vadd.f32 %v4997_v27, %v4965_v12 }
 0x688   : > { %v5061_v44 = vmax.f32 %v5029_v56, 0.0  ;;  %v4467_v56 = vadd.f32 %v4423_v22, %v4232_v52  ;;  %v5005_v22 = vld [vmem:[#allocation2 + $0x1c8] sm:$0xff] }
 0x689   : > { %v4878_v8 = vpop.f32.mrf.mxu2  ;;  %v4193_v27 = vpop.f32.mrf.mxu3 }
 0x68a   : > { %5093 = vst [vmem:[%s8299_s19 + $0x90] sm:$0xff] %v5061_v44  ;;  %v4930_v48 = vadd.f32 %v4878_v8, %v4696_v36  ;;  %v5002_v44 = vld [vmem:[#allocation2 + $0x190] sm:$0xff] }
 0x68b   : > { %v4428_v14 = vpop.f32.mrf.mxu0 }
 0x68c   : > { %v4966_v53 = vadd.f32 %v8290_v49, %v4930_v48  ;;  %v4701_v48 = vadd.f32 %v4657_v51, %v4467_v56 }
 0x68e   : > { %v5030_v0 = vadd.f32 %v4998_v29, %v4966_v53  ;;  %v4662_v53 = vpop.f32.mrf.mxu1 }
 0x690   : > { %v5062_v19 = vmax.f32 %v5030_v0, 0.0 }
 0x691   : > { %v4881_v4 = vpop.f32.mrf.mxu2  ;;  %v4195_v0 = vpop.f32.mrf.mxu3 }
 0x692   : > { %5094 = vst [vmem:[%s8299_s19 + $0x98] sm:$0xff] %v5062_v19  ;;  %v4931_v25 = vadd.f32 %v4881_v4, %v4697_v35  ;;  %v4234_v19 = vadd.f32 %v4193_v27, %v8245_v40  ;;  %v4702_v4 = vadd.f32 %v4659_v58, %v4468_v31  ;;  %v4235_v47 = vadd.f32 %v4195_v0, %v8254_v28  ;;  %v5007_v27 = vld [vmem:[#allocation2 + $0x1e8] sm:$0xff] }
 0x693   : > { %v4430_v3 = vpop.f32.mrf.mxu0 }
 0x694   : > { %v4967_v2 = vadd.f32 %v8290_v49, %v4931_v25  ;;  %v4469_v13 = vadd.f32 %v4428_v14, %v4234_v19 }
 0x696   : > { %v5031_v6 = vadd.f32 %v4999_v61, %v4967_v2  ;;  %v5004_v61 = vld [vmem:[#allocation2 + $0x1b0] sm:$0xff]  ;;  %v4664_v60 = vpop.f32.mrf.mxu1 }
 0x698   : > { %v5063_v21 = vmax.f32 %v5031_v6, 0.0 }
 0x699   : > { %v4883_v15 = vpop.f32.mrf.mxu2  ;;  %v4198_v34 = vpop.f32.mrf.mxu3 }
 0x69a   : > { %5095 = vst [vmem:[%s8299_s19 + $0xa0] sm:$0xff] %v5063_v21  ;;  %v4932_v11 = vadd.f32 %v4883_v15, %v4698_v57  ;;  %v4703_v57 = vadd.f32 %v4662_v53, %v4469_v13  ;;  %v4236_v51 = vadd.f32 %v4198_v34, %v8261_v50  ;;  %v5008_v53 = vld [vmem:[#allocation2 + $0x1f0] sm:$0xff] }
 0x69c   : > { %v4968_v1 = vadd.f32 %v8290_v49, %v4932_v11  ;;  %v4470_v11 = vadd.f32 %v4430_v3, %v4235_v47 }
 0x69e   : > { %v5032_v37 = vadd.f32 %v5000_v39, %v4968_v1  ;;  %v4433_v1 = vpop.f32.mrf.mxu0 }
 0x6a0   : > { %v5064_v59 = vmax.f32 %v5032_v37, 0.0  ;;  %v4667_v37 = vpop.f32.mrf.mxu1 }
 0x6a1   : > { %v4886_v63 = vpop.f32.mrf.mxu2 }
 0x6a2   : > { %5096 = vst [vmem:[%s8299_s19 + $0xa8] sm:$0xff] %v5064_v59  ;;  %v4933_v17 = vadd.f32 %v4886_v63, %v4699_v9  ;;  %v4704_v59 = vadd.f32 %v4664_v60, %v4470_v11  ;;  %v4200_v9 = vpop.f32.mrf.mxu3  ;;  %v4471_v63 = vadd.f32 %v4433_v1, %v4236_v51 }
 0x6a4   : > { %v4969_v32 = vadd.f32 %v8290_v49, %v4933_v17  ;;  %v4705_v52 = vadd.f32 %v4667_v37, %v4471_v63 }
 0x6a6   : > { %v5033_v18 = vadd.f32 %v5001_v23, %v4969_v32  ;;  %v4435_v23 = vpop.f32.mrf.mxu0 }
 0x6a8   : > { %v5065_v55 = vmax.f32 %v5033_v18, 0.0  ;;  %v4237_v18 = vadd.f32 %v4200_v9, %v8270_v43 }
 0x6a9   : > { %v4888_v42 = vpop.f32.mrf.mxu2 }
 0x6aa   : > { %5097 = vst [vmem:[%s8299_s19 + $0xb0] sm:$0xff] %v5065_v55  ;;  %v4934_v12 = vadd.f32 %v4888_v42, %v4700_v10  ;;  %v4669_v10 = vpop.f32.mrf.mxu1  ;;  %v4203_v42 = vpop.f32.mrf.mxu3  ;;  %v4472_v58 = vadd.f32 %v4435_v23, %v4237_v18 }
 0x6ac   : > { %v4970_v7 = vadd.f32 %v8290_v49, %v4934_v12  ;;  %v4706_v54 = vadd.f32 %v4669_v10, %v4472_v58 }
 0x6ae   : > { %v5034_v36 = vadd.f32 %v5002_v44, %v4970_v7  ;;  %v4438_v7 = vpop.f32.mrf.mxu0  ;;  %v4238_v44 = vadd.f32 %v4203_v42, %v8277_v24 }
 0x6b0   : > { %v5066_v8 = vmax.f32 %v5034_v36, 0.0  ;;  %v4473_v14 = vadd.f32 %v4438_v7, %v4238_v44 }
 0x6b1   : > { %v4891_v33 = vpop.f32.mrf.mxu2 }
 0x6b2   : > { %5098 = vst [vmem:[%s8299_s19 + $0xb8] sm:$0xff] %v5066_v8  ;;  %v4935_v26 = vadd.f32 %v4891_v33, %v4701_v48  ;;  %v4672_v48 = vpop.f32.mrf.mxu1 }
 0x6b4   : > { %v4971_v29 = vadd.f32 %v8290_v49, %v4935_v26  ;;  %v4205_v26 = vpop.f32.mrf.mxu3 }
 0x6b5   : > { %v4239_v0 = vadd.f32 %v4205_v26, %v8281_v5  ;;  %v5010_v5 = vld [vmem:[#allocation2 + $0x210] sm:$0xff] }
 0x6b6   : > { %v5035_v62 = vadd.f32 %v5003_v46, %v4971_v29  ;;  %v4707_v29 = vadd.f32 %v4672_v48, %v4473_v14 }
 0x6b8   : > { %v5067_v35 = vmax.f32 %v5035_v62, 0.0  ;;  %v4440_v62 = vpop.f32.mrf.mxu0 }
 0x6b9   : > { %v4893_v38 = vpop.f32.mrf.mxu2 }
 0x6ba   : > { %5099 = vst [vmem:[%s8299_s19 + $0xc0] sm:$0xff] %v5067_v35  ;;  %v4936_v25 = vadd.f32 %v4893_v38, %v4702_v4  ;;  %v4474_v35 = vadd.f32 %v4440_v62, %v4239_v0  ;;  %v4674_v38 = vpop.f32.mrf.mxu1 }
 0x6bc   : > { %v4972_v2 = vadd.f32 %v8290_v49, %v4936_v25  ;;  %v5009_v25 = vld [vmem:[#allocation2 + $0x208] sm:$0xff]  ;;  %v4708_v13 = vadd.f32 %v4674_v38, %v4474_v35 }
 0x6be   : > { %v5036_v6 = vadd.f32 %v5004_v61, %v4972_v2 }
 0x6c0   : > { %v5068_v21 = vmax.f32 %v5036_v6, 0.0 }
 0x6c1   : > { %v4896_v40 = vpop.f32.mrf.mxu2 }
 0x6c2   : > { %5100 = vst [vmem:[%s8299_s19 + $0xc8] sm:$0xff] %v5068_v21  ;;  %v4937_v15 = vadd.f32 %v4896_v40, %v4703_v57 }
 0x6c4   : > { %v4973_v41 = vadd.f32 %v8290_v49, %v4937_v15 }
 0x6c6   : > { %v5037_v39 = vadd.f32 %v5005_v22, %v4973_v41 }
 0x6c8   : > { %v5069_v16 = vmax.f32 %v5037_v39, 0.0 }
 0x6c9   : > { %v4898_v28 = vpop.f32.mrf.mxu2 }
 0x6ca   : > { %5101 = vst [vmem:[%s8299_s19 + $0xd0] sm:$0xff] %v5069_v16  ;;  %v4938_v20 = vadd.f32 %v4898_v28, %v4704_v59 }
 0x6cc   : > { %v4974_v17 = vadd.f32 %v8290_v49, %v4938_v20 }
 0x6ce   : > { %v5038_v32 = vadd.f32 %v5006_v30, %v4974_v17 }
 0x6d0   : > { %v5070_v45 = vmax.f32 %v5038_v32, 0.0 }
 0x6d1   : > { %v4901_v55 = vpop.f32.mrf.mxu2 }
 0x6d2   : > { %5102 = vst [vmem:[%s8299_s19 + $0xd8] sm:$0xff] %v5070_v45  ;;  %v4939_v50 = vadd.f32 %v4901_v55, %v4705_v52 }
 0x6d4   : > { %v4975_v12 = vadd.f32 %v8290_v49, %v4939_v50 }
 0x6d6   : > { %v5039_v56 = vadd.f32 %v5007_v27, %v4975_v12 }
 0x6d8   : > { %v5071_v36 = vmax.f32 %v5039_v56, 0.0 }
 0x6d9   : > { %v4903_v43 = vpop.f32.mrf.mxu2 }
 0x6da   : > { %5103 = vst [vmem:[%s8299_s19 + $0xe0] sm:$0xff] %v5071_v36  ;;  %v4940_v8 = vadd.f32 %v4903_v43, %v4706_v54 }
 0x6dc   : > { %v4976_v33 = vadd.f32 %v8290_v49, %v4940_v8 }
 0x6de   : > { %v5040_v31 = vadd.f32 %v5008_v53, %v4976_v33 }
 0x6e0   : > { %v5072_v46 = vmax.f32 %v5040_v31, 0.0 }
 0x6e1   : > { %v4906_v24 = vpop.f32.mrf.mxu2 }
 0x6e2   : > { %5104 = vst [vmem:[%s8299_s19 + $0xe8] sm:$0xff] %v5072_v46  ;;  %v4941_v19 = vadd.f32 %v4906_v24, %v4707_v29 }
 0x6e4   : > { %v4977_v4 = vadd.f32 %v8290_v49, %v4941_v19 }
 0x6e6   : > { %v5041_v3 = vadd.f32 %v5009_v25, %v4977_v4 }
 0x6e8   : > { %v5073_v2 = vmax.f32 %v5041_v3, 0.0 }
 0x6e9   : > { %v4908_v61 = vpop.f32.mrf.mxu2 }
 0x6ea   : > { %5105 = vst [vmem:[%s8299_s19 + $0xf0] sm:$0xff] %v5073_v2  ;;  %v4942_v60 = vadd.f32 %v4908_v61, %v4708_v13 }
 0x6ec   : > { %v4978_v6 = vadd.f32 %v8290_v49, %v4942_v60 }
 0x6ee   : > { %v5042_v34 = vadd.f32 %v5010_v5, %v4978_v6 }
 0x6f0   : > { %v5074_v47 = vmax.f32 %v5042_v34, 0.0 }
 0x6f2   : > { %5106 = vst [vmem:[%s8299_s19 + $0xf8] sm:$0xff] %v5074_v47 }
 0x6f3 PF: > { %s18_s24 = sadd.s32 1, %s6249_s24  }
 0x6f4   : > { %p15_p7 = scmp.ge.s32.totalorder %s18_s24, 4  }
 0x6f6   :  { %17 = sbr.rel (!%p15_p7) target bundleno = 1 (0x1), region = 103 }
 0x6fb   :  { %5128 = vsyncpa [#allocation5], 1 }
 0x6fc   :  { %5130 = vsyncpa [#allocation5 + $0x1], 1 }

</bundles_post_ra>
